<compile_context>
chip_gen: v7x
topology: tpu7x:2x2x1
jax: 0.10.0
libtpu: 0.0.40
codegen_flags: <defaults>
</compile_context>

<pallas_src>
import functools

import jax
import jax.numpy as jnp
from jax.experimental import pallas as pl
from jax.experimental.pallas import tpu as pltpu


# ----------------------------------------------------------------------------
# Fused SSA kernel: one (batch-block, time-step) per grid point.
# LIF state is carried across the (innermost, "arbitrary") T grid axis in VMEM scratch.
# ----------------------------------------------------------------------------
def _ssa_kernel(x_ref, wqkv_ref, bqkv_ref, wproj_ref, bproj_ref, mask_ref,
                o_ref, vq_ref, vk_ref, vv_ref, va_ref, vp_ref,
                *, tau, v_th, attn_v_th):
    # x_ref    : (1, Bc, C, N) f32   natural layout (channels on sublanes, tokens on lanes)
    # wqkv_ref : (C, 3C) bf16        bqkv_ref : (1, 3C) f32   (BN folded)
    # wproj_ref: (C, C)  bf16        bproj_ref: (1, C)  f32   (BN + conv bias folded)
    # mask_ref : (C, C)  f32         per-head block-diagonal mask, pre-multiplied by 0.125
    # o_ref    : (1, Bc, C, N) f32
    # v*_ref   : (Bc*N, C) f32       LIF membrane state, persistent across the T grid axis
    bc, c, n = x_ref.shape[1], x_ref.shape[2], x_ref.shape[3]
    m = bc * n
    inv_tau = 1.0 / tau

    # Zero all membrane states at the first time step of each batch block.
    @pl.when(pl.program_id(1) == 0)
    def _init():
        z = jnp.zeros((m, c), jnp.float32)
        vq_ref[...] = z
        vk_ref[...] = z
        vv_ref[...] = z
        va_ref[...] = z
        vp_ref[...] = z

    def lif(v_ref, drive, thr):
        # spikingjelly LIF (f32): charge, threshold, hard reset to 0 as predicated selects.
        h = v_ref[...] + (drive - v_ref[...]) * inv_tau
        spk = h >= thr
        v_ref[...] = jnp.where(spk, jnp.float32(0.0), h)
        return spk

    # (Bc, C, N) -> (Bc*N, C): in-tile XLU transpose + leading-dim merge, then bf16 for MXU.
    # (In Spikformer the SSA input is itself a binary spike map, so bf16 is exact there.)
    xt = jnp.transpose(x_ref[0], (0, 2, 1)).reshape(m, c).astype(jnp.bfloat16)

    # --- q/k/v 1x1 conv + folded BN: one stacked bf16 MXU matmul (M = Bc*N) --------------
    qkv = jnp.dot(xt, wqkv_ref[...], preferred_element_type=jnp.float32) + bqkv_ref[...]

    sq = lif(vq_ref, qkv[:, :c], v_th).astype(jnp.bfloat16)
    sk = lif(vk_ref, qkv[:, c:2 * c], v_th).astype(jnp.bfloat16)
    sv = lif(vv_ref, qkv[:, 2 * c:], v_th).astype(jnp.bfloat16)

    # --- spiking self-attention ----------------------------------------------------------
    # Full C x C spike Gram (k^T v) masked to the per-head block diagonal == independent
    # per-head attention, done as full-width MXU ops.  Spike counts (<= N) are exact in
    # bf16 iff N <= 256; otherwise keep the second matmul's operands in f32.
    exact_bf16 = n <= 256
    mask = mask_ref[...]                         # 0.125 scale already folded in
    if bc == 1:
        kv = jax.lax.dot_general(sk, sv, (((0,), (0,)), ((), ())),
                                 preferred_element_type=jnp.float32)          # (C, C)
        kv = kv * mask
        attn = jnp.dot(sq if exact_bf16 else sq.astype(jnp.float32),
                       kv.astype(jnp.bfloat16) if exact_bf16 else kv,
                       preferred_element_type=jnp.float32)                    # (N, C)
    else:
        sk3 = sk.reshape(bc, n, c)
        sv3 = sv.reshape(bc, n, c)
        sq3 = sq.reshape(bc, n, c)
        kv = jax.lax.dot_general(sk3, sv3, (((1,), (1,)), ((0,), (0,))),
                                 preferred_element_type=jnp.float32)          # (Bc, C, C)
        kv = kv * mask
        attn = jax.lax.dot_general(
            sq3 if exact_bf16 else sq3.astype(jnp.float32),
            kv.astype(jnp.bfloat16) if exact_bf16 else kv,
            (((2,), (1,)), ((0,), (0,))),
            preferred_element_type=jnp.float32).reshape(m, c)                 # (Bc*N, C)

    sa = lif(va_ref, attn, attn_v_th).astype(jnp.bfloat16)                    # v_th = 0.5

    # --- proj 1x1 conv (+bias) + folded BN + LIF ------------------------------------------
    p_in = jnp.dot(sa, wproj_ref[...], preferred_element_type=jnp.float32) + bproj_ref[...]
    sp = lif(vp_ref, p_in, v_th)

    # (Bc*N, C) -> (Bc, C, N): transpose back so the HBM store keeps N (= H*W) on lanes.
    o_ref[0] = jnp.transpose(sp.astype(o_ref.dtype).reshape(bc, n, c), (0, 2, 1))


# ----------------------------------------------------------------------------
# Wrapper: natural layout (no HBM transposes), grid = (B // Bc, T).
# ----------------------------------------------------------------------------
def _pick_batch_block(batch, tokens, target_rows=256):
    """Stack Bc batch elements per grid step so the matmul M dim ~ target_rows,
    while keeping >= 2 parallel grid slices for dual-TensorCore chips."""
    want = max(1, target_rows // max(tokens, 1))
    bc = 1
    for d in range(1, batch + 1):
        if batch % d == 0 and d <= want:
            bc = d
    while bc > 1 and batch // bc < 2:
        bc -= 1
        while bc > 1 and batch % bc != 0:
            bc -= 1
    return max(bc, 1)


def ssa_forward(x_tbchw, params, num_heads, batch_block=None):
    T, B, C, H, W = x_tbchw.shape
    assert C % num_heads == 0
    N = H * W

    # Pure reshape — no HBM transpose (the kernel works in the natural (T, B, C, N) layout).
    x = x_tbchw.reshape(T, B, C, N)

    if batch_block is None:
        batch_block = _pick_batch_block(B, N)
    assert B % batch_block == 0
    nb = B // batch_block

    head = jnp.arange(C) // (C // num_heads)
    mask = (head[:, None] == head[None, :]).astype(jnp.float32) * 0.125   # scale folded in

    kern = functools.partial(_ssa_kernel, tau=2.0, v_th=1.0, attn_v_th=0.5)

    out = pl.pallas_call(
        kern,
        out_shape=jax.ShapeDtypeStruct((T, B, C, N), jnp.float32),
        grid=(nb, T),                 # T innermost: LIF state carried in VMEM scratch
        in_specs=[
            pl.BlockSpec((1, batch_block, C, N), lambda b, t: (t, b, 0, 0)),
            pl.BlockSpec((C, 3 * C), lambda b, t: (0, 0)),
            pl.BlockSpec((1, 3 * C), lambda b, t: (0, 0)),
            pl.BlockSpec((C, C), lambda b, t: (0, 0)),
            pl.BlockSpec((1, C), lambda b, t: (0, 0)),
            pl.BlockSpec((C, C), lambda b, t: (0, 0)),
        ],
        out_specs=pl.BlockSpec((1, batch_block, C, N), lambda b, t: (t, b, 0, 0)),
        scratch_shapes=[pltpu.VMEM((batch_block * N, C), jnp.float32)] * 5,
        compiler_params=pltpu.CompilerParams(
            dimension_semantics=("parallel", "arbitrary"),
            vmem_limit_bytes=48 * 1024 * 1024,   # explicit headroom, below v7x 64 MiB physical
        ),
    )(x, params["wqkv"], params["bqkv"], params["wproj"], params["bproj"], mask)

    return out.reshape(T, B, C, H, W)


# ----------------------------------------------------------------------------
# Deterministic parameters: Conv1d weights + inference-mode BN folded in.
# ----------------------------------------------------------------------------
def init_params(key, dim):
    keys = jax.random.split(key, 9)
    eps = 1e-5

    def conv_w(k, cin, cout):
        return jax.random.normal(k, (cout, cin), jnp.float32) / jnp.sqrt(cin)

    def bn_stats(k, c):
        kg, kb, km, kvv = jax.random.split(k, 4)
        gamma = 1.0 + 0.1 * jax.random.normal(kg, (c,), jnp.float32)
        beta = 0.1 * jax.random.normal(kb, (c,), jnp.float32)
        mean = 0.1 * jax.random.normal(km, (c,), jnp.float32)
        var = 0.5 + jax.random.uniform(kvv, (c,), jnp.float32)
        return gamma, beta, mean, var

    def fold(w, conv_bias, bn):
        gamma, beta, mean, var = bn
        s = gamma * jax.lax.rsqrt(var + eps)
        w_fold = (w * s[:, None]).T                                # (cin, cout)
        cb = jnp.zeros_like(s) if conv_bias is None else conv_bias
        b_fold = cb * s + beta - mean * s
        return w_fold, b_fold

    wq_f, bq_f = fold(conv_w(keys[0], dim, dim), None, bn_stats(keys[1], dim))
    wk_f, bk_f = fold(conv_w(keys[2], dim, dim), None, bn_stats(keys[3], dim))
    wv_f, bv_f = fold(conv_w(keys[4], dim, dim), None, bn_stats(keys[5], dim))
    proj_bias = 0.1 * jax.random.normal(keys[8], (dim,), jnp.float32)
    wp_f, bp_f = fold(conv_w(keys[6], dim, dim), proj_bias, bn_stats(keys[7], dim))

    # Weights go to the MXU in bf16 (spike operands, f32 accumulation); biases stay f32
    # because they add onto f32 accumulators and feed the f32 LIF threshold compare.
    return dict(
        wqkv=jnp.concatenate([wq_f, wk_f, wv_f], axis=1).astype(jnp.bfloat16),  # (C, 3C)
        bqkv=jnp.concatenate([bq_f, bk_f, bv_f]).reshape(1, 3 * dim),
        wproj=wp_f.astype(jnp.bfloat16),                                         # (C, C)
        bproj=bp_f.reshape(1, dim),
    )


if __name__ == "__main__":
    # Small shapes consistent with the module: dim=32, num_heads=8, T=4, B=2, 16x16 tokens.
    # N = 256 keeps the output store lane-dense and fills an MXU pass without batch stacking.
    T, B, dim, num_heads, H, W = 4, 2, 32, 8, 16, 16

    key = jax.random.PRNGKey(0)
    kx, kp = jax.random.split(key)
    x = jax.random.normal(kx, (T, B, dim, H, W), jnp.float32)      # PyTorch-style input
    params = init_params(kp, dim)

    fwd = jax.jit(lambda xx, pp: ssa_forward(xx, pp, num_heads))
    out = fwd(x, params)
    jax.block_until_ready(out)

    assert out.shape == (T, B, dim, H, W), out.shape
    assert out.dtype == jnp.float32
    # The module ends in proj_lif, so the output must be a binary spike tensor.
    assert bool(jnp.all((out == 0.0) | (out == 1.0)))
    print("KERNEL_OK")
</pallas_src>

<mosaic_0001>
module attributes {stable_mosaic.version = 11 : i64} {
  func.func @_ssa_kernel(%arg0: i32, %arg1: i32, %arg2: memref<1x1x32x256xf32, #tpu.memory_space<vmem>>, %arg3: memref<32x96xbf16, #tpu.memory_space<vmem>>, %arg4: memref<1x96xf32, #tpu.memory_space<vmem>>, %arg5: memref<32x32xbf16, #tpu.memory_space<vmem>>, %arg6: memref<1x32xf32, #tpu.memory_space<vmem>>, %arg7: memref<32x32xf32, #tpu.memory_space<vmem>>, %arg8: memref<1x1x32x256xf32, #tpu.memory_space<vmem>>, %arg9: memref<256x32xf32, #tpu.memory_space<vmem>>, %arg10: memref<256x32xf32, #tpu.memory_space<vmem>>, %arg11: memref<256x32xf32, #tpu.memory_space<vmem>>, %arg12: memref<256x32xf32, #tpu.memory_space<vmem>>, %arg13: memref<256x32xf32, #tpu.memory_space<vmem>>) attributes {dimension_semantics = [#tpu.dimension_semantics<parallel>, #tpu.dimension_semantics<arbitrary>], iteration_bounds = array<i64: 2, 4>, scalar_prefetch = 0 : i64, scratch_operands = 5 : i64, tpu.core_type = #tpu.core_type<tc>, window_params = [{transform_indices = @transform_0, window_bounds = array<i64: 1, 1, 32, 256>}, {pipeline_mode = #tpu.pipeline_mode<synchronous>, transform_indices = @transform_1, window_bounds = array<i64: 32, 96>}, {pipeline_mode = #tpu.pipeline_mode<synchronous>, transform_indices = @transform_2, window_bounds = array<i64: 1, 96>}, {pipeline_mode = #tpu.pipeline_mode<synchronous>, transform_indices = @transform_3, window_bounds = array<i64: 32, 32>}, {pipeline_mode = #tpu.pipeline_mode<synchronous>, transform_indices = @transform_4, window_bounds = array<i64: 1, 32>}, {pipeline_mode = #tpu.pipeline_mode<synchronous>, transform_indices = @transform_5, window_bounds = array<i64: 32, 32>}, {transform_indices = @transform_6, window_bounds = array<i64: 1, 1, 32, 256>}]} {
    %c0_i32 = arith.constant 0 : i32
    %0 = arith.cmpi eq, %arg1, %c0_i32 : i32
    %1 = arith.extui %0 : i1 to i32
    %c0_i32_0 = arith.constant 0 : i32
    %2 = arith.cmpi ne, %1, %c0_i32_0 : i32
    scf.if %2 {
      %cst_66 = arith.constant 0.000000e+00 : f32
      %100 = vector.broadcast %cst_66 : f32 to vector<256x32xf32>
      %c0_67 = arith.constant 0 : index
      %c0_68 = arith.constant 0 : index
      %101 = vector.load %arg9[%c0_67, %c0_68] : memref<256x32xf32, #tpu.memory_space<vmem>>, vector<256x32xf32>
      tpu.vector_store %arg9[%c0_67, %c0_68], %100 {strides = array<i32>} : memref<256x32xf32, #tpu.memory_space<vmem>>, vector<256x32xf32>,
      %c0_69 = arith.constant 0 : index
      %c0_70 = arith.constant 0 : index
      %102 = vector.load %arg10[%c0_69, %c0_70] : memref<256x32xf32, #tpu.memory_space<vmem>>, vector<256x32xf32>
      tpu.vector_store %arg10[%c0_69, %c0_70], %100 {strides = array<i32>} : memref<256x32xf32, #tpu.memory_space<vmem>>, vector<256x32xf32>,
      %c0_71 = arith.constant 0 : index
      %c0_72 = arith.constant 0 : index
      %103 = vector.load %arg11[%c0_71, %c0_72] : memref<256x32xf32, #tpu.memory_space<vmem>>, vector<256x32xf32>
      tpu.vector_store %arg11[%c0_71, %c0_72], %100 {strides = array<i32>} : memref<256x32xf32, #tpu.memory_space<vmem>>, vector<256x32xf32>,
      %c0_73 = arith.constant 0 : index
      %c0_74 = arith.constant 0 : index
      %104 = vector.load %arg12[%c0_73, %c0_74] : memref<256x32xf32, #tpu.memory_space<vmem>>, vector<256x32xf32>
      tpu.vector_store %arg12[%c0_73, %c0_74], %100 {strides = array<i32>} : memref<256x32xf32, #tpu.memory_space<vmem>>, vector<256x32xf32>,
      %c0_75 = arith.constant 0 : index
      %c0_76 = arith.constant 0 : index
      %105 = vector.load %arg13[%c0_75, %c0_76] : memref<256x32xf32, #tpu.memory_space<vmem>>, vector<256x32xf32>
      tpu.vector_store %arg13[%c0_75, %c0_76], %100 {strides = array<i32>} : memref<256x32xf32, #tpu.memory_space<vmem>>, vector<256x32xf32>,
    } else {
    }
    %c0 = arith.constant 0 : index
    %c0_1 = arith.constant 0 : index
    %c0_2 = arith.constant 0 : index
    %c0_3 = arith.constant 0 : index
    %3 = vector.load %arg2[%c0, %c0_1, %c0_2, %c0_3] : memref<1x1x32x256xf32, #tpu.memory_space<vmem>>, vector<1x1x32x256xf32>
    %4 = vector.shape_cast %3 : vector<1x1x32x256xf32> to vector<1x32x256xf32>
    %5 = tpu.transpose %4, [0, 2, 1] : vector<1x32x256xf32> -> vector<1x256x32xf32>
    %6 = vector.shape_cast %5 : vector<1x256x32xf32> to vector<256x32xf32>
    %7 = arith.truncf %6 : vector<256x32xf32> to vector<256x32xbf16>
    %c0_4 = arith.constant 0 : index
    %c0_5 = arith.constant 0 : index
    %8 = vector.load %arg3[%c0_4, %c0_5] : memref<32x96xbf16, #tpu.memory_space<vmem>>, vector<32x96xbf16>
    %cst = arith.constant dense<0.000000e+00> : vector<256x96xf32>
    %9 = tpu.matmul %7, %8, %cst {dimension_numbers = #tpu.dot_dimension_numbers<[1], [0], [0], [1], [0, 0, 1, 1], [], []>} : vector<256x32xbf16>, vector<32x96xbf16>, vector<256x96xf32> -> vector<256x96xf32>
    %c0_6 = arith.constant 0 : index
    %c0_7 = arith.constant 0 : index
    %10 = vector.load %arg4[%c0_6, %c0_7] : memref<1x96xf32, #tpu.memory_space<vmem>>, vector<1x96xf32>
    %11 = vector.broadcast %10 : vector<1x96xf32> to vector<256x96xf32>
    %12 = arith.addf %9, %11 : vector<256x96xf32>
    %13 = vector.extract_strided_slice %12 {offsets = [0, 0], sizes = [256, 32], strides = [1, 1]} : vector<256x96xf32> to vector<256x32xf32>
    %c0_8 = arith.constant 0 : index
    %c0_9 = arith.constant 0 : index
    %14 = vector.load %arg9[%c0_8, %c0_9] : memref<256x32xf32, #tpu.memory_space<vmem>>, vector<256x32xf32>
    %c0_10 = arith.constant 0 : index
    %c0_11 = arith.constant 0 : index
    %15 = vector.load %arg9[%c0_10, %c0_11] : memref<256x32xf32, #tpu.memory_space<vmem>>, vector<256x32xf32>
    %16 = arith.subf %13, %15 : vector<256x32xf32>
    %cst_12 = arith.constant 5.000000e-01 : f32
    %17 = vector.broadcast %cst_12 : f32 to vector<256x32xf32>
    %18 = arith.mulf %16, %17 : vector<256x32xf32>
    %19 = arith.addf %14, %18 : vector<256x32xf32>
    %cst_13 = arith.constant 1.000000e+00 : f32
    %20 = vector.broadcast %cst_13 : f32 to vector<256x32xf32>
    %21 = arith.cmpf oge, %19, %20 : vector<256x32xf32>
    %cst_14 = arith.constant 0.000000e+00 : f32
    %22 = vector.broadcast %cst_14 : f32 to vector<256x32xf32>
    %23 = arith.select %21, %22, %19 : vector<256x32xi1>, vector<256x32xf32>
    %c0_15 = arith.constant 0 : index
    %c0_16 = arith.constant 0 : index
    %24 = vector.load %arg9[%c0_15, %c0_16] : memref<256x32xf32, #tpu.memory_space<vmem>>, vector<256x32xf32>
    tpu.vector_store %arg9[%c0_15, %c0_16], %23 {strides = array<i32>} : memref<256x32xf32, #tpu.memory_space<vmem>>, vector<256x32xf32>,
    %25 = arith.extui %21 : vector<256x32xi1> to vector<256x32xi32>
    %26 = arith.sitofp %25 : vector<256x32xi32> to vector<256x32xf32>
    %27 = arith.truncf %26 : vector<256x32xf32> to vector<256x32xbf16>
    %28 = vector.extract_strided_slice %12 {offsets = [0, 32], sizes = [256, 32], strides = [1, 1]} : vector<256x96xf32> to vector<256x32xf32>
    %c0_17 = arith.constant 0 : index
    %c0_18 = arith.constant 0 : index
    %29 = vector.load %arg10[%c0_17, %c0_18] : memref<256x32xf32, #tpu.memory_space<vmem>>, vector<256x32xf32>
    %c0_19 = arith.constant 0 : index
    %c0_20 = arith.constant 0 : index
    %30 = vector.load %arg10[%c0_19, %c0_20] : memref<256x32xf32, #tpu.memory_space<vmem>>, vector<256x32xf32>
    %31 = arith.subf %28, %30 : vector<256x32xf32>
    %cst_21 = arith.constant 5.000000e-01 : f32
    %32 = vector.broadcast %cst_21 : f32 to vector<256x32xf32>
    %33 = arith.mulf %31, %32 : vector<256x32xf32>
    %34 = arith.addf %29, %33 : vector<256x32xf32>
    %cst_22 = arith.constant 1.000000e+00 : f32
    %35 = vector.broadcast %cst_22 : f32 to vector<256x32xf32>
    %36 = arith.cmpf oge, %34, %35 : vector<256x32xf32>
    %cst_23 = arith.constant 0.000000e+00 : f32
    %37 = vector.broadcast %cst_23 : f32 to vector<256x32xf32>
    %38 = arith.select %36, %37, %34 : vector<256x32xi1>, vector<256x32xf32>
    %c0_24 = arith.constant 0 : index
    %c0_25 = arith.constant 0 : index
    %39 = vector.load %arg10[%c0_24, %c0_25] : memref<256x32xf32, #tpu.memory_space<vmem>>, vector<256x32xf32>
    tpu.vector_store %arg10[%c0_24, %c0_25], %38 {strides = array<i32>} : memref<256x32xf32, #tpu.memory_space<vmem>>, vector<256x32xf32>,
    %40 = arith.extui %36 : vector<256x32xi1> to vector<256x32xi32>
    %41 = arith.sitofp %40 : vector<256x32xi32> to vector<256x32xf32>
    %42 = arith.truncf %41 : vector<256x32xf32> to vector<256x32xbf16>
    %43 = vector.extract_strided_slice %12 {offsets = [0, 64], sizes = [256, 32], strides = [1, 1]} : vector<256x96xf32> to vector<256x32xf32>
    %c0_26 = arith.constant 0 : index
    %c0_27 = arith.constant 0 : index
    %44 = vector.load %arg11[%c0_26, %c0_27] : memref<256x32xf32, #tpu.memory_space<vmem>>, vector<256x32xf32>
    %c0_28 = arith.constant 0 : index
    %c0_29 = arith.constant 0 : index
    %45 = vector.load %arg11[%c0_28, %c0_29] : memref<256x32xf32, #tpu.memory_space<vmem>>, vector<256x32xf32>
    %46 = arith.subf %43, %45 : vector<256x32xf32>
    %cst_30 = arith.constant 5.000000e-01 : f32
    %47 = vector.broadcast %cst_30 : f32 to vector<256x32xf32>
    %48 = arith.mulf %46, %47 : vector<256x32xf32>
    %49 = arith.addf %44, %48 : vector<256x32xf32>
    %cst_31 = arith.constant 1.000000e+00 : f32
    %50 = vector.broadcast %cst_31 : f32 to vector<256x32xf32>
    %51 = arith.cmpf oge, %49, %50 : vector<256x32xf32>
    %cst_32 = arith.constant 0.000000e+00 : f32
    %52 = vector.broadcast %cst_32 : f32 to vector<256x32xf32>
    %53 = arith.select %51, %52, %49 : vector<256x32xi1>, vector<256x32xf32>
    %c0_33 = arith.constant 0 : index
    %c0_34 = arith.constant 0 : index
    %54 = vector.load %arg11[%c0_33, %c0_34] : memref<256x32xf32, #tpu.memory_space<vmem>>, vector<256x32xf32>
    tpu.vector_store %arg11[%c0_33, %c0_34], %53 {strides = array<i32>} : memref<256x32xf32, #tpu.memory_space<vmem>>, vector<256x32xf32>,
    %55 = arith.extui %51 : vector<256x32xi1> to vector<256x32xi32>
    %56 = arith.sitofp %55 : vector<256x32xi32> to vector<256x32xf32>
    %57 = arith.truncf %56 : vector<256x32xf32> to vector<256x32xbf16>
    %c0_35 = arith.constant 0 : index
    %c0_36 = arith.constant 0 : index
    %58 = vector.load %arg7[%c0_35, %c0_36] : memref<32x32xf32, #tpu.memory_space<vmem>>, vector<32x32xf32>
    %cst_37 = arith.constant dense<0.000000e+00> : vector<32x32xf32>
    %59 = tpu.matmul %42, %57, %cst_37 {dimension_numbers = #tpu.dot_dimension_numbers<[0], [0], [1], [1], [0, 1, 1, 1], [], []>} : vector<256x32xbf16>, vector<256x32xbf16>, vector<32x32xf32> -> vector<32x32xf32>
    %60 = arith.mulf %59, %58 : vector<32x32xf32>
    %61 = arith.truncf %60 : vector<32x32xf32> to vector<32x32xbf16>
    %cst_38 = arith.constant dense<0.000000e+00> : vector<256x32xf32>
    %62 = tpu.matmul %27, %61, %cst_38 {dimension_numbers = #tpu.dot_dimension_numbers<[1], [0], [0], [1], [0, 0, 1, 1], [], []>} : vector<256x32xbf16>, vector<32x32xbf16>, vector<256x32xf32> -> vector<256x32xf32>
    %c0_39 = arith.constant 0 : index
    %c0_40 = arith.constant 0 : index
    %63 = vector.load %arg12[%c0_39, %c0_40] : memref<256x32xf32, #tpu.memory_space<vmem>>, vector<256x32xf32>
    %c0_41 = arith.constant 0 : index
    %c0_42 = arith.constant 0 : index
    %64 = vector.load %arg12[%c0_41, %c0_42] : memref<256x32xf32, #tpu.memory_space<vmem>>, vector<256x32xf32>
    %65 = arith.subf %62, %64 : vector<256x32xf32>
    %cst_43 = arith.constant 5.000000e-01 : f32
    %66 = vector.broadcast %cst_43 : f32 to vector<256x32xf32>
    %67 = arith.mulf %65, %66 : vector<256x32xf32>
    %68 = arith.addf %63, %67 : vector<256x32xf32>
    %cst_44 = arith.constant 5.000000e-01 : f32
    %69 = vector.broadcast %cst_44 : f32 to vector<256x32xf32>
    %70 = arith.cmpf oge, %68, %69 : vector<256x32xf32>
    %cst_45 = arith.constant 0.000000e+00 : f32
    %71 = vector.broadcast %cst_45 : f32 to vector<256x32xf32>
    %72 = arith.select %70, %71, %68 : vector<256x32xi1>, vector<256x32xf32>
    %c0_46 = arith.constant 0 : index
    %c0_47 = arith.constant 0 : index
    %73 = vector.load %arg12[%c0_46, %c0_47] : memref<256x32xf32, #tpu.memory_space<vmem>>, vector<256x32xf32>
    tpu.vector_store %arg12[%c0_46, %c0_47], %72 {strides = array<i32>} : memref<256x32xf32, #tpu.memory_space<vmem>>, vector<256x32xf32>,
    %74 = arith.extui %70 : vector<256x32xi1> to vector<256x32xi32>
    %75 = arith.sitofp %74 : vector<256x32xi32> to vector<256x32xf32>
    %76 = arith.truncf %75 : vector<256x32xf32> to vector<256x32xbf16>
    %c0_48 = arith.constant 0 : index
    %c0_49 = arith.constant 0 : index
    %77 = vector.load %arg5[%c0_48, %c0_49] : memref<32x32xbf16, #tpu.memory_space<vmem>>, vector<32x32xbf16>
    %cst_50 = arith.constant dense<0.000000e+00> : vector<256x32xf32>
    %78 = tpu.matmul %76, %77, %cst_50 {dimension_numbers = #tpu.dot_dimension_numbers<[1], [0], [0], [1], [0, 0, 1, 1], [], []>} : vector<256x32xbf16>, vector<32x32xbf16>, vector<256x32xf32> -> vector<256x32xf32>
    %c0_51 = arith.constant 0 : index
    %c0_52 = arith.constant 0 : index
    %79 = vector.load %arg6[%c0_51, %c0_52] : memref<1x32xf32, #tpu.memory_space<vmem>>, vector<1x32xf32>
    %80 = vector.broadcast %79 : vector<1x32xf32> to vector<256x32xf32>
    %81 = arith.addf %78, %80 : vector<256x32xf32>
    %c0_53 = arith.constant 0 : index
    %c0_54 = arith.constant 0 : index
    %82 = vector.load %arg13[%c0_53, %c0_54] : memref<256x32xf32, #tpu.memory_space<vmem>>, vector<256x32xf32>
    %c0_55 = arith.constant 0 : index
    %c0_56 = arith.constant 0 : index
    %83 = vector.load %arg13[%c0_55, %c0_56] : memref<256x32xf32, #tpu.memory_space<vmem>>, vector<256x32xf32>
    %84 = arith.subf %81, %83 : vector<256x32xf32>
    %cst_57 = arith.constant 5.000000e-01 : f32
    %85 = vector.broadcast %cst_57 : f32 to vector<256x32xf32>
    %86 = arith.mulf %84, %85 : vector<256x32xf32>
    %87 = arith.addf %82, %86 : vector<256x32xf32>
    %cst_58 = arith.constant 1.000000e+00 : f32
    %88 = vector.broadcast %cst_58 : f32 to vector<256x32xf32>
    %89 = arith.cmpf oge, %87, %88 : vector<256x32xf32>
    %cst_59 = arith.constant 0.000000e+00 : f32
    %90 = vector.broadcast %cst_59 : f32 to vector<256x32xf32>
    %91 = arith.select %89, %90, %87 : vector<256x32xi1>, vector<256x32xf32>
    %c0_60 = arith.constant 0 : index
    %c0_61 = arith.constant 0 : index
    %92 = vector.load %arg13[%c0_60, %c0_61] : memref<256x32xf32, #tpu.memory_space<vmem>>, vector<256x32xf32>
    tpu.vector_store %arg13[%c0_60, %c0_61], %91 {strides = array<i32>} : memref<256x32xf32, #tpu.memory_space<vmem>>, vector<256x32xf32>,
    %93 = arith.extui %89 : vector<256x32xi1> to vector<256x32xi32>
    %94 = arith.sitofp %93 : vector<256x32xi32> to vector<256x32xf32>
    %95 = vector.shape_cast %94 : vector<256x32xf32> to vector<1x256x32xf32>
    %96 = tpu.transpose %95, [0, 2, 1] : vector<1x256x32xf32> -> vector<1x32x256xf32>
    %c0_62 = arith.constant 0 : index
    %c0_63 = arith.constant 0 : index
    %c0_64 = arith.constant 0 : index
    %c0_65 = arith.constant 0 : index
    %97 = vector.load %arg8[%c0_62, %c0_63, %c0_64, %c0_65] : memref<1x1x32x256xf32, #tpu.memory_space<vmem>>, vector<1x1x32x256xf32>
    %98 = vector.shape_cast %97 : vector<1x1x32x256xf32> to vector<1x32x256xf32>
    %99 = vector.shape_cast %96 : vector<1x32x256xf32> to vector<1x1x32x256xf32>
    tpu.vector_store %arg8[%c0_62, %c0_63, %c0_64, %c0_65], %99 {strides = array<i32>} : memref<1x1x32x256xf32, #tpu.memory_space<vmem>>, vector<1x1x32x256xf32>,
    return
  }
  func.func @transform_0(%arg0: i32, %arg1: i32) -> (i32, i32, i32, i32) {
    %c0_i32 = arith.constant 0 : i32
    %c0_i32_0 = arith.constant 0 : i32
    %c0_i32_1 = arith.constant 0 : i32
    return %arg1, %arg0, %c0_i32, %c0_i32_0 : i32, i32, i32, i32
  }
  func.func @transform_1(%arg0: i32, %arg1: i32) -> (i32, i32) {
    %c0_i32 = arith.constant 0 : i32
    %c0_i32_0 = arith.constant 0 : i32
    %c0_i32_1 = arith.constant 0 : i32
    return %c0_i32, %c0_i32_0 : i32, i32
  }
  func.func @transform_2(%arg0: i32, %arg1: i32) -> (i32, i32) {
    %c0_i32 = arith.constant 0 : i32
    %c0_i32_0 = arith.constant 0 : i32
    %c0_i32_1 = arith.constant 0 : i32
    return %c0_i32, %c0_i32_0 : i32, i32
  }
  func.func @transform_3(%arg0: i32, %arg1: i32) -> (i32, i32) {
    %c0_i32 = arith.constant 0 : i32
    %c0_i32_0 = arith.constant 0 : i32
    %c0_i32_1 = arith.constant 0 : i32
    return %c0_i32, %c0_i32_0 : i32, i32
  }
  func.func @transform_4(%arg0: i32, %arg1: i32) -> (i32, i32) {
    %c0_i32 = arith.constant 0 : i32
    %c0_i32_0 = arith.constant 0 : i32
    %c0_i32_1 = arith.constant 0 : i32
    return %c0_i32, %c0_i32_0 : i32, i32
  }
  func.func @transform_5(%arg0: i32, %arg1: i32) -> (i32, i32) {
    %c0_i32 = arith.constant 0 : i32
    %c0_i32_0 = arith.constant 0 : i32
    %c0_i32_1 = arith.constant 0 : i32
    return %c0_i32, %c0_i32_0 : i32, i32
  }
  func.func @transform_6(%arg0: i32, %arg1: i32) -> (i32, i32, i32, i32) {
    %c0_i32 = arith.constant 0 : i32
    %c0_i32_0 = arith.constant 0 : i32
    %c0_i32_1 = arith.constant 0 : i32
    return %arg1, %arg0, %c0_i32, %c0_i32_0 : i32, i32, i32, i32
  }
}

</mosaic_0001>

<bundles_post_ra>
// kernel: _lambda_.1
= control target key start
LH: loop header
LB: loop body
LE: loop exit
PB: predicated region body
PF: predicated region fallthrough
CT: control target
= control target key end

     0   :  { %s4191_s21 = smov 0   ;;  %s4193_s22 = smov 0   ;;  %s6223_s0 = inlined_call_operand.vmem [shape: f32[4,2,32,256], index: 0, kind: input, shape index: {}]   ;;  %s6224_s1 = inlined_call_operand.vmem [shape: bf16[32,96], index: 1, kind: input, shape index: {}]   ;;  %s6225_s2 = inlined_call_operand.vmem [shape: f32[1,96], index: 2, kind: input, shape index: {}]   ;;  %s6226_s3 = inlined_call_operand.vmem [shape: bf16[32,32], index: 3, kind: input, shape index: {}]   ;;  %s6227_s4 = inlined_call_operand.vmem [shape: f32[1,32], index: 4, kind: input, shape index: {}]   ;;  %s6228_s5 = inlined_call_operand.vmem [shape: f32[32,32], index: 5, kind: input, shape index: {}]   ;;  %s6229_s6 = inlined_call_operand.vmem [shape: f32[4,2,32,256], index: 6, kind: output, shape index: {}]  }
   0x1   :  { %s4195_s23 = smov 0   ;;  %s4197_s24 = smov 0  }
   0x2   :  { %s4199_s25 = smov 0  }
   0x3 LB: > { %s25_s26 = sadd.s32 1, %s4140_s23  ;;  %s28_s27 = sadd.s32 1, %s4144_s24  ;;  %s4148_s25 = sphi %s4199_s25, %s16_s25   ;;  %s4144_s24 = sphi %s4197_s24, %s6314_s24   ;;  %s4140_s23 = sphi %s4195_s23, %s6313_s23   ;;  %s4136_s22 = sphi %s4193_s22, %s6312_s22   ;;  %s4132_s21 = sphi %s4191_s21, %s6311_s21  }
   0x4   : > { %p26_p0 = scmp.ge.s32.totalorder %s25_s26, 4  ;;  %p3494_p1 = scmp.ge.s32.totalorder %s4148_s25, 1 }
   0x5   : > { %p232_p2 = scmp.lt.s32.totalorder %s4148_s25, 9 }
   0x6   : > { %s6316_s26 = smov (%p26_p0, %s25_s26), 0  ;;  %s6318_s27 = smov (!%p26_p0, %s28_s27), %s4144_s24 }
   0x7   : > { %p233_p3 = pnand %p3494_p1, %p232_p2  ;;  %p30_p4 = scmp.ge.s32.totalorder %s6318_s27, 2 }
   0x9   : > { %s6320_s27 = smov (%p30_p4, %s6318_s27), 0  ;;  %236 = sbr.rel (%p233_p3) target bundleno = 1642 (0x66a), region = 44 }
  0x10   : > { %p270_p5 = scmp.lt.s32.totalorder %s4132_s21, 3  ;;  %p272_p6 = scmp.lt.s32.totalorder %s4136_s22, 1 }
  0x11   : > { %p3501_p7 = scmp.ne.s32.totalorder %s4132_s21, 0 }
  0x12   : > { %s271_s28 = scalar_select %p270_p5, %s4132_s21, 3 }
  0x13   : > { %s6322_s22 = smov (!%p272_p6, %s4136_s22), 1  ;;  %292 = sbr.rel (%p3501_p7) target bundleno = 101 (0x65), region = 48 }
  0x14   : > { %s3496_s29 = sshll.u32 %s271_s28, 4  ;;  %s3495_s30 = sshll.u32 %s6322_s22, 3  ;;  %vm293_vm0 = vcmask (!%p3501_p7), 261120   ;;  %v4150_v0 = vmov (!%p3501_p7), 0.0  }
  0x15   : > { %s276_s7 = sadd.s32 %s3496_s29, %s3495_s30  ;;  %294 = vst.msk [vmem:[#allocation2] sm:$0xff] (!%p3501_p7), %vm293_vm0, %v4150_v0  ;;  %295 = vst.msk [vmem:[#allocation2 + $0x8] sm:$0xff] (!%p3501_p7), %vm293_vm0, %v4150_v0 }
  0x16   : > { %s3497_s8 = sshll.u32 %s276_s7, 3  ;;  %296 = vst.msk [vmem:[#allocation2 + $0x10] sm:$0xff] (!%p3501_p7), %vm293_vm0, %v4150_v0  ;;  %297 = vst.msk [vmem:[#allocation2 + $0x18] sm:$0xff] (!%p3501_p7), %vm293_vm0, %v4150_v0 }
  0x17   : > { %s4224_s11 = scalar_lea.vmem %s6223_s0, %s3497_s8  ;;  %s4229_s14 = scalar_lea.vmem %s6229_s6, %s3497_s8  ;;  %298 = vst.msk [vmem:[#allocation2 + $0x20] sm:$0xff] (!%p3501_p7), %vm293_vm0, %v4150_v0  ;;  %299 = vst.msk [vmem:[#allocation2 + $0x28] sm:$0xff] (!%p3501_p7), %vm293_vm0, %v4150_v0 }
  0x18   : > { %300 = vst.msk [vmem:[#allocation2 + $0x30] sm:$0xff] (!%p3501_p7), %vm293_vm0, %v4150_v0  ;;  %301 = vst.msk [vmem:[#allocation2 + $0x38] sm:$0xff] (!%p3501_p7), %vm293_vm0, %v4150_v0 }
  0x19   : > { %302 = vst.msk [vmem:[#allocation2 + $0x40] sm:$0xff] (!%p3501_p7), %vm293_vm0, %v4150_v0  ;;  %303 = vst.msk [vmem:[#allocation2 + $0x48] sm:$0xff] (!%p3501_p7), %vm293_vm0, %v4150_v0 }
  0x1a   : > { %304 = vst.msk [vmem:[#allocation2 + $0x50] sm:$0xff] %vm293_vm0, %v4150_v0  ;;  %305 = vst.msk [vmem:[#allocation2 + $0x58] sm:$0xff] %vm293_vm0, %v4150_v0 }
  0x1b   : > { %306 = vst.msk [vmem:[#allocation2 + $0x60] sm:$0xff] %vm293_vm0, %v4150_v0  ;;  %307 = vst.msk [vmem:[#allocation2 + $0x68] sm:$0xff] %vm293_vm0, %v4150_v0 }
  0x1c   : > { %308 = vst.msk [vmem:[#allocation2 + $0x70] sm:$0xff] %vm293_vm0, %v4150_v0  ;;  %309 = vst.msk [vmem:[#allocation2 + $0x78] sm:$0xff] %vm293_vm0, %v4150_v0 }
  0x1d   : > { %310 = vst.msk [vmem:[#allocation2 + $0x80] sm:$0xff] %vm293_vm0, %v4150_v0  ;;  %311 = vst.msk [vmem:[#allocation2 + $0x88] sm:$0xff] %vm293_vm0, %v4150_v0 }
  0x1e   : > { %312 = vst.msk [vmem:[#allocation2 + $0x90] sm:$0xff] %vm293_vm0, %v4150_v0  ;;  %313 = vst.msk [vmem:[#allocation2 + $0x98] sm:$0xff] %vm293_vm0, %v4150_v0 }
  0x1f   : > { %314 = vst.msk [vmem:[#allocation2 + $0xa0] sm:$0xff] %vm293_vm0, %v4150_v0  ;;  %315 = vst.msk [vmem:[#allocation2 + $0xa8] sm:$0xff] %vm293_vm0, %v4150_v0 }
  0x20   : > { %316 = vst.msk [vmem:[#allocation2 + $0xb0] sm:$0xff] %vm293_vm0, %v4150_v0  ;;  %317 = vst.msk [vmem:[#allocation2 + $0xb8] sm:$0xff] %vm293_vm0, %v4150_v0 }
  0x21   : > { %318 = vst.msk [vmem:[#allocation2 + $0xc0] sm:$0xff] %vm293_vm0, %v4150_v0  ;;  %319 = vst.msk [vmem:[#allocation2 + $0xc8] sm:$0xff] %vm293_vm0, %v4150_v0 }
  0x22   : > { %320 = vst.msk [vmem:[#allocation2 + $0xd0] sm:$0xff] %vm293_vm0, %v4150_v0  ;;  %321 = vst.msk [vmem:[#allocation2 + $0xd8] sm:$0xff] %vm293_vm0, %v4150_v0 }
  0x23   : > { %322 = vst.msk [vmem:[#allocation2 + $0xe0] sm:$0xff] %vm293_vm0, %v4150_v0  ;;  %323 = vst.msk [vmem:[#allocation2 + $0xe8] sm:$0xff] %vm293_vm0, %v4150_v0 }
  0x24   : > { %324 = vst.msk [vmem:[#allocation2 + $0xf0] sm:$0xff] %vm293_vm0, %v4150_v0  ;;  %325 = vst.msk [vmem:[#allocation2 + $0xf8] sm:$0xff] %vm293_vm0, %v4150_v0 }
  0x25   : > { %326 = vst.msk [vmem:[#allocation3] sm:$0xff] %vm293_vm0, %v4150_v0  ;;  %327 = vst.msk [vmem:[#allocation3 + $0x8] sm:$0xff] %vm293_vm0, %v4150_v0 }
  0x26   : > { %328 = vst.msk [vmem:[#allocation3 + $0x10] sm:$0xff] %vm293_vm0, %v4150_v0  ;;  %329 = vst.msk [vmem:[#allocation3 + $0x18] sm:$0xff] %vm293_vm0, %v4150_v0 }
  0x27   : > { %330 = vst.msk [vmem:[#allocation3 + $0x20] sm:$0xff] %vm293_vm0, %v4150_v0  ;;  %331 = vst.msk [vmem:[#allocation3 + $0x28] sm:$0xff] %vm293_vm0, %v4150_v0 }
  0x28   : > { %332 = vst.msk [vmem:[#allocation3 + $0x30] sm:$0xff] %vm293_vm0, %v4150_v0  ;;  %333 = vst.msk [vmem:[#allocation3 + $0x38] sm:$0xff] %vm293_vm0, %v4150_v0 }
  0x29   : > { %334 = vst.msk [vmem:[#allocation3 + $0x40] sm:$0xff] %vm293_vm0, %v4150_v0  ;;  %335 = vst.msk [vmem:[#allocation3 + $0x48] sm:$0xff] %vm293_vm0, %v4150_v0 }
  0x2a   : > { %336 = vst.msk [vmem:[#allocation3 + $0x50] sm:$0xff] %vm293_vm0, %v4150_v0  ;;  %337 = vst.msk [vmem:[#allocation3 + $0x58] sm:$0xff] %vm293_vm0, %v4150_v0 }
  0x2b   : > { %338 = vst.msk [vmem:[#allocation3 + $0x60] sm:$0xff] %vm293_vm0, %v4150_v0  ;;  %339 = vst.msk [vmem:[#allocation3 + $0x68] sm:$0xff] %vm293_vm0, %v4150_v0 }
  0x2c   : > { %340 = vst.msk [vmem:[#allocation3 + $0x70] sm:$0xff] %vm293_vm0, %v4150_v0  ;;  %341 = vst.msk [vmem:[#allocation3 + $0x78] sm:$0xff] %vm293_vm0, %v4150_v0 }
  0x2d   : > { %342 = vst.msk [vmem:[#allocation3 + $0x80] sm:$0xff] %vm293_vm0, %v4150_v0  ;;  %343 = vst.msk [vmem:[#allocation3 + $0x88] sm:$0xff] %vm293_vm0, %v4150_v0 }
  0x2e   : > { %344 = vst.msk [vmem:[#allocation3 + $0x90] sm:$0xff] %vm293_vm0, %v4150_v0  ;;  %345 = vst.msk [vmem:[#allocation3 + $0x98] sm:$0xff] %vm293_vm0, %v4150_v0 }
  0x2f   : > { %346 = vst.msk [vmem:[#allocation3 + $0xa0] sm:$0xff] %vm293_vm0, %v4150_v0  ;;  %347 = vst.msk [vmem:[#allocation3 + $0xa8] sm:$0xff] %vm293_vm0, %v4150_v0 }
  0x30   : > { %348 = vst.msk [vmem:[#allocation3 + $0xb0] sm:$0xff] %vm293_vm0, %v4150_v0  ;;  %349 = vst.msk [vmem:[#allocation3 + $0xb8] sm:$0xff] %vm293_vm0, %v4150_v0 }
  0x31   : > { %350 = vst.msk [vmem:[#allocation3 + $0xc0] sm:$0xff] %vm293_vm0, %v4150_v0  ;;  %351 = vst.msk [vmem:[#allocation3 + $0xc8] sm:$0xff] %vm293_vm0, %v4150_v0 }
  0x32   : > { %352 = vst.msk [vmem:[#allocation3 + $0xd0] sm:$0xff] %vm293_vm0, %v4150_v0  ;;  %353 = vst.msk [vmem:[#allocation3 + $0xd8] sm:$0xff] %vm293_vm0, %v4150_v0 }
  0x33   : > { %354 = vst.msk [vmem:[#allocation3 + $0xe0] sm:$0xff] %vm293_vm0, %v4150_v0  ;;  %355 = vst.msk [vmem:[#allocation3 + $0xe8] sm:$0xff] %vm293_vm0, %v4150_v0 }
  0x34   : > { %356 = vst.msk [vmem:[#allocation3 + $0xf0] sm:$0xff] %vm293_vm0, %v4150_v0  ;;  %357 = vst.msk [vmem:[#allocation3 + $0xf8] sm:$0xff] %vm293_vm0, %v4150_v0 }
  0x35   : > { %358 = vst.msk [vmem:[#allocation4] sm:$0xff] %vm293_vm0, %v4150_v0  ;;  %359 = vst.msk [vmem:[#allocation4 + $0x8] sm:$0xff] %vm293_vm0, %v4150_v0 }
  0x36   : > { %360 = vst.msk [vmem:[#allocation4 + $0x10] sm:$0xff] %vm293_vm0, %v4150_v0  ;;  %361 = vst.msk [vmem:[#allocation4 + $0x18] sm:$0xff] %vm293_vm0, %v4150_v0 }
  0x37   : > { %362 = vst.msk [vmem:[#allocation4 + $0x20] sm:$0xff] %vm293_vm0, %v4150_v0  ;;  %363 = vst.msk [vmem:[#allocation4 + $0x28] sm:$0xff] %vm293_vm0, %v4150_v0 }
  0x38   : > { %364 = vst.msk [vmem:[#allocation4 + $0x30] sm:$0xff] %vm293_vm0, %v4150_v0  ;;  %365 = vst.msk [vmem:[#allocation4 + $0x38] sm:$0xff] %vm293_vm0, %v4150_v0 }
  0x39   : > { %366 = vst.msk [vmem:[#allocation4 + $0x40] sm:$0xff] %vm293_vm0, %v4150_v0  ;;  %367 = vst.msk [vmem:[#allocation4 + $0x48] sm:$0xff] %vm293_vm0, %v4150_v0 }
  0x3a   : > { %368 = vst.msk [vmem:[#allocation4 + $0x50] sm:$0xff] %vm293_vm0, %v4150_v0  ;;  %369 = vst.msk [vmem:[#allocation4 + $0x58] sm:$0xff] %vm293_vm0, %v4150_v0 }
  0x3b   : > { %370 = vst.msk [vmem:[#allocation4 + $0x60] sm:$0xff] %vm293_vm0, %v4150_v0  ;;  %371 = vst.msk [vmem:[#allocation4 + $0x68] sm:$0xff] %vm293_vm0, %v4150_v0 }
  0x3c   : > { %372 = vst.msk [vmem:[#allocation4 + $0x70] sm:$0xff] %vm293_vm0, %v4150_v0  ;;  %373 = vst.msk [vmem:[#allocation4 + $0x78] sm:$0xff] %vm293_vm0, %v4150_v0 }
  0x3d   : > { %374 = vst.msk [vmem:[#allocation4 + $0x80] sm:$0xff] %vm293_vm0, %v4150_v0  ;;  %375 = vst.msk [vmem:[#allocation4 + $0x88] sm:$0xff] %vm293_vm0, %v4150_v0 }
  0x3e   : > { %376 = vst.msk [vmem:[#allocation4 + $0x90] sm:$0xff] %vm293_vm0, %v4150_v0  ;;  %377 = vst.msk [vmem:[#allocation4 + $0x98] sm:$0xff] %vm293_vm0, %v4150_v0 }
  0x3f   : > { %378 = vst.msk [vmem:[#allocation4 + $0xa0] sm:$0xff] %vm293_vm0, %v4150_v0  ;;  %379 = vst.msk [vmem:[#allocation4 + $0xa8] sm:$0xff] %vm293_vm0, %v4150_v0 }
  0x40   : > { %380 = vst.msk [vmem:[#allocation4 + $0xb0] sm:$0xff] %vm293_vm0, %v4150_v0  ;;  %381 = vst.msk [vmem:[#allocation4 + $0xb8] sm:$0xff] %vm293_vm0, %v4150_v0 }
  0x41   : > { %382 = vst.msk [vmem:[#allocation4 + $0xc0] sm:$0xff] %vm293_vm0, %v4150_v0  ;;  %383 = vst.msk [vmem:[#allocation4 + $0xc8] sm:$0xff] %vm293_vm0, %v4150_v0 }
  0x42   : > { %384 = vst.msk [vmem:[#allocation4 + $0xd0] sm:$0xff] %vm293_vm0, %v4150_v0  ;;  %385 = vst.msk [vmem:[#allocation4 + $0xd8] sm:$0xff] %vm293_vm0, %v4150_v0 }
  0x43   : > { %386 = vst.msk [vmem:[#allocation4 + $0xe0] sm:$0xff] %vm293_vm0, %v4150_v0  ;;  %387 = vst.msk [vmem:[#allocation4 + $0xe8] sm:$0xff] %vm293_vm0, %v4150_v0 }
  0x44   : > { %388 = vst.msk [vmem:[#allocation4 + $0xf0] sm:$0xff] %vm293_vm0, %v4150_v0  ;;  %389 = vst.msk [vmem:[#allocation4 + $0xf8] sm:$0xff] %vm293_vm0, %v4150_v0 }
  0x45   : > { %390 = vst.msk [vmem:[#allocation5] sm:$0xff] %vm293_vm0, %v4150_v0  ;;  %391 = vst.msk [vmem:[#allocation5 + $0x8] sm:$0xff] %vm293_vm0, %v4150_v0 }
  0x46   : > { %392 = vst.msk [vmem:[#allocation5 + $0x10] sm:$0xff] %vm293_vm0, %v4150_v0  ;;  %393 = vst.msk [vmem:[#allocation5 + $0x18] sm:$0xff] %vm293_vm0, %v4150_v0 }
  0x47   : > { %394 = vst.msk [vmem:[#allocation5 + $0x20] sm:$0xff] %vm293_vm0, %v4150_v0  ;;  %395 = vst.msk [vmem:[#allocation5 + $0x28] sm:$0xff] %vm293_vm0, %v4150_v0 }
  0x48   : > { %396 = vst.msk [vmem:[#allocation5 + $0x30] sm:$0xff] %vm293_vm0, %v4150_v0  ;;  %397 = vst.msk [vmem:[#allocation5 + $0x38] sm:$0xff] %vm293_vm0, %v4150_v0 }
  0x49   : > { %398 = vst.msk [vmem:[#allocation5 + $0x40] sm:$0xff] %vm293_vm0, %v4150_v0  ;;  %399 = vst.msk [vmem:[#allocation5 + $0x48] sm:$0xff] %vm293_vm0, %v4150_v0 }
  0x4a   : > { %400 = vst.msk [vmem:[#allocation5 + $0x50] sm:$0xff] %vm293_vm0, %v4150_v0  ;;  %401 = vst.msk [vmem:[#allocation5 + $0x58] sm:$0xff] %vm293_vm0, %v4150_v0 }
  0x4b   : > { %402 = vst.msk [vmem:[#allocation5 + $0x60] sm:$0xff] %vm293_vm0, %v4150_v0  ;;  %403 = vst.msk [vmem:[#allocation5 + $0x68] sm:$0xff] %vm293_vm0, %v4150_v0 }
  0x4c   : > { %404 = vst.msk [vmem:[#allocation5 + $0x70] sm:$0xff] %vm293_vm0, %v4150_v0  ;;  %405 = vst.msk [vmem:[#allocation5 + $0x78] sm:$0xff] %vm293_vm0, %v4150_v0 }
  0x4d   : > { %406 = vst.msk [vmem:[#allocation5 + $0x80] sm:$0xff] %vm293_vm0, %v4150_v0  ;;  %407 = vst.msk [vmem:[#allocation5 + $0x88] sm:$0xff] %vm293_vm0, %v4150_v0 }
  0x4e   : > { %408 = vst.msk [vmem:[#allocation5 + $0x90] sm:$0xff] %vm293_vm0, %v4150_v0  ;;  %409 = vst.msk [vmem:[#allocation5 + $0x98] sm:$0xff] %vm293_vm0, %v4150_v0 }
  0x4f   : > { %410 = vst.msk [vmem:[#allocation5 + $0xa0] sm:$0xff] %vm293_vm0, %v4150_v0  ;;  %411 = vst.msk [vmem:[#allocation5 + $0xa8] sm:$0xff] %vm293_vm0, %v4150_v0 }
  0x50   : > { %412 = vst.msk [vmem:[#allocation5 + $0xb0] sm:$0xff] %vm293_vm0, %v4150_v0  ;;  %413 = vst.msk [vmem:[#allocation5 + $0xb8] sm:$0xff] %vm293_vm0, %v4150_v0 }
  0x51   : > { %414 = vst.msk [vmem:[#allocation5 + $0xc0] sm:$0xff] %vm293_vm0, %v4150_v0  ;;  %415 = vst.msk [vmem:[#allocation5 + $0xc8] sm:$0xff] %vm293_vm0, %v4150_v0 }
  0x52   : > { %416 = vst.msk [vmem:[#allocation5 + $0xd0] sm:$0xff] %vm293_vm0, %v4150_v0  ;;  %417 = vst.msk [vmem:[#allocation5 + $0xd8] sm:$0xff] %vm293_vm0, %v4150_v0 }
  0x53   : > { %418 = vst.msk [vmem:[#allocation5 + $0xe0] sm:$0xff] %vm293_vm0, %v4150_v0  ;;  %419 = vst.msk [vmem:[#allocation5 + $0xe8] sm:$0xff] %vm293_vm0, %v4150_v0 }
  0x54   : > { %420 = vst.msk [vmem:[#allocation5 + $0xf0] sm:$0xff] %vm293_vm0, %v4150_v0  ;;  %421 = vst.msk [vmem:[#allocation5 + $0xf8] sm:$0xff] %vm293_vm0, %v4150_v0 }
  0x55   : > { %422 = vst.msk [vmem:[#allocation6] sm:$0xff] %vm293_vm0, %v4150_v0  ;;  %423 = vst.msk [vmem:[#allocation6 + $0x8] sm:$0xff] %vm293_vm0, %v4150_v0 }
  0x56   : > { %424 = vst.msk [vmem:[#allocation6 + $0x10] sm:$0xff] %vm293_vm0, %v4150_v0  ;;  %425 = vst.msk [vmem:[#allocation6 + $0x18] sm:$0xff] %vm293_vm0, %v4150_v0 }
  0x57   : > { %426 = vst.msk [vmem:[#allocation6 + $0x20] sm:$0xff] %vm293_vm0, %v4150_v0  ;;  %427 = vst.msk [vmem:[#allocation6 + $0x28] sm:$0xff] %vm293_vm0, %v4150_v0 }
  0x58   : > { %428 = vst.msk [vmem:[#allocation6 + $0x30] sm:$0xff] %vm293_vm0, %v4150_v0  ;;  %429 = vst.msk [vmem:[#allocation6 + $0x38] sm:$0xff] %vm293_vm0, %v4150_v0 }
  0x59   : > { %430 = vst.msk [vmem:[#allocation6 + $0x40] sm:$0xff] %vm293_vm0, %v4150_v0  ;;  %431 = vst.msk [vmem:[#allocation6 + $0x48] sm:$0xff] %vm293_vm0, %v4150_v0 }
  0x5a   : > { %432 = vst.msk [vmem:[#allocation6 + $0x50] sm:$0xff] %vm293_vm0, %v4150_v0  ;;  %433 = vst.msk [vmem:[#allocation6 + $0x58] sm:$0xff] %vm293_vm0, %v4150_v0 }
  0x5b   : > { %434 = vst.msk [vmem:[#allocation6 + $0x60] sm:$0xff] %vm293_vm0, %v4150_v0  ;;  %435 = vst.msk [vmem:[#allocation6 + $0x68] sm:$0xff] %vm293_vm0, %v4150_v0 }
  0x5c   : > { %436 = vst.msk [vmem:[#allocation6 + $0x70] sm:$0xff] %vm293_vm0, %v4150_v0  ;;  %437 = vst.msk [vmem:[#allocation6 + $0x78] sm:$0xff] %vm293_vm0, %v4150_v0 }
  0x5d   : > { %438 = vst.msk [vmem:[#allocation6 + $0x80] sm:$0xff] %vm293_vm0, %v4150_v0  ;;  %439 = vst.msk [vmem:[#allocation6 + $0x88] sm:$0xff] %vm293_vm0, %v4150_v0 }
  0x5e   : > { %440 = vst.msk [vmem:[#allocation6 + $0x90] sm:$0xff] %vm293_vm0, %v4150_v0  ;;  %441 = vst.msk [vmem:[#allocation6 + $0x98] sm:$0xff] %vm293_vm0, %v4150_v0 }
  0x5f   : > { %442 = vst.msk [vmem:[#allocation6 + $0xa0] sm:$0xff] %vm293_vm0, %v4150_v0  ;;  %443 = vst.msk [vmem:[#allocation6 + $0xa8] sm:$0xff] %vm293_vm0, %v4150_v0 }
  0x60   : > { %444 = vst.msk [vmem:[#allocation6 + $0xb0] sm:$0xff] %vm293_vm0, %v4150_v0  ;;  %445 = vst.msk [vmem:[#allocation6 + $0xb8] sm:$0xff] %vm293_vm0, %v4150_v0 }
  0x61   : > { %446 = vst.msk [vmem:[#allocation6 + $0xc0] sm:$0xff] %vm293_vm0, %v4150_v0  ;;  %447 = vst.msk [vmem:[#allocation6 + $0xc8] sm:$0xff] %vm293_vm0, %v4150_v0 }
  0x62   : > { %448 = vst.msk [vmem:[#allocation6 + $0xd0] sm:$0xff] %vm293_vm0, %v4150_v0  ;;  %449 = vst.msk [vmem:[#allocation6 + $0xd8] sm:$0xff] %vm293_vm0, %v4150_v0 }
  0x63   : > { %450 = vst.msk [vmem:[#allocation6 + $0xe0] sm:$0xff] %vm293_vm0, %v4150_v0  ;;  %451 = vst.msk [vmem:[#allocation6 + $0xe8] sm:$0xff] %vm293_vm0, %v4150_v0 }
  0x64   : > { %452 = vst.msk [vmem:[#allocation6 + $0xf0] sm:$0xff] %vm293_vm0, %v4150_v0  ;;  %453 = vst.msk [vmem:[#allocation6 + $0xf8] sm:$0xff] %vm293_vm0, %v4150_v0 }
  0x65 PF: > { %v454_v1 = vld [vmem:[%s4224_s11] sm:$0xff]  ;;  %v455_v2 = vld [vmem:[%s4224_s11 + $0x8] sm:$0xff]  ;;  %v456_v3 = vld [vmem:[%s4224_s11 + $0x10] sm:$0xff]  ;;  %s4151_s19 = smov 32   ;;  %vm565_vm1 = vcmask 261120   ;;  %s4152_s20 = smov 64  }
  0x66   : > { %462 = vxpose.xlu0.b32.start [1/4] (short) %v454_v1, 128  ;;  %494 = vxpose.xlu1.b32.start [1/4] (short) %v455_v2, 128  ;;  %v457_v4 = vld [vmem:[%s4224_s11 + $0x18] sm:$0xff]  ;;  %v4042_v5 = vld [vmem:[%s6224_s1] sm:$0xff]   ;;  %v459_v7 = vld [vmem:[%s4224_s11 + $0x28] sm:$0xff]  ;;  %s4153_s28 = smov 96  }
  0x67   : > { %v458_v6 = vld [vmem:[%s4224_s11 + $0x20] sm:$0xff]  ;;  %3832 = vmatprep.subr.bf16.mxu0 %v4042_v5  ;;  %v4043_v8 = vld [vmem:[%s6224_s1 + $0x8] sm:$0xff]   ;;  %v460_v9 = vld [vmem:[%s4224_s11 + $0x30] sm:$0xff] }
  0x68   : > { %3833 = vmatpush3.bf16.msra.mxu0 %v4042_v5  ;;  %v461_v10 = vld [vmem:[%s4224_s11 + $0x38] sm:$0xff]  ;;  %v1096_v11 = vld [vmem:[#allocation3 + $0x88] sm:$0xff]  ;;  %v1079_v12 = vld [vmem:[#allocation3] sm:$0xff] }
  0x69   : > { %3834 = vmatprep.subr.bf16.mxu0 %v4043_v8  ;;  %v1080_v13 = vld [vmem:[#allocation3 + $0x8] sm:$0xff]  ;;  %v1095_v14 = vld [vmem:[#allocation3 + $0x80] sm:$0xff]  ;;  %v1097_v15 = vld [vmem:[#allocation3 + $0x90] sm:$0xff] }
  0x6a   : > { %463 = vxpose.xlu0.b32.cont [2/4] (short) %v456_v3, 128  ;;  %495 = vxpose.xlu1.b32.cont [2/4] (short) %v457_v4, 128  ;;  %v1098_v16 = vld [vmem:[#allocation3 + $0x98] sm:$0xff]  ;;  %v1081_v17 = vld [vmem:[#allocation3 + $0x10] sm:$0xff]  ;;  %v1099_v19 = vld [vmem:[#allocation3 + $0xa0] sm:$0xff] }
  0x6b   : > { %v1082_v18 = vld [vmem:[#allocation3 + $0x18] sm:$0xff]  ;;  %v1100_v20 = vld [vmem:[#allocation3 + $0xa8] sm:$0xff]  ;;  %v1083_v21 = vld [vmem:[#allocation3 + $0x20] sm:$0xff] }
  0x6c   : > { %3835 = vmatpush3.bf16.msra.mxu0 %v4043_v8  ;;  %v1084_v22 = vld [vmem:[#allocation3 + $0x28] sm:$0xff]  ;;  %v1101_v23 = vld [vmem:[#allocation3 + $0xb0] sm:$0xff]  ;;  %v1102_v24 = vld [vmem:[#allocation3 + $0xb8] sm:$0xff] }
  0x6d   : > { %v1085_v25 = vld [vmem:[#allocation3 + $0x30] sm:$0xff]  ;;  %v1086_v26 = vld [vmem:[#allocation3 + $0x38] sm:$0xff]  ;;  %v1103_v27 = vld [vmem:[#allocation3 + $0xc0] sm:$0xff] }
  0x6e   : > { %464 = vxpose.xlu0.b32.cont [3/4] (short) %v458_v6, 128  ;;  %496 = vxpose.xlu1.b32.cont [3/4] (short) %v459_v7, 128  ;;  %v1104_v28 = vld [vmem:[#allocation3 + $0xc8] sm:$0xff]  ;;  %v1087_v30 = vld [vmem:[#allocation3 + $0x40] sm:$0xff]  ;;  %v1105_v34 = vld [vmem:[#allocation3 + $0xd0] sm:$0xff] }
  0x6f   : > { %v1088_v32 = vld [vmem:[#allocation3 + $0x48] sm:$0xff]  ;;  %v1106_v37 = vld [vmem:[#allocation3 + $0xd8] sm:$0xff]  ;;  %v1089_v39 = vld [vmem:[#allocation3 + $0x50] sm:$0xff] }
  0x70   : > { %v1090_v41 = vld [vmem:[#allocation3 + $0x58] sm:$0xff]  ;;  %v1107_v43 = vld [vmem:[#allocation3 + $0xe0] sm:$0xff]  ;;  %v1108_v45 = vld [vmem:[#allocation3 + $0xe8] sm:$0xff] }
  0x71   : > { %v1091_v48 = vld [vmem:[#allocation3 + $0x60] sm:$0xff]  ;;  %v1092_v49 = vld [vmem:[#allocation3 + $0x68] sm:$0xff]  ;;  %v1109_v51 = vld [vmem:[#allocation3 + $0xf0] sm:$0xff] }
  0x72   : > { %465 = vxpose.xlu0.b32.end [4/4] (short) %v460_v9, 128  ;;  %497 = vxpose.xlu1.b32.end [4/4] (short) %v461_v10, 128  ;;  %v1110_v54 = vld [vmem:[#allocation3 + $0xf8] sm:$0xff]  ;;  %v1093_v56 = vld [vmem:[#allocation3 + $0x70] sm:$0xff]  ;;  %v1655_v60 = vld [vmem:[#allocation4 + $0x80] sm:$0xff] }
  0x73   : > { %v1094_v57 = vld [vmem:[#allocation3 + $0x78] sm:$0xff]  ;;  %v1656_v62 = vld [vmem:[#allocation4 + $0x88] sm:$0xff]  ;;  %v1639_v0 = vld [vmem:[#allocation4] sm:$0xff] }
  0x74   : > { %v1640_v2 = vld [vmem:[#allocation4 + $0x8] sm:$0xff]  ;;  %v1657_v4 = vld [vmem:[#allocation4 + $0x90] sm:$0xff]  ;;  %v1658_v6 = vld [vmem:[#allocation4 + $0x98] sm:$0xff] }
  0x75   : > { %v1641_v9 = vld [vmem:[#allocation4 + $0x10] sm:$0xff]  ;;  %v1642_v10 = vld [vmem:[#allocation4 + $0x18] sm:$0xff] }
  0xc0   : > { %1177 = vrot.lane.b32.xlu1 %v1096_v11, %s4151_s19 }
  0xc4   : > { %1143 = vrot.lane.b32.xlu1 %v1079_v12, %s4151_s19  ;;  %v1659_v12 = vld [vmem:[#allocation4 + $0xa0] sm:$0xff] }
  0xc8   : > { %1145 = vrot.lane.b32.xlu1 %v1080_v13, %s4151_s19 }
  0xcb   : > { %1175 = vrot.lane.b32.xlu0 %v1095_v14, %s4151_s19 }
  0xcc   : > { %1179 = vrot.lane.b32.xlu1 %v1097_v15, %s4151_s19  ;;  %v1660_v15 = vld [vmem:[#allocation4 + $0xa8] sm:$0xff] }
  0xcf   : > { %1181 = vrot.lane.b32.xlu0 %v1098_v16, %s4151_s19 }
  0xd0   : > { %1147 = vrot.lane.b32.xlu1 %v1081_v17, %s4151_s19  ;;  %v1643_v17 = vld [vmem:[#allocation4 + $0x20] sm:$0xff] }
  0xd3   : > { %1149 = vrot.lane.b32.xlu0 %v1082_v18, %s4151_s19  ;;  %v1644_v18 = vld [vmem:[#allocation4 + $0x28] sm:$0xff] }
  0xd4   : > { %1183 = vrot.lane.b32.xlu1 %v1099_v19, %s4151_s19 }
  0xd7   : > { %1185 = vrot.lane.b32.xlu0 %v1100_v20, %s4151_s19 }
  0xd8   : > { %1151 = vrot.lane.b32.xlu1 %v1083_v21, %s4151_s19  ;;  %v1661_v21 = vld [vmem:[#allocation4 + $0xb0] sm:$0xff] }
  0xdb   : > { %1153 = vrot.lane.b32.xlu0 %v1084_v22, %s4151_s19 }
  0xdc   : > { %1187 = vrot.lane.b32.xlu1 %v1101_v23, %s4151_s19  ;;  %v1662_v23 = vld [vmem:[#allocation4 + $0xb8] sm:$0xff] }
  0xdf   : > { %1189 = vrot.lane.b32.xlu0 %v1102_v24, %s4151_s19 }
  0xe0   : > { %1155 = vrot.lane.b32.xlu1 %v1085_v25, %s4151_s19  ;;  %v1645_v25 = vld [vmem:[#allocation4 + $0x30] sm:$0xff] }
  0xe3   : > { %1157 = vrot.lane.b32.xlu0 %v1086_v26, %s4151_s19 }
  0xe4   : > { %1191 = vrot.lane.b32.xlu1 %v1103_v27, %s4151_s19  ;;  %v1646_v27 = vld [vmem:[#allocation4 + $0x38] sm:$0xff] }
  0xe6   : > { %v478_v29 = vpop.trf.xlu0  ;;  %v4582_v31 = vpop.trf.xlu1 }
  0xe7   : > { %1193 = vrot.lane.b32.xlu0 %v1104_v28, %s4151_s19 }
  0xe8   : > { %1159 = vrot.lane.b32.xlu1 %v1087_v30, %s4151_s19  ;;  %v1663_v30 = vld [vmem:[#allocation4 + $0xc0] sm:$0xff] }
  0xea   : > { %v479_v33 = vpop.trf.xlu0  ;;  %v4586_v36 = vpop.trf.xlu1 }
  0xeb   : > { %v526_v35 = vpack.c.bf16 %v479_v33, %v478_v29  ;;  %1161 = vrot.lane.b32.xlu0 %v1088_v32, %s4151_s19  ;;  %v534_v28 = vpack.c.bf16 %v4586_v36, %v4582_v31  ;;  %v1664_v33 = vld [vmem:[#allocation4 + $0xc8] sm:$0xff] }
  0xec   : > { %1195 = vrot.lane.b32.xlu1 %v1105_v34, %s4151_s19 }
  0xed   : > { %3836 = vmatprep.mubr.msk.bf16.mxu0 %vm565_vm1, %v526_v35  ;;  %v1647_v35 = vld [vmem:[#allocation4 + $0x40] sm:$0xff] }
  0xee   : > { %v480_v38 = vpop.trf.xlu0  ;;  %v4591_v40 = vpop.trf.xlu1 }
  0xef   : > { %1197 = vrot.lane.b32.xlu0 %v1106_v37, %s4151_s19  ;;  %v1648_v37 = vld [vmem:[#allocation4 + $0x48] sm:$0xff] }
  0xf0   : > { %1163 = vrot.lane.b32.xlu1 %v1089_v39, %s4151_s19 }
  0xf2   : > { %v481_v42 = vpop.trf.xlu0  ;;  %v4597_v46 = vpop.trf.xlu1 }
  0xf3   : > { %v527_v44 = vpack.c.bf16 %v481_v42, %v480_v38  ;;  %1165 = vrot.lane.b32.xlu0 %v1090_v41, %s4151_s19  ;;  %v535_v31 = vpack.c.bf16 %v4597_v46, %v4591_v40  ;;  %v1665_v38 = vld [vmem:[#allocation4 + $0xd0] sm:$0xff]  ;;  %v1666_v41 = vld [vmem:[#allocation4 + $0xd8] sm:$0xff]  ;;  %v1667_v46 = vld [vmem:[#allocation4 + $0xe0] sm:$0xff] }
  0xf4   : > { %1199 = vrot.lane.b32.xlu1 %v1107_v43, %s4151_s19  ;;  %v1649_v42 = vld [vmem:[#allocation4 + $0x50] sm:$0xff]  ;;  %v1650_v40 = vld [vmem:[#allocation4 + $0x58] sm:$0xff] }
  0xf5   : > { %3837 = vmatmul.mubr.msk.bf16.vlgmr.msra.gmra.mrb[0].mxu0 %vm565_vm1, %v527_v44 }
  0xf6   : > { %v482_v47 = vpop.trf.xlu0  ;;  %v4602_v53 = vpop.trf.xlu1 }
  0xf7   : > { %1201 = vrot.lane.b32.xlu0 %v1108_v45, %s4151_s19 }
  0xf8   : > { %1167 = vrot.lane.b32.xlu1 %v1091_v48, %s4151_s19  ;;  %v1651_v48 = vld [vmem:[#allocation4 + $0x60] sm:$0xff] }
  0xfa   : > { %v483_v50 = vpop.trf.xlu0  ;;  %v4608_v58 = vpop.trf.xlu1 }
  0xfb   : > { %v528_v52 = vpack.c.bf16 %v483_v50, %v482_v47  ;;  %1169 = vrot.lane.b32.xlu0 %v1092_v49, %s4151_s19  ;;  %v536_v36 = vpack.c.bf16 %v4608_v58, %v4602_v53  ;;  %v1668_v47 = vld [vmem:[#allocation4 + $0xe8] sm:$0xff]  ;;  %v1669_v53 = vld [vmem:[#allocation4 + $0xf0] sm:$0xff] }
  0xfc   : > { %1203 = vrot.lane.b32.xlu1 %v1109_v51, %s4151_s19  ;;  %v1652_v50 = vld [vmem:[#allocation4 + $0x68] sm:$0xff] }
  0xfd   : > { %3840 = vmatprep.mubr.msk.bf16.mxu0 %vm565_vm1, %v528_v52 }
  0xfe   : > { %v484_v55 = vpop.trf.xlu0  ;;  %v4614_v1 = vpop.trf.xlu1 }
  0xff   : > { %1205 = vrot.lane.b32.xlu0 %v1110_v54, %s4151_s19  ;;  %v1670_v54 = vld [vmem:[#allocation4 + $0xf8] sm:$0xff] }
 0x100   : > { %1171 = vrot.lane.b32.xlu1 %v1093_v56, %s4151_s19  ;;  %v1653_v56 = vld [vmem:[#allocation4 + $0x70] sm:$0xff] }
 0x102   : > { %v485_v59 = vpop.trf.xlu0  ;;  %v4620_v7 = vpop.trf.xlu1 }
 0x103   : > { %v529_v61 = vpack.c.bf16 %v485_v59, %v484_v55  ;;  %1173 = vrot.lane.b32.xlu0 %v1094_v57, %s4151_s19  ;;  %v537_v43 = vpack.c.bf16 %v4620_v7, %v4614_v1  ;;  %v1654_v57 = vld [vmem:[#allocation4 + $0x78] sm:$0xff] }
 0x104   : > { %1735 = vrot.lane.b32.xlu1 %v1655_v60, %s4152_s20 }
 0x105   : > { %3841 = vmatmul.mubr.msk.bf16.gmra.mrb[4].mxu0 %vm565_vm1, %v529_v61 }
 0x106   : > { %v486_v63 = vpop.trf.xlu0  ;;  %v518_v14 = vpop.trf.xlu1 }
 0x107   : > { %1737 = vrot.lane.b32.xlu0 %v1656_v62, %s4152_s20 }
 0x108   : > { %1703 = vrot.lane.b32.xlu1 %v1639_v0, %s4152_s20 }
 0x10a   : > { %v487_v3 = vpop.trf.xlu0  ;;  %v519_v19 = vpop.trf.xlu1 }
 0x10b   : > { %v530_v5 = vpack.c.bf16 %v487_v3, %v486_v63  ;;  %1705 = vrot.lane.b32.xlu0 %v1640_v2, %s4152_s20  ;;  %v538_v45 = vpack.c.bf16 %v519_v19, %v518_v14 }
 0x10c   : > { %1739 = vrot.lane.b32.xlu1 %v1657_v4, %s4152_s20 }
 0x10d   : > { %3844 = vmatprep.mubr.msk.bf16.mxu0 %vm565_vm1, %v530_v5 }
 0x10e   : > { %v488_v8 = vpop.trf.xlu0  ;;  %v520_v26 = vpop.trf.xlu1 }
 0x10f   : > { %1741 = vrot.lane.b32.xlu0 %v1658_v6, %s4152_s20 }
 0x110   : > { %1707 = vrot.lane.b32.xlu1 %v1641_v9, %s4152_s20 }
 0x112   : > { %v489_v11 = vpop.trf.xlu0  ;;  %v521_v34 = vpop.trf.xlu1 }
 0x113   : > { %v531_v13 = vpack.c.bf16 %v489_v11, %v488_v8  ;;  %1709 = vrot.lane.b32.xlu0 %v1642_v10, %s4152_s20  ;;  %v539_v51 = vpack.c.bf16 %v521_v34, %v520_v26 }
 0x114   : > { %1743 = vrot.lane.b32.xlu1 %v1659_v12, %s4152_s20 }
 0x115   : > { %3845 = vmatmul.mubr.msk.bf16.gmra.mrb[8].mxu0 %vm565_vm1, %v531_v13 }
 0x116   : > { %v490_v16 = vpop.trf.xlu0  ;;  %v522_v39 = vpop.trf.xlu1 }
 0x117   : > { %1745 = vrot.lane.b32.xlu0 %v1660_v15, %s4152_s20 }
 0x118   : > { %1711 = vrot.lane.b32.xlu1 %v1643_v17, %s4152_s20 }
 0x11a   : > { %v491_v20 = vpop.trf.xlu0  ;;  %v523_v44 = vpop.trf.xlu1 }
 0x11b   : > { %v532_v22 = vpack.c.bf16 %v491_v20, %v490_v16  ;;  %1713 = vrot.lane.b32.xlu0 %v1644_v18, %s4152_s20  ;;  %v540_v52 = vpack.c.bf16 %v523_v44, %v522_v39 }
 0x11c   : > { %1747 = vrot.lane.b32.xlu1 %v1661_v21, %s4152_s20 }
 0x11d   : > { %3848 = vmatprep.mubr.msk.bf16.mxu0 %vm565_vm1, %v532_v22 }
 0x11e   : > { %v492_v24 = vpop.trf.xlu0  ;;  %v524_v49 = vpop.trf.xlu1 }
 0x11f   : > { %1749 = vrot.lane.b32.xlu0 %v1662_v23, %s4152_s20 }
 0x120   : > { %1715 = vrot.lane.b32.xlu1 %v1645_v25, %s4152_s20 }
 0x122   : > { %v493_v29 = vpop.trf.xlu0  ;;  %v525_v55 = vpop.trf.xlu1 }
 0x123   : > { %v533_v32 = vpack.c.bf16 %v493_v29, %v492_v24  ;;  %1717 = vrot.lane.b32.xlu0 %v1646_v27, %s4152_s20  ;;  %v541_v58 = vpack.c.bf16 %v525_v55, %v524_v49 }
 0x124   : > { %1751 = vrot.lane.b32.xlu1 %v1663_v30, %s4152_s20 }
 0x125   : > { %3849 = vmatmul.mubr.msk.bf16.gmra.mrb[12].mxu0 %vm565_vm1, %v533_v32 }
 0x126   : > { %3852 = vmatprep.mubr.msk.bf16.mxu0 %vm565_vm1, %v534_v28 }
 0x127   : > { %1753 = vrot.lane.b32.xlu0 %v1664_v33, %s4152_s20 }
 0x128   : > { %1719 = vrot.lane.b32.xlu1 %v1647_v35, %s4152_s20 }
 0x12b   : > { %1721 = vrot.lane.b32.xlu0 %v1648_v37, %s4152_s20 }
 0x12c   : > { %1755 = vrot.lane.b32.xlu1 %v1665_v38, %s4152_s20 }
 0x12d   : > { %3853 = vmatmul.mubr.msk.bf16.gmra.mrb[16].mxu0 %vm565_vm1, %v535_v31 }
 0x12e   : > { %3856 = vmatprep.mubr.msk.bf16.mxu0 %vm565_vm1, %v536_v36  ;;  %v4752_v36 = vld [vmem:[%s6225_s2] ss:$0 sm:$0xff] }
 0x12f   : > { %1757 = vrot.lane.b32.xlu0 %v1666_v41, %s4152_s20  ;;  %v777_v41 = vld [vmem:[#allocation2 + $0x10] sm:$0xff] }
 0x130   : > { %1723 = vrot.lane.b32.xlu1 %v1649_v42, %s4152_s20 }
 0x132   : > { %v4666_v59 = vpop.permute.xlu1 %1177 }
 0x133   : > { %1725 = vrot.lane.b32.xlu0 %v1650_v40, %s4152_s20 }
 0x134   : > { %1759 = vrot.lane.b32.xlu1 %v1667_v46, %s4152_s20  ;;  %v778_v46 = vld [vmem:[#allocation2 + $0x18] sm:$0xff] }
 0x135   : > { %3857 = vmatmul.mubr.msk.bf16.gmra.mrb[20].mxu0 %vm565_vm1, %v537_v43  ;;  %v775_v43 = vld [vmem:[#allocation2] sm:$0xff] }
 0x136   : > { %3860 = vmatprep.mubr.msk.bf16.mxu0 %vm565_vm1, %v538_v45  ;;  %v4671_v60 = vpop.permute.xlu1 %1143 }
 0x137   : > { %1761 = vrot.lane.b32.xlu0 %v1668_v47, %s4152_s20 }
 0x138   : > { %1727 = vrot.lane.b32.xlu1 %v1651_v48, %s4152_s20 }
 0x13a   : > { %v4673_v61 = vpop.permute.xlu1 %1145 }
 0x13b   : > { %1729 = vrot.lane.b32.xlu0 %v1652_v50, %s4152_s20 }
 0x13c   : > { %1763 = vrot.lane.b32.xlu1 %v1669_v53, %s4152_s20 }
 0x13d   : > { %3861 = vmatmul.mubr.msk.bf16.gmra.mrb[24].mxu0 %vm565_vm1, %v539_v51  ;;  %v4677_v63 = vpop.permute.xlu0 %1175  ;;  %v776_v51 = vld [vmem:[#allocation2 + $0x8] sm:$0xff] }
 0x13e   : > { %3864 = vmatprep.mubr.msk.bf16.mxu0 %vm565_vm1, %v540_v52  ;;  %v4675_v62 = vpop.permute.xlu1 %1179 }
 0x13f   : > { %1765 = vrot.lane.b32.xlu0 %v1670_v54, %s4152_s20 }
 0x140   : > { %1731 = vrot.lane.b32.xlu1 %v1653_v56, %s4152_s20 }
 0x141   : > { %v4679_v1 = vpop.permute.xlu0 %1181 }
 0x142   : > { %v1148_v0 = vpop.permute.xlu1 %1147 }
 0x143   : > { %1733 = vrot.lane.b32.xlu0 %v1654_v57, %s4152_s20 }
 0x145   : > { %3865 = vmatmul.mubr.msk.bf16.gmra.mrb[28].mxu0 %vm565_vm1, %v541_v58  ;;  %v4683_v3 = vpop.permute.xlu0 %1149 }
 0x146   : > { %v4681_v2 = vpop.permute.xlu1 %1183 }
 0x149   : > { %v4687_v5 = vpop.permute.xlu0 %1185 }
 0x14a   : > { %v4685_v4 = vpop.permute.xlu1 %1151 }
 0x14d   : > { %v4691_v7 = vpop.permute.xlu0 %1153 }
 0x14e   : > { %v4689_v6 = vpop.permute.xlu1 %1187 }
 0x151   : > { %v4695_v9 = vpop.permute.xlu0 %1189 }
 0x152   : > { %v4693_v8 = vpop.permute.xlu1 %1155 }
 0x155   : > { %v4699_v11 = vpop.permute.xlu0 %1157 }
 0x156   : > { %v4697_v10 = vpop.permute.xlu1 %1191 }
 0x159   : > { %v4703_v13 = vpop.permute.xlu0 %1193 }
 0x15a   : > { %v4701_v12 = vpop.permute.xlu1 %1159 }
 0x15d   : > { %v4707_v15 = vpop.permute.xlu0 %1161 }
 0x15e   : > { %v4705_v14 = vpop.permute.xlu1 %1195 }
 0x161   : > { %v4711_v17 = vpop.permute.xlu0 %1197 }
 0x162   : > { %v4709_v16 = vpop.permute.xlu1 %1163 }
 0x165   : > { %v4715_v19 = vpop.permute.xlu0 %1165 }
 0x166   : > { %v4713_v18 = vpop.permute.xlu1 %1199 }
 0x167   : > { %6253 = vst [vmem:[#allocation7_spill] sm:$0xff] %v4713_v18 }
 0x169   : > { %v4719_v21 = vpop.permute.xlu0 %1201 }
 0x16a   : > { %v4717_v20 = vpop.permute.xlu1 %1167  ;;  %6254 = vst [vmem:[#allocation8_spill] sm:$0xff] %v4719_v21 }
 0x16d   : > { %v4723_v23 = vpop.permute.xlu0 %1169 }
 0x16e   : > { %v4721_v22 = vpop.permute.xlu1 %1203 }
 0x16f   : > { %6255 = vst [vmem:[#allocation9_spill] sm:$0xff] %v4721_v22 }
 0x171   : > { %v4727_v25 = vpop.permute.xlu0 %1205 }
 0x172   : > { %v4725_v24 = vpop.permute.xlu1 %1171  ;;  %6256 = vst [vmem:[#allocation10_spill] sm:$0xff] %v4727_v25 }
 0x175   : > { %v4731_v27 = vpop.permute.xlu0 %1173 }
 0x176   : > { %v4729_v26 = vpop.permute.xlu1 %1735 }
 0x179   : > { %v4735_v29 = vpop.permute.xlu0 %1737 }
 0x17a   : > { %v4733_v28 = vpop.permute.xlu1 %1703 }
 0x17d   : > { %v4739_v32 = vpop.permute.xlu0 %1705 }
 0x17e   : > { %v4737_v30 = vpop.permute.xlu1 %1739 }
 0x181   : > { %v4741_v34 = vpop.permute.xlu0 %1741 }
 0x182   : > { %v1708_v33 = vpop.permute.xlu1 %1707 }
 0x185   : > { %v4745_v37 = vpop.permute.xlu0 %1709 }
 0x186   : > { %v4743_v35 = vpop.permute.xlu1 %1743 }
 0x189   : > { %v4754_v38 = vpop.permute.xlu0 %1745 }
 0x18a   : > { %v4747_v31 = vpop.permute.xlu1 %1711 }
 0x18d   : > { %v4767_v55 = vpop.permute.xlu0 %1713 }
 0x18e   : > { %v4761_v52 = vpop.permute.xlu1 %1747 }
 0x1c8   : > { %v3838_v39 = vpop.f32.mrb[0].mxu0 }
 0x1c9   : > { %v657_v42 = vadd.f32 %v3838_v39, %v4752_v36  ;;  %v648_v40 = vpop.f32.mrb[1].mxu0 }
 0x1ca   : > { %v4758_v44 = vadd.f32 %v4752_v36, %v648_v40  ;;  %v3839_v45 = vpop.f32.mrb[2].mxu0 }
 0x1cb   : > { %v809_v47 = vsub.f32 %v657_v42, %v777_v41  ;;  %v1241_v48 = vsub.f32 %v657_v42, %v1148_v0  ;;  %v660_v49 = vadd.f32 %v3839_v45, %v4752_v36  ;;  %v651_v50 = vpop.f32.mrb[3].mxu0  ;;  %v1801_v58 = vsub.f32 %v657_v42, %v1708_v33 }
 0x1cc   : > { %v807_v53 = vsub.f32 %v4758_v44, %v775_v43  ;;  %v4765_v54 = vadd.f32 %v4752_v36, %v651_v50  ;;  %v1239_v0 = vsub.f32 %v4758_v44, %v4671_v60  ;;  %v1799_v33 = vsub.f32 %v4758_v44, %v4733_v28 }
 0x1cd   : > { %v841_v56 = vmul.f32 0.5, %v809_v47  ;;  %v1273_v57 = vmul.f32 0.5, %v1241_v48  ;;  %v810_v39 = vsub.f32 %v660_v49, %v778_v46  ;;  %v1242_v22 = vsub.f32 %v660_v49, %v4683_v3  ;;  %v4776_v48 = vpop.permute.xlu1 %1715 }
 0x1ce   : > { %v839_v40 = vmul.f32 0.5, %v807_v53  ;;  %v808_v45 = vsub.f32 %v4765_v54, %v776_v51  ;;  %v1833_v42 = vmul.f32 0.5, %v1801_v58  ;;  %v1802_v3 = vsub.f32 %v660_v49, %v4745_v37 }
 0x1cf   : > { %v873_v21 = vadd.f32 %v841_v56, %v777_v41  ;;  %v842_v18 = vmul.f32 0.5, %v810_v39  ;;  %1339 = vrot.lane.b32.xlu1 %v1273_v57, %s4153_s28  ;;  %v1271_v41 = vmul.f32 0.5, %v1239_v0  ;;  %v4779_v56 = vpop.permute.xlu0 %1749  ;;  %v1274_v57 = vmul.f32 0.5, %v1242_v22 }
 0x1d0   : > { %v871_v25 = vadd.f32 %v839_v40, %v775_v43  ;;  %v840_v50 = vmul.f32 0.5, %v808_v45  ;;  %v1240_v58 = vsub.f32 %v4765_v54, %v4673_v61  ;;  %v1834_v39 = vmul.f32 0.5, %v1802_v3 }
 0x1d1   : > { %vm905_vm2 = vcmp.ge.f32.partialorder %v873_v21, 1.0  ;;  %v874_v47 = vadd.f32 %v842_v18, %v778_v46  ;;  %v6230_v18 = vmov 0.0   ;;  %1341 = vrot.lane.b32.xlu0 %v1274_v57, %s4153_s28  ;;  %v4810_v40 = vpop.permute.xlu1 %1751 }
 0x1d2   : > { %v937_v60 = vsel %vm905_vm2, 0.0, %v873_v21  ;;  %vm903_vm3 = vcmp.ge.f32.partialorder %v871_v25, 1.0  ;;  %v872_v53 = vadd.f32 %v840_v50, %v776_v51  ;;  %v4787_v28 = vsel %vm905_vm2, 1.0, %v6230_v18 }
 0x1d3   : > { %969 = vst.msk [vmem:[#allocation2 + $0x10] sm:$0xff] %vm565_vm1, %v937_v60  ;;  %v935_v43 = vsel %vm903_vm3, 0.0, %v871_v25  ;;  %vm906_vm4 = vcmp.ge.f32.partialorder %v874_v47, 1.0  ;;  %1899 = vrot.lane.b32.xlu1 %v1833_v42, %s4152_s20  ;;  %6257 = vst [vmem:[#allocation11_spill] sm:$0xff] %v4787_v28  ;;  %v4799_v21 = vsel %vm903_vm3, 1.0, %v6230_v18  ;;  %v781_v25 = vld [vmem:[#allocation2 + $0x30] sm:$0xff]  ;;  %v4812_v45 = vpop.permute.xlu0 %1717 }
 0x1d4   : > { %967 = vst.msk [vmem:[#allocation2] sm:$0xff] %vm565_vm1, %v935_v43  ;;  %v938_v44 = vsel %vm906_vm4, 0.0, %v874_v47  ;;  %v4791_v46 = vsel %vm906_vm4, 1.0, %v6230_v18  ;;  %vm904_vm5 = vcmp.ge.f32.partialorder %v872_v53, 1.0  ;;  %6259 = vst [vmem:[#allocation13_spill] sm:$0xff] %v4799_v21  ;;  %v1831_v50 = vmul.f32 0.5, %v1799_v33 }
 0x1d5   : > { %6258 = vst [vmem:[#allocation12_spill] sm:$0xff] %v4791_v46  ;;  %970 = vst.msk [vmem:[#allocation2 + $0x18] sm:$0xff] %vm565_vm1, %v938_v44  ;;  %v936_v22 = vsel %vm904_vm5, 0.0, %v872_v53  ;;  %v4802_v49 = vsel %vm904_vm5, 1.0, %v6230_v18  ;;  %1901 = vrot.lane.b32.xlu0 %v1834_v39, %s4152_s20  ;;  %v779_v60 = vld [vmem:[#allocation2 + $0x20] sm:$0xff]  ;;  %v1800_v53 = vsub.f32 %v4765_v54, %v4739_v32  ;;  %v782_v43 = vld [vmem:[#allocation2 + $0x38] sm:$0xff]  ;;  %v4830_v51 = vpop.permute.xlu1 %1719 }
 0x1d6   : > { %968 = vst.msk [vmem:[#allocation2 + $0x8] sm:$0xff] %vm565_vm1, %v936_v22  ;;  %v1272_v3 = vmul.f32 0.5, %v1240_v58  ;;  %v780_v54 = vld [vmem:[#allocation2 + $0x28] sm:$0xff] }
 0x1d7   : > { %1335 = vrot.lane.b32.xlu1 %v1271_v41, %s4153_s28  ;;  %v1832_v18 = vmul.f32 0.5, %v1800_v53 }
 0x1d8   : > { %v3842_v0 = vpop.f32.mrb[4].mxu0 }
 0x1d9   : > { %v673_v42 = vadd.f32 %v3842_v0, %v4752_v36  ;;  %v664_v47 = vpop.f32.mrb[5].mxu0  ;;  %1337 = vrot.lane.b32.xlu0 %v1272_v3, %s4153_s28 }
 0x1da   : > { %v4819_v61 = vadd.f32 %v4752_v36, %v664_v47  ;;  %v3843_v41 = vpop.f32.mrb[6].mxu0 }
 0x1db   : > { %v813_v57 = vsub.f32 %v673_v42, %v781_v25  ;;  %v1245_v44 = vsub.f32 %v673_v42, %v4693_v8  ;;  %v676_v33 = vadd.f32 %v3843_v41, %v4752_v36  ;;  %1895 = vrot.lane.b32.xlu1 %v1831_v50, %s4152_s20  ;;  %v667_v22 = vpop.f32.mrb[7].mxu0  ;;  %v1805_v0 = vsub.f32 %v673_v42, %v4776_v48  ;;  %v4833_v50 = vpop.permute.xlu0 %1753 }
 0x1dc   : > { %v811_v39 = vsub.f32 %v4819_v61, %v779_v60  ;;  %v4827_v32 = vadd.f32 %v4752_v36, %v667_v22 }
 0x1dd   : > { %v845_v47 = vmul.f32 0.5, %v813_v57  ;;  %v1277_v37 = vmul.f32 0.5, %v1245_v44  ;;  %v814_v58 = vsub.f32 %v676_v33, %v782_v43  ;;  %v1246_v41 = vsub.f32 %v676_v33, %v4699_v11  ;;  %1897 = vrot.lane.b32.xlu0 %v1832_v18, %s4152_s20 }
 0x1de   : > { %v843_v8 = vmul.f32 0.5, %v811_v39  ;;  %v812_v48 = vsub.f32 %v4827_v32, %v780_v54  ;;  %v1243_v57 = vsub.f32 %v4819_v61, %v4685_v4  ;;  %v1837_v3 = vmul.f32 0.5, %v1805_v0  ;;  %v4845_v4 = vpop.permute.xlu1 %1755 }
 0x1df   : > { %v877_v28 = vadd.f32 %v845_v47, %v781_v25  ;;  %v846_v46 = vmul.f32 0.5, %v814_v58  ;;  %1347 = vrot.lane.b32.xlu1 %v1277_v37, %s4153_s28  ;;  %v1278_v22 = vmul.f32 0.5, %v1246_v41  ;;  %v4848_v53 = vpop.permute.xlu0 %1721  ;;  %v6260_v18 = vmov 0.0  }
 0x1e0   : > { %v875_v42 = vadd.f32 %v843_v8, %v779_v60  ;;  %v844_v39 = vmul.f32 0.5, %v812_v48  ;;  %v1806_v60 = vsub.f32 %v676_v33, %v4812_v45  ;;  %v1275_v47 = vmul.f32 0.5, %v1243_v57  ;;  %v785_v48 = vld [vmem:[#allocation2 + $0x50] sm:$0xff] }
 0x1e1   : > { %vm909_vm6 = vcmp.ge.f32.partialorder %v877_v28, 1.0  ;;  %v878_v44 = vadd.f32 %v846_v46, %v782_v43  ;;  %v1803_v45 = vsub.f32 %v4819_v61, %v4747_v31  ;;  %1349 = vrot.lane.b32.xlu0 %v1278_v22, %s4153_s28  ;;  %v1244_v31 = vsub.f32 %v4827_v32, %v4691_v7 }
 0x1e2   : > { %v941_v11 = vsel %vm909_vm6, 0.0, %v877_v28  ;;  %vm907_vm7 = vcmp.ge.f32.partialorder %v875_v42, 1.0  ;;  %v876_v37 = vadd.f32 %v844_v39, %v780_v54  ;;  %v4852_v43 = vsel %vm909_vm6, 1.0, %v6260_v18  ;;  %v1724_v22 = vpop.permute.xlu1 %1723 }
 0x1e3   : > { %973 = vst.msk [vmem:[#allocation2 + $0x30] sm:$0xff] %vm565_vm1, %v941_v11  ;;  %v939_v25 = vsel %vm907_vm7, 0.0, %v875_v42  ;;  %vm910_vm8 = vcmp.ge.f32.partialorder %v878_v44, 1.0  ;;  %1907 = vrot.lane.b32.xlu1 %v1837_v3, %s4152_s20  ;;  %6261 = vst [vmem:[#allocation14_spill] sm:$0xff] %v4852_v43  ;;  %v4865_v28 = vsel %vm907_vm7, 1.0, %v6260_v18  ;;  %v1838_v61 = vmul.f32 0.5, %v1806_v60  ;;  %v4880_v7 = vpop.permute.xlu0 %1757 }
 0x1e4   : > { %971 = vst.msk [vmem:[#allocation2 + $0x20] sm:$0xff] %vm565_vm1, %v939_v25  ;;  %v942_v46 = vsel %vm910_vm8, 0.0, %v878_v44  ;;  %v4855_v0 = vsel %vm910_vm8, 1.0, %v6260_v18  ;;  %vm908_vm9 = vcmp.ge.f32.partialorder %v876_v37, 1.0  ;;  %6263 = vst [vmem:[#allocation16_spill] sm:$0xff] %v4865_v28  ;;  %v1835_v57 = vmul.f32 0.5, %v1803_v45 }
 0x1e5   : > { %6262 = vst [vmem:[#allocation15_spill] sm:$0xff] %v4855_v0  ;;  %974 = vst.msk [vmem:[#allocation2 + $0x38] sm:$0xff] %vm565_vm1, %v942_v46  ;;  %v940_v54 = vsel %vm908_vm9, 0.0, %v876_v37  ;;  %v4868_v58 = vsel %vm908_vm9, 1.0, %v6260_v18  ;;  %1909 = vrot.lane.b32.xlu0 %v1838_v61, %s4152_s20  ;;  %v783_v44 = vld [vmem:[#allocation2 + $0x40] sm:$0xff]  ;;  %v1804_v39 = vsub.f32 %v4827_v32, %v4767_v55  ;;  %v786_v37 = vld [vmem:[#allocation2 + $0x58] sm:$0xff] }
 0x1e6   : > { %6264 = vst [vmem:[#allocation17_spill] sm:$0xff] %v4868_v58  ;;  %972 = vst.msk [vmem:[#allocation2 + $0x28] sm:$0xff] %vm565_vm1, %v940_v54  ;;  %v1276_v60 = vmul.f32 0.5, %v1244_v31  ;;  %v784_v55 = vld [vmem:[#allocation2 + $0x48] sm:$0xff] }
 0x1e7   : > { %1343 = vrot.lane.b32.xlu1 %v1275_v47, %s4153_s28  ;;  %v1726_v28 = vpop.permute.xlu0 %1725 }
 0x1e8   : > { %v3846_v41 = vpop.f32.mrb[8].mxu0 }
 0x1e9   : > { %v689_v42 = vadd.f32 %v3846_v41, %v4752_v36  ;;  %v680_v3 = vpop.f32.mrb[9].mxu0  ;;  %1345 = vrot.lane.b32.xlu0 %v1276_v60, %s4153_s28 }
 0x1ea   : > { %v681_v11 = vadd.f32 %v4752_v36, %v680_v3  ;;  %v3847_v25 = vpop.f32.mrb[10].mxu0 }
 0x1eb   : > { %v817_v46 = vsub.f32 %v689_v42, %v785_v48  ;;  %v1249_v47 = vsub.f32 %v689_v42, %v4709_v16  ;;  %v692_v45 = vadd.f32 %v3847_v25, %v4752_v36  ;;  %1903 = vrot.lane.b32.xlu1 %v1835_v57, %s4152_s20  ;;  %v683_v54 = vpop.f32.mrb[11].mxu0  ;;  %v1809_v41 = vsub.f32 %v689_v42, %v1724_v22 }
 0x1ec   : > { %v815_v61 = vsub.f32 %v681_v11, %v783_v44  ;;  %v4887_v33 = vadd.f32 %v4752_v36, %v683_v54  ;;  %v1836_v16 = vmul.f32 0.5, %v1804_v39  ;;  %v1247_v22 = vsub.f32 %v681_v11, %v4701_v12 }
 0x1ed   : > { %v849_v32 = vmul.f32 0.5, %v817_v46  ;;  %v1281_v8 = vmul.f32 0.5, %v1249_v47  ;;  %v818_v3 = vsub.f32 %v692_v45, %v786_v37  ;;  %v1250_v43 = vsub.f32 %v692_v45, %v4715_v19 }
 0x1ee   : > { %v847_v31 = vmul.f32 0.5, %v815_v61  ;;  %v816_v57 = vsub.f32 %v4887_v33, %v784_v55  ;;  %v1841_v54 = vmul.f32 0.5, %v1809_v41  ;;  %1905 = vrot.lane.b32.xlu0 %v1836_v16, %s4152_s20  ;;  %v1807_v39 = vsub.f32 %v681_v11, %v4830_v51 }
 0x1ef   : > { %v881_v0 = vadd.f32 %v849_v32, %v785_v48  ;;  %v850_v25 = vmul.f32 0.5, %v818_v3  ;;  %1355 = vrot.lane.b32.xlu1 %v1281_v8, %s4153_s28  ;;  %v1282_v47 = vmul.f32 0.5, %v1250_v43  ;;  %v1810_v8 = vsub.f32 %v692_v45, %v1726_v28 }
 0x1f0   : > { %v879_v42 = vadd.f32 %v847_v31, %v783_v44  ;;  %v848_v60 = vmul.f32 0.5, %v816_v57  ;;  %v1248_v51 = vsub.f32 %v4887_v33, %v4707_v15  ;;  %v789_v31 = vld [vmem:[#allocation2 + $0x70] sm:$0xff]  ;;  %v1839_v16 = vmul.f32 0.5, %v1807_v39 }
 0x1f1   : > { %vm913_vm10 = vcmp.ge.f32.partialorder %v881_v0, 1.0  ;;  %v882_v46 = vadd.f32 %v850_v25, %v786_v37  ;;  %v1842_v11 = vmul.f32 0.5, %v1810_v8  ;;  %v1808_v15 = vsub.f32 %v4887_v33, %v4848_v53  ;;  %v788_v33 = vld [vmem:[#allocation2 + $0x68] sm:$0xff] }
 0x1f2   : > { %v945_v61 = vsel %vm913_vm10, 0.0, %v881_v0  ;;  %vm911_vm11 = vcmp.ge.f32.partialorder %v879_v42, 1.0  ;;  %v880_v48 = vadd.f32 %v848_v60, %v784_v55  ;;  %v4900_v44 = vsel %vm913_vm10, 1.0, %v6260_v18  ;;  %1357 = vrot.lane.b32.xlu0 %v1282_v47, %s4153_s28  ;;  %v4920_v55 = vpop.permute.xlu1 %1759 }
 0x1f3   : > { %977 = vst.msk [vmem:[#allocation2 + $0x50] sm:$0xff] %vm565_vm1, %v945_v61  ;;  %v943_v19 = vsel %vm911_vm11, 0.0, %v879_v42  ;;  %vm914_vm12 = vcmp.ge.f32.partialorder %v882_v46, 1.0  ;;  %1915 = vrot.lane.b32.xlu1 %v1841_v54, %s4152_s20  ;;  %6265 = vst [vmem:[#allocation18_spill] sm:$0xff] %v4900_v44  ;;  %v1279_v0 = vmul.f32 0.5, %v1247_v22  ;;  %v4912_v45 = vsel %vm911_vm11, 1.0, %v6260_v18 }
 0x1f4   : > { %975 = vst.msk [vmem:[#allocation2 + $0x40] sm:$0xff] %vm565_vm1, %v943_v19  ;;  %v946_v12 = vsel %vm914_vm12, 0.0, %v882_v46  ;;  %v4903_v43 = vsel %vm914_vm12, 1.0, %v6260_v18  ;;  %vm912_vm13 = vcmp.ge.f32.partialorder %v880_v48, 1.0  ;;  %6267 = vst [vmem:[#allocation20_spill] sm:$0xff] %v4912_v45  ;;  %v787_v42 = vld [vmem:[#allocation2 + $0x60] sm:$0xff] }
 0x1f5   : > { %6266 = vst [vmem:[#allocation19_spill] sm:$0xff] %v4903_v43  ;;  %978 = vst.msk [vmem:[#allocation2 + $0x58] sm:$0xff] %vm565_vm1, %v946_v12  ;;  %v944_v37 = vsel %vm912_vm13, 0.0, %v880_v48  ;;  %v4915_v41 = vsel %vm912_vm13, 1.0, %v6260_v18  ;;  %v790_v46 = vld [vmem:[#allocation2 + $0x78] sm:$0xff]  ;;  %v1280_v47 = vmul.f32 0.5, %v1248_v51 }
 0x1f6   : > { %6268 = vst [vmem:[#allocation21_spill] sm:$0xff] %v4915_v41  ;;  %976 = vst.msk [vmem:[#allocation2 + $0x48] sm:$0xff] %vm565_vm1, %v944_v37  ;;  %1917 = vrot.lane.b32.xlu0 %v1842_v11, %s4152_s20 }
 0x1f7   : > { %1351 = vrot.lane.b32.xlu1 %v1279_v0, %s4153_s28  ;;  %v1728_v0 = vpop.permute.xlu1 %1727 }
 0x1f8   : > { %v3850_v3 = vpop.f32.mrb[12].mxu0 }
 0x1f9   : > { %v4927_v25 = vadd.f32 %v3850_v3, %v4752_v36  ;;  %v696_v57 = vpop.f32.mrb[13].mxu0 }
 0x1fa   : > { %v697_v22 = vadd.f32 %v4752_v36, %v696_v57  ;;  %v3851_v54 = vpop.f32.mrb[14].mxu0  ;;  %1353 = vrot.lane.b32.xlu0 %v1280_v47, %s4153_s28 }
 0x1fb   : > { %v821_v60 = vsub.f32 %v4927_v25, %v789_v31  ;;  %v1253_v61 = vsub.f32 %v4927_v25, %v4725_v24  ;;  %v4936_v19 = vadd.f32 %v3851_v54, %v4752_v36  ;;  %1911 = vrot.lane.b32.xlu1 %v1839_v16, %s4152_s20  ;;  %v699_v48 = vpop.f32.mrb[15].mxu0  ;;  %v1840_v16 = vmul.f32 0.5, %v1808_v15 }
 0x1fc   : > { %v819_v8 = vsub.f32 %v697_v22, %v787_v42  ;;  %v1251_v12 = vsub.f32 %v697_v22, %v4717_v20  ;;  %v4941_v53 = vadd.f32 %v4752_v36, %v699_v48  ;;  %v1811_v11 = vsub.f32 %v697_v22, %v1728_v0  ;;  %v4951_v48 = vpop.permute.xlu0 %1761 }
 0x1fd   : > { %v853_v39 = vmul.f32 0.5, %v821_v60  ;;  %v1285_v37 = vmul.f32 0.5, %v1253_v61  ;;  %v822_v24 = vsub.f32 %v4936_v19, %v790_v46  ;;  %v1254_v3 = vsub.f32 %v4936_v19, %v4731_v27 }
 0x1fe   : > { %v851_v51 = vmul.f32 0.5, %v819_v8  ;;  %v820_v54 = vsub.f32 %v4941_v53, %v788_v33  ;;  %v1283_v47 = vmul.f32 0.5, %v1251_v12  ;;  %1913 = vrot.lane.b32.xlu0 %v1840_v16, %s4152_s20  ;;  %v1843_v0 = vmul.f32 0.5, %v1811_v11  ;;  %v793_v12 = vld [vmem:[#allocation2 + $0x90] sm:$0xff] }
 0x1ff   : > { %v4947_v57 = vadd.f32 %v853_v39, %v789_v31  ;;  %v854_v20 = vmul.f32 0.5, %v822_v24  ;;  %1363 = vrot.lane.b32.xlu1 %v1285_v37, %s4153_s28  ;;  %v1286_v8 = vmul.f32 0.5, %v1254_v3 }
 0x200   : > { %v4953_v60 = vadd.f32 %v851_v51, %v787_v42  ;;  %v3854_v61 = vpop.f32.mrb[16].mxu0  ;;  %v852_v27 = vmul.f32 0.5, %v820_v54  ;;  %v1252_v42 = vsub.f32 %v4941_v53, %v4723_v23  ;;  %v791_v51 = vld [vmem:[#allocation2 + $0x80] sm:$0xff] }
 0x201   : > { %vm917_vm14 = vcmp.ge.f32.partialorder %v4947_v57, 1.0  ;;  %v4956_v22 = vadd.f32 %v854_v20, %v790_v46  ;;  %v712_v31 = vpop.f32.mrb[17].mxu0  ;;  %v721_v24 = vadd.f32 %v3854_v61, %v4752_v36 }
 0x202   : > { %v949_v15 = vsel %vm917_vm14, 0.0, %v4947_v57  ;;  %vm915_vm15 = vcmp.ge.f32.partialorder %v4953_v60, 1.0  ;;  %v3855_v39 = vpop.f32.mrb[18].mxu0  ;;  %v4970_v37 = vadd.f32 %v852_v27, %v788_v33  ;;  %v4979_v11 = vadd.f32 %v4752_v36, %v712_v31  ;;  %v794_v33 = vld [vmem:[#allocation2 + $0x98] sm:$0xff]  ;;  %1365 = vrot.lane.b32.xlu0 %v1286_v8, %s4153_s28  ;;  %v1730_v27 = vpop.permute.xlu0 %1729 }
 0x203   : > { %981 = vst.msk [vmem:[#allocation2 + $0x70] sm:$0xff] %vm565_vm1, %v949_v15  ;;  %v947_v46 = vsel %vm915_vm15, 0.0, %v4953_v60  ;;  %vm918_vm0 = vcmp.ge.f32.partialorder %v4956_v22, 1.0  ;;  %v715_v3 = vpop.f32.mrb[19].mxu0  ;;  %1359 = vrot.lane.b32.xlu1 %v1283_v47, %s4153_s28  ;;  %v4982_v16 = vadd.f32 %v3855_v39, %v4752_v36  ;;  %v825_v54 = vsub.f32 %v721_v24, %v793_v12  ;;  %v792_v39 = vld [vmem:[#allocation2 + $0x88] sm:$0xff] }
 0x204   : > { %979 = vst.msk [vmem:[#allocation2 + $0x60] sm:$0xff] %vm565_vm1, %v947_v46  ;;  %v950_v23 = vsel %vm918_vm0, 0.0, %v4956_v22  ;;  %v4985_v20 = vadd.f32 %v4752_v36, %v715_v3  ;;  %vm916_vm2 = vcmp.ge.f32.partialorder %v4970_v37, 1.0  ;;  %v1257_v47 = vsub.f32 %v721_v24, %v4675_v62 }
 0x205   : > { %982 = vst.msk [vmem:[#allocation2 + $0x78] sm:$0xff] %vm565_vm1, %v950_v23  ;;  %v1817_v61 = vsub.f32 %v721_v24, %v4737_v30  ;;  %v948_v31 = vsel %vm916_vm2, 0.0, %v4970_v37  ;;  %v823_v15 = vsub.f32 %v4979_v11, %v791_v51  ;;  %v1284_v46 = vmul.f32 0.5, %v1252_v42 }
 0x206   : > { %980 = vst.msk [vmem:[#allocation2 + $0x68] sm:$0xff] %vm565_vm1, %v948_v31  ;;  %v1812_v3 = vsub.f32 %v4941_v53, %v1730_v27  ;;  %v857_v23 = vmul.f32 0.5, %v825_v54  ;;  %v826_v62 = vsub.f32 %v4982_v16, %v794_v33  ;;  %v1289_v30 = vmul.f32 0.5, %v1257_v47 }
 0x207   : > { %1919 = vrot.lane.b32.xlu1 %v1843_v0, %s4152_s20  ;;  %v855_v8 = vmul.f32 0.5, %v823_v15  ;;  %v1818_v44 = vsub.f32 %v4982_v16, %v4741_v34  ;;  %v824_v43 = vsub.f32 %v4985_v20, %v792_v39  ;;  %1361 = vrot.lane.b32.xlu0 %v1284_v46, %s4153_s28  ;;  %v1258_v54 = vsub.f32 %v4982_v16, %v4679_v1 }
 0x208   : > { %v3858_v24 = vpop.f32.mrb[20].mxu0  ;;  %v5000_v28 = vadd.f32 %v857_v23, %v793_v12  ;;  %v858_v32 = vmul.f32 0.5, %v826_v62  ;;  %v1844_v47 = vmul.f32 0.5, %v1812_v3  ;;  %v1849_v15 = vmul.f32 0.5, %v1817_v61  ;;  %v798_v3 = vld [vmem:[#allocation2 + $0xb8] sm:$0xff] }
 0x209   : > { %v728_v42 = vpop.f32.mrb[21].mxu0  ;;  %v5006_v53 = vadd.f32 %v855_v8, %v791_v51  ;;  %v856_v27 = vmul.f32 0.5, %v824_v43  ;;  %v1255_v1 = vsub.f32 %v4979_v11, %v4677_v63  ;;  %v797_v51 = vld [vmem:[#allocation2 + $0xb0] sm:$0xff]  ;;  %v5028_v16 = vadd.f32 %v3858_v24, %v4752_v36 }
 0x20a   : > { %v3859_v0 = vpop.f32.mrb[22].mxu0  ;;  %vm921_vm3 = vcmp.ge.f32.partialorder %v5000_v28, 1.0  ;;  %v5011_v12 = vadd.f32 %v858_v32, %v794_v33  ;;  %v795_v33 = vld [vmem:[#allocation2 + $0xa0] sm:$0xff]  ;;  %v1290_v61 = vmul.f32 0.5, %v1258_v54  ;;  %v5036_v46 = vadd.f32 %v4752_v36, %v728_v42  ;;  %v796_v42 = vld [vmem:[#allocation2 + $0xa8] sm:$0xff] }
 0x20b   : > { %v731_v31 = vpop.f32.mrb[23].mxu0  ;;  %1371 = vrot.lane.b32.xlu1 %v1289_v30, %s4153_s28  ;;  %v953_v34 = vsel %vm921_vm3, 0.0, %v5000_v28  ;;  %vm919_vm4 = vcmp.ge.f32.partialorder %v5006_v53, 1.0  ;;  %v5025_v32 = vadd.f32 %v856_v27, %v792_v39  ;;  %1921 = vrot.lane.b32.xlu0 %v1844_v47, %s4152_s20  ;;  %v829_v39 = vsub.f32 %v5028_v16, %v797_v51 }
 0x20c   : > { %985 = vst.msk [vmem:[#allocation2 + $0x90] sm:$0xff] %vm565_vm1, %v953_v34  ;;  %v951_v43 = vsel %vm919_vm4, 0.0, %v5006_v53  ;;  %vm922_vm5 = vcmp.ge.f32.partialorder %v5011_v12, 1.0  ;;  %v5044_v62 = vadd.f32 %v3859_v0, %v4752_v36  ;;  %v1815_v30 = vsub.f32 %v4979_v11, %v4729_v26 }
 0x20d   : > { %983 = vst.msk [vmem:[#allocation2 + $0x80] sm:$0xff] %vm565_vm1, %v951_v43  ;;  %v954_v63 = vsel %vm922_vm5, 0.0, %v5011_v12  ;;  %vm920_vm6 = vcmp.ge.f32.partialorder %v5025_v32, 1.0  ;;  %v827_v24 = vsub.f32 %v5036_v46, %v795_v33  ;;  %v1287_v47 = vmul.f32 0.5, %v1255_v1 }
 0x20e   : > { %986 = vst.msk [vmem:[#allocation2 + $0x98] sm:$0xff] %vm565_vm1, %v954_v63  ;;  %v952_v8 = vsel %vm920_vm6, 0.0, %v5025_v32  ;;  %v861_v27 = vmul.f32 0.5, %v829_v39  ;;  %v830_v0 = vsub.f32 %v5044_v62, %v798_v3  ;;  %v5056_v34 = vadd.f32 %v4752_v36, %v731_v31 }
 0x20f   : > { %1931 = vrot.lane.b32.xlu1 %v1849_v15, %s4152_s20  ;;  %984 = vst.msk [vmem:[#allocation2 + $0x88] sm:$0xff] %vm565_vm1, %v952_v8  ;;  %1373 = vrot.lane.b32.xlu0 %v1290_v61, %s4153_s28  ;;  %v1850_v11 = vmul.f32 0.5, %v1818_v44  ;;  %v1256_v15 = vsub.f32 %v4985_v20, %v4666_v59  ;;  %v859_v43 = vmul.f32 0.5, %v827_v24  ;;  %v1261_v31 = vsub.f32 %v5028_v16, %v4689_v6  ;;  %v801_v6 = vld [vmem:[#allocation2 + $0xd0] sm:$0xff] }
 0x210   : > { %v3862_v54 = vpop.f32.mrb[24].mxu0  ;;  %v5061_v23 = vadd.f32 %v861_v27, %v797_v51  ;;  %v862_v1 = vmul.f32 0.5, %v830_v0  ;;  %v828_v8 = vsub.f32 %v5056_v34, %v796_v42  ;;  %v1847_v61 = vmul.f32 0.5, %v1815_v30 }
 0x211   : > { %v744_v26 = vpop.f32.mrb[25].mxu0  ;;  %v5069_v44 = vadd.f32 %v859_v43, %v795_v33  ;;  %v1288_v24 = vmul.f32 0.5, %v1256_v15  ;;  %v1816_v27 = vsub.f32 %v4985_v20, %v4735_v29  ;;  %v5089_v30 = vadd.f32 %v3862_v54, %v4752_v36  ;;  %v799_v29 = vld [vmem:[#allocation2 + $0xc0] sm:$0xff]  ;;  %v802_v15 = vld [vmem:[#allocation2 + $0xd8] sm:$0xff] }
 0x212   : > { %v3863_v63 = vpop.f32.mrb[26].mxu0  ;;  %vm925_vm7 = vcmp.ge.f32.partialorder %v5061_v23, 1.0  ;;  %v5072_v59 = vadd.f32 %v862_v1, %v798_v3  ;;  %v860_v51 = vmul.f32 0.5, %v828_v8  ;;  %v1293_v20 = vmul.f32 0.5, %v1261_v31 }
 0x213   : > { %v747_v45 = vpop.f32.mrb[27].mxu0  ;;  %1367 = vrot.lane.b32.xlu1 %v1287_v47, %s4153_s28  ;;  %1933 = vrot.lane.b32.xlu0 %v1850_v11, %s4152_s20  ;;  %v957_v47 = vsel %vm925_vm7, 0.0, %v5061_v23  ;;  %vm923_vm8 = vcmp.ge.f32.partialorder %v5069_v44, 1.0  ;;  %v5097_v11 = vadd.f32 %v4752_v36, %v744_v26  ;;  %v5105_v1 = vadd.f32 %v3863_v63, %v4752_v36 }
 0x214   : > { %989 = vst.msk [vmem:[#allocation2 + $0xb0] sm:$0xff] %vm565_vm1, %v957_v47  ;;  %v955_v33 = vsel %vm923_vm8, 0.0, %v5069_v44  ;;  %vm926_vm9 = vcmp.ge.f32.partialorder %v5072_v59, 1.0  ;;  %v5086_v3 = vadd.f32 %v860_v51, %v796_v42  ;;  %v833_v42 = vsub.f32 %v5089_v30, %v801_v6  ;;  %v800_v51 = vld [vmem:[#allocation2 + $0xc8] sm:$0xff] }
 0x215   : > { %987 = vst.msk [vmem:[#allocation2 + $0xa0] sm:$0xff] %vm565_vm1, %v955_v33  ;;  %v958_v0 = vsel %vm926_vm9, 0.0, %v5072_v59  ;;  %v1848_v31 = vmul.f32 0.5, %v1816_v27  ;;  %v1262_v33 = vsub.f32 %v5044_v62, %v4695_v9  ;;  %v834_v63 = vsub.f32 %v5105_v1, %v802_v15 }
 0x216   : > { %990 = vst.msk [vmem:[#allocation2 + $0xb8] sm:$0xff] %vm565_vm1, %v958_v0  ;;  %vm924_vm10 = vcmp.ge.f32.partialorder %v5086_v3, 1.0  ;;  %v865_v0 = vmul.f32 0.5, %v833_v42  ;;  %v6269_v54 = vsub.f32 %v5028_v16, %v4761_v52  ;;  %v1259_v41 = vsub.f32 %v5036_v46, %v4681_v2 }
 0x217   : > { %1927 = vrot.lane.b32.xlu1 %v1847_v61, %s4152_s20  ;;  %1369 = vrot.lane.b32.xlu0 %v1288_v24, %s4153_s28  ;;  %v956_v26 = vsel %vm924_vm10, 0.0, %v5086_v3  ;;  %v831_v61 = vsub.f32 %v5097_v11, %v799_v29  ;;  %v5117_v24 = vadd.f32 %v4752_v36, %v747_v45  ;;  %v1826_v42 = vsub.f32 %v5105_v1, %v4880_v7 }
 0x218   : > { %v3866_v43 = vpop.f32.mrb[28].mxu0  ;;  %988 = vst.msk [vmem:[#allocation2 + $0xa8] sm:$0xff] %vm565_vm1, %v956_v26  ;;  %v1853_v39 = vmul.f32 0.5, %v6269_v54  ;;  %v5125_v9 = vadd.f32 %v865_v0, %v801_v6  ;;  %v866_v26 = vmul.f32 0.5, %v834_v63  ;;  %v1291_v2 = vmul.f32 0.5, %v1259_v41  ;;  %v804_v0 = vld [vmem:[#allocation2 + $0xe8] sm:$0xff] }
 0x219   : > { %v760_v8 = vpop.f32.mrb[29].mxu0  ;;  %v863_v58 = vmul.f32 0.5, %v831_v61  ;;  %v832_v45 = vsub.f32 %v5117_v24, %v800_v51  ;;  %v1819_v6 = vsub.f32 %v5036_v46, %v4743_v35  ;;  %v5151_v41 = vadd.f32 %v3866_v43, %v4752_v36  ;;  %v803_v35 = vld [vmem:[#allocation2 + $0xe0] sm:$0xff]  ;;  %v806_v43 = vld [vmem:[#allocation2 + $0xf8] sm:$0xff] }
 0x21a   : > { %v3867_v47 = vpop.f32.mrb[30].mxu0  ;;  %vm6243_vm11 = vcmp.ge.f32.partialorder %v5125_v9, 1.0  ;;  %v5134_v52 = vadd.f32 %v866_v26, %v802_v15  ;;  %v1260_v46 = vsub.f32 %v5056_v34, %v4687_v5  ;;  %v1820_v15 = vsub.f32 %v5056_v34, %v4754_v38 }
 0x21b   : > { %v763_v27 = vpop.f32.mrb[31].mxu0  ;;  %1379 = vrot.lane.b32.xlu1 %v1293_v20, %s4153_s28  ;;  %1929 = vrot.lane.b32.xlu0 %v1848_v31, %s4152_s20  ;;  %v5131_v21 = vadd.f32 %v863_v58, %v799_v29  ;;  %v1294_v20 = vmul.f32 0.5, %v1262_v33  ;;  %v864_v16 = vmul.f32 0.5, %v832_v45  ;;  %v961_v54 = vsel %vm6243_vm11, 0.0, %v5125_v9  ;;  %v805_v58 = vld [vmem:[#allocation2 + $0xf0] sm:$0xff] }
 0x21c   : > { %993 = vst.msk [vmem:[#allocation2 + $0xd0] sm:$0xff] %vm565_vm1, %v961_v54  ;;  %vm6244_vm13 = vcmp.ge.f32.partialorder %v5134_v52, 1.0  ;;  %v5163_v61 = vadd.f32 %v4752_v36, %v760_v8  ;;  %v837_v5 = vsub.f32 %v5151_v41, %v805_v58  ;;  %v5172_v38 = vadd.f32 %v3867_v47, %v4752_v36 }
 0x21d   : > { %vm6246_vm12 = vcmp.ge.f32.partialorder %v5131_v21, 1.0  ;;  %v962_v31 = vsel %vm6244_vm13, 0.0, %v5134_v52  ;;  %v1851_v34 = vmul.f32 0.5, %v1819_v6  ;;  %v1265_v8 = vsub.f32 %v5089_v30, %v4705_v14 }
 0x21e   : > { %v959_v29 = vsel %vm6246_vm12, 0.0, %v5131_v21  ;;  %994 = vst.msk [vmem:[#allocation2 + $0xd8] sm:$0xff] %vm565_vm1, %v962_v31  ;;  %v1263_v63 = vsub.f32 %v5097_v11, %v4697_v10  ;;  %v869_v47 = vmul.f32 0.5, %v837_v5  ;;  %v838_v26 = vsub.f32 %v5172_v38, %v806_v43 }
 0x21f   : > { %1939 = vrot.lane.b32.xlu1 %v1853_v39, %s4152_s20  ;;  %v5148_v39 = vadd.f32 %v864_v16, %v800_v51  ;;  %1381 = vrot.lane.b32.xlu0 %v1294_v20, %s4153_s28  ;;  %991 = vst.msk [vmem:[#allocation2 + $0xc0] sm:$0xff] %vm565_vm1, %v959_v29  ;;  %v6270_v51 = vsub.f32 %v5044_v62, %v4779_v56  ;;  %v1292_v14 = vmul.f32 0.5, %v1260_v46  ;;  %v1297_v29 = vmul.f32 0.5, %v1265_v8 }
 0x220   : > { %v835_v62 = vsub.f32 %v5163_v61, %v803_v35  ;;  %v5186_v45 = vadd.f32 %v4752_v36, %v763_v27  ;;  %v1266_v20 = vsub.f32 %v5105_v1, %v4711_v17  ;;  %v901_v6 = vadd.f32 %v869_v47, %v805_v58 }
 0x221   : > { %v1854_v33 = vmul.f32 0.5, %v6270_v51  ;;  %vm6245_vm11 = vcmp.ge.f32.partialorder %v5148_v39, 1.0  ;;  %v870_v54 = vmul.f32 0.5, %v838_v26  ;;  %v6271_v31 = vsub.f32 %v5089_v30, %v4845_v4 }
 0x222   : > { %v960_v56 = vsel %vm6245_vm11, 0.0, %v5148_v39  ;;  %v867_v16 = vmul.f32 0.5, %v835_v62  ;;  %v836_v10 = vsub.f32 %v5186_v45, %v804_v0  ;;  %v1823_v27 = vsub.f32 %v5097_v11, %v4810_v40 }
 0x223   : > { %1375 = vrot.lane.b32.xlu1 %v1291_v2, %s4153_s28  ;;  %992 = vst.msk [vmem:[#allocation2 + $0xc8] sm:$0xff] %vm565_vm1, %v960_v56  ;;  %1941 = vrot.lane.b32.xlu0 %v1854_v33, %s4152_s20  ;;  %v1852_v2 = vmul.f32 0.5, %v1820_v15  ;;  %v1857_v36 = vmul.f32 0.5, %v6271_v31  ;;  %v1295_v51 = vmul.f32 0.5, %v1263_v63  ;;  %vm6247_vm13 = vcmp.ge.f32.partialorder %v901_v6, 1.0 }
 0x224   : > { %v899_v46 = vadd.f32 %v867_v16, %v803_v35  ;;  %v902_v17 = vadd.f32 %v870_v54, %v806_v43  ;;  %v868_v33 = vmul.f32 0.5, %v836_v10  ;;  %v1298_v58 = vmul.f32 0.5, %v1266_v20  ;;  %v6277_v16 = vld [vmem:[#allocation9_spill] sm:$0xff]  ;;  %v1764_v54 = vpop.permute.xlu1 %1763 }
 0x225   : > { %v1264_v15 = vsub.f32 %v5117_v24, %v4703_v13  ;;  %v965_v5 = vsel %vm6247_vm13, 0.0, %v901_v6  ;;  %v1858_v4 = vmul.f32 0.5, %v1826_v42  ;;  %v5213_v13 = vsel %vm915_vm15, 1.0, %v6260_v18 }
 0x226   : > { %vm931_vm11 = vcmp.ge.f32.partialorder %v899_v46, 1.0  ;;  %997 = vst.msk [vmem:[#allocation2 + $0xf0] sm:$0xff] %vm565_vm1, %v965_v5  ;;  %vm934_vm12 = vcmp.ge.f32.partialorder %v902_v17, 1.0  ;;  %v900_v30 = vadd.f32 %v868_v33, %v804_v0  ;;  %v5218_v7 = vsel %vm916_vm2, 1.0, %v6260_v18 }
 0x227   : > { %1935 = vrot.lane.b32.xlu1 %v1851_v34, %s4152_s20  ;;  %1377 = vrot.lane.b32.xlu0 %v1292_v14, %s4153_s28  ;;  %v963_v40 = vsel %vm931_vm11, 0.0, %v899_v46  ;;  %v966_v11 = vsel %vm934_vm12, 0.0, %v902_v17  ;;  %v5223_v1 = vsel %vm917_vm14, 1.0, %v6260_v18  ;;  %v1069_v60 = vpack.c.bf16 %v5218_v7, %v5213_v13  ;;  %v6278_v46 = vld [vmem:[#allocation10_spill] sm:$0xff]  ;;  %v2501_v13 = vld [vmem:[#allocation5 + $0x10] sm:$0xff]  ;;  %v2499_v7 = vld [vmem:[#allocation5] sm:$0xff] }
 0x228   : > { %995 = vst.msk [vmem:[#allocation2 + $0xe0] sm:$0xff] %vm565_vm1, %v963_v40  ;;  %998 = vst.msk [vmem:[#allocation2 + $0xf8] sm:$0xff] %vm565_vm1, %v966_v11  ;;  %vm932_vm13 = vcmp.ge.f32.partialorder %v900_v30, 1.0  ;;  %v5232_v42 = vsel %vm918_vm0, 1.0, %v6260_v18  ;;  %v5237_v37 = vsel %vm919_vm4, 1.0, %v6260_v18  ;;  %v5245_v43 = vsel %vm920_vm6, 1.0, %v6260_v18  ;;  %v1732_v17 = vpop.permute.xlu1 %1731 }
 0x229   : > { %v964_v57 = vsel %vm932_vm13, 0.0, %v900_v30  ;;  %v1070_v35 = vpack.c.bf16 %v5232_v42, %v5223_v1  ;;  %v5250_v22 = vsel %vm921_vm3, 1.0, %v6260_v18  ;;  %v1071_v53 = vpack.c.bf16 %v5245_v43, %v5237_v37  ;;  %v4046_v30 = vld [vmem:[#allocation3 + $0x10] sm:$0xff] }
 0x22a   : > { %996 = vst.msk [vmem:[#allocation2 + $0xe8] sm:$0xff] %vm565_vm1, %v964_v57  ;;  %v5259_v34 = vsel %vm922_vm5, 1.0, %v6260_v18  ;;  %v5264_v32 = vsel %vm923_vm8, 1.0, %v6260_v18  ;;  %v5269_v28 = vsel %vm924_vm10, 1.0, %v6260_v18  ;;  %v5278_v12 = vsel %vm925_vm7, 1.0, %v6260_v18 }
 0x22b   : > { %1387 = vrot.lane.b32.xlu1 %v1297_v29, %s4153_s28  ;;  %1937 = vrot.lane.b32.xlu0 %v1852_v2, %s4152_s20  ;;  %v1072_v8 = vpack.c.bf16 %v5259_v34, %v5250_v22  ;;  %v1073_v56 = vpack.c.bf16 %v5269_v28, %v5264_v32  ;;  %v5283_v44 = vsel %vm926_vm9, 1.0, %v6260_v18  ;;  %vm6272_vm14 = vcmp.ge.f32.partialorder %v5131_v21, 1.0 }
 0x22c   : > { %v1074_v3 = vpack.c.bf16 %v5283_v44, %v5278_v12  ;;  %v5291_v62 = vsel %vm6272_vm14, 1.0, %v6260_v18  ;;  %vm6273_vm15 = vcmp.ge.f32.partialorder %v5148_v39, 1.0  ;;  %vm6274_vm0 = vcmp.ge.f32.partialorder %v5125_v9, 1.0 }
 0x22d   : > { %v5296_v23 = vsel %vm6273_vm15, 1.0, %v6260_v18  ;;  %v5301_v59 = vsel %vm6274_vm0, 1.0, %v6260_v18  ;;  %vm6275_vm2 = vcmp.ge.f32.partialorder %v5134_v52, 1.0  ;;  %v5312_v21 = vsel %vm931_vm11, 1.0, %v6260_v18 }
 0x22e   : > { %v1075_v0 = vpack.c.bf16 %v5296_v23, %v5291_v62  ;;  %v5308_v63 = vsel %vm6275_vm2, 1.0, %v6260_v18  ;;  %v5316_v39 = vsel %vm932_vm13, 1.0, %v6260_v18  ;;  %vm6276_vm3 = vcmp.ge.f32.partialorder %v901_v6, 1.0  ;;  %v2505_v62 = vld [vmem:[#allocation5 + $0x30] sm:$0xff] }
 0x22f   : > { %1947 = vrot.lane.b32.xlu1 %v1857_v36, %s4152_s20  ;;  %1389 = vrot.lane.b32.xlu0 %v1298_v58, %s4153_s28  ;;  %v1076_v9 = vpack.c.bf16 %v5308_v63, %v5301_v59  ;;  %v1077_v47 = vpack.c.bf16 %v5316_v39, %v5312_v21  ;;  %v5325_v52 = vsel %vm6276_vm3, 1.0, %v6260_v18  ;;  %v5329_v26 = vsel %vm934_vm12, 1.0, %v6260_v18  ;;  %v6279_v58 = vld [vmem:[#allocation7_spill] sm:$0xff] }
 0x230   : > { %v1078_v14 = vpack.c.bf16 %v5329_v26, %v5325_v52  ;;  %v1855_v20 = vmul.f32 0.5, %v1823_v27  ;;  %v1269_v2 = vsub.f32 %v5151_v41, %v6277_v16  ;;  %v1296_v10 = vmul.f32 0.5, %v1264_v15  ;;  %v2503_v59 = vld [vmem:[#allocation5 + $0x20] sm:$0xff] }
 0x231   : > { %v1824_v6 = vsub.f32 %v5117_v24, %v4833_v50  ;;  %v1829_v31 = vsub.f32 %v5151_v41, %v1764_v54  ;;  %v1270_v27 = vsub.f32 %v5172_v38, %v6278_v46  ;;  %v1267_v15 = vsub.f32 %v5163_v61, %v6279_v58  ;;  %v6280_v24 = vld [vmem:[#allocation8_spill] sm:$0xff] }
 0x232   : > { %v1301_v29 = vmul.f32 0.5, %v1269_v2  ;;  %v1268_v41 = vsub.f32 %v5186_v45, %v6280_v24  ;;  %v1813_v2 = vsub.f32 %v4927_v25, %v1732_v17  ;;  %v4049_v17 = vld [vmem:[#allocation3] sm:$0xff]  ;;  %v1828_v58 = vsub.f32 %v5186_v45, %v4951_v48  ;;  %v4050_v24 = vld [vmem:[#allocation4 + $0x18] sm:$0xff] }
 0x233   : > { %1383 = vrot.lane.b32.xlu1 %v1295_v51, %s4153_s28  ;;  %1949 = vrot.lane.b32.xlu0 %v1858_v4, %s4152_s20  ;;  %v1856_v36 = vmul.f32 0.5, %v1824_v6  ;;  %v1766_v51 = vpop.permute.xlu0 %1765  ;;  %v1861_v33 = vmul.f32 0.5, %v1829_v31  ;;  %v1302_v50 = vmul.f32 0.5, %v1270_v27  ;;  %v1299_v5 = vmul.f32 0.5, %v1267_v15  ;;  %v4051_v45 = vld [vmem:[#allocation4] sm:$0xff] }
 0x234   : > { %v1827_v4 = vsub.f32 %v5163_v61, %v4920_v55  ;;  %v1300_v16 = vmul.f32 0.5, %v1268_v41  ;;  %v1845_v46 = vmul.f32 0.5, %v1813_v2 }
 0x236   : > { %v1859_v54 = vmul.f32 0.5, %v1827_v4 }
 0x237   : > { %1943 = vrot.lane.b32.xlu1 %v1855_v20, %s4152_s20  ;;  %1385 = vrot.lane.b32.xlu0 %v1296_v10, %s4153_s28  ;;  %v1734_v57 = vpop.permute.xlu0 %1733  ;;  %v1830_v20 = vsub.f32 %v5172_v38, %v1766_v51  ;;  %v4047_v10 = vld [vmem:[#allocation4 + $0x10] sm:$0xff] }
 0x238   : > { %v1814_v38 = vsub.f32 %v4936_v19, %v1734_v57 }
 0x23b   : > { %1395 = vrot.lane.b32.xlu1 %v1301_v29, %s4153_s28  ;;  %1945 = vrot.lane.b32.xlu0 %v1856_v36, %s4152_s20  ;;  %v1862_v29 = vmul.f32 0.5, %v1830_v20  ;;  %v4048_v36 = vld [vmem:[#allocation3 + $0x18] sm:$0xff]  ;;  %v4091_v20 = vld [vmem:[#allocation3 + $0xd0] sm:$0xff] }
 0x23f   : > { %1955 = vrot.lane.b32.xlu1 %v1861_v33, %s4152_s20  ;;  %1397 = vrot.lane.b32.xlu0 %v1302_v50, %s4153_s28  ;;  %v1846_v33 = vmul.f32 0.5, %v1814_v38 }
 0x241   : > { %v1340_v40 = vpop.permute.xlu1 %1339 }
 0x242   : > { %v5353_v11 = vadd.f32 %v4046_v30, %v1340_v40  ;;  %v1860_v40 = vmul.f32 0.5, %v1828_v58  ;;  %v4056_v58 = vld [vmem:[#allocation3 + $0x38] sm:$0xff] }
 0x243   : > { %1391 = vrot.lane.b32.xlu1 %v1299_v5, %s4153_s28  ;;  %1393 = vrot.lane.b32.xlu0 %v1300_v16, %s4153_s28  ;;  %v1342_v31 = vpop.permute.xlu0 %1341  ;;  %v4052_v16 = vld [vmem:[#allocation3 + $0x8] sm:$0xff] }
 0x244   : > { %vm1465_vm4 = vcmp.ge.f32.partialorder %v5353_v11, 1.0  ;;  %v5366_v25 = vadd.f32 %v4048_v36, %v1342_v31 }
 0x245   : > { %v1497_v55 = vsel %vm1465_vm4, 0.0, %v5353_v11  ;;  %v1900_v61 = vpop.permute.xlu1 %1899  ;;  %v4069_v11 = vld [vmem:[#allocation3 + $0x70] sm:$0xff] }
 0x246   : > { %1529 = vst.msk [vmem:[#allocation3 + $0x10] sm:$0xff] %vm565_vm1, %v1497_v55  ;;  %v1993_v6 = vadd.f32 %v4047_v10, %v1900_v61  ;;  %vm1466_vm6 = vcmp.ge.f32.partialorder %v5366_v25, 1.0  ;;  %v4053_v61 = vld [vmem:[#allocation3 + $0x30] sm:$0xff] }
 0x247   : > { %1951 = vrot.lane.b32.xlu1 %v1859_v54, %s4152_s20  ;;  %1957 = vrot.lane.b32.xlu0 %v1862_v29, %s4152_s20  ;;  %v1498_v15 = vsel %vm1466_vm6, 0.0, %v5366_v25  ;;  %v1902_v50 = vpop.permute.xlu0 %1901  ;;  %v4054_v29 = vld [vmem:[#allocation4 + $0x8] sm:$0xff] }
 0x248   : > { %vm2025_vm5 = vcmp.ge.f32.partialorder %v1993_v6, 1.0  ;;  %1530 = vst.msk [vmem:[#allocation3 + $0x18] sm:$0xff] %vm565_vm1, %v1498_v15  ;;  %v1994_v41 = vadd.f32 %v4050_v24, %v1902_v50  ;;  %v4068_v25 = vld [vmem:[#allocation3 + $0x48] sm:$0xff] }
 0x249   : > { %v2057_v27 = vsel %vm2025_vm5, 0.0, %v1993_v6  ;;  %v1336_v51 = vpop.permute.xlu1 %1335 }
 0x24a   : > { %2089 = vst.msk [vmem:[#allocation4 + $0x10] sm:$0xff] %vm565_vm1, %v2057_v27  ;;  %v5372_v19 = vadd.f32 %v4049_v17, %v1336_v51  ;;  %vm2026_vm8 = vcmp.ge.f32.partialorder %v1994_v41, 1.0  ;;  %v4055_v27 = vld [vmem:[#allocation4 + $0x30] sm:$0xff] }
 0x24b   : > { %1923 = vrot.lane.b32.xlu1 %v1845_v46, %s4152_s20  ;;  %1925 = vrot.lane.b32.xlu0 %v1846_v33, %s4152_s20  ;;  %v2058_v30 = vsel %vm2026_vm8, 0.0, %v1994_v41  ;;  %v1338_v57 = vpop.permute.xlu0 %1337  ;;  %vm5390_vm9 = vmpackc.low %vm2026_vm8, %vm2025_vm5  ;;  %v4057_v41 = vld [vmem:[#allocation3 + $0x20] sm:$0xff] }
 0x24c   : > { %vm1463_vm7 = vcmp.ge.f32.partialorder %v5372_v19, 1.0  ;;  %2090 = vst.msk [vmem:[#allocation4 + $0x18] sm:$0xff] %vm565_vm1, %v2058_v30  ;;  %v5395_v2 = vadd.f32 %v4052_v16, %v1338_v57 }
 0x24d   : > { %v1495_v5 = vsel %vm1463_vm7, 0.0, %v5372_v19  ;;  %v1896_v48 = vpop.permute.xlu1 %1895  ;;  %v4067_v19 = vld [vmem:[#allocation4 + $0x40] sm:$0xff] }
 0x24e   : > { %1527 = vst.msk [vmem:[#allocation3] sm:$0xff] %vm565_vm1, %v1495_v5  ;;  %v5387_v4 = vadd.f32 %v4051_v45, %v1896_v48  ;;  %vm1464_vm11 = vcmp.ge.f32.partialorder %v5395_v2, 1.0 }
 0x24f   : > { %1953 = vrot.lane.b32.xlu0 %v1860_v40, %s4152_s20  ;;  %v1496_v6 = vsel %vm1464_vm11, 0.0, %v5395_v2  ;;  %v1898_v38 = vpop.permute.xlu0 %1897  ;;  %v4058_v40 = vld [vmem:[#allocation4 + $0x38] sm:$0xff] }
 0x250   : > { %vm2023_vm10 = vcmp.ge.f32.partialorder %v5387_v4, 1.0  ;;  %1528 = vst.msk [vmem:[#allocation3 + $0x8] sm:$0xff] %vm565_vm1, %v1496_v6  ;;  %v5410_v31 = vadd.f32 %v4054_v29, %v1898_v38  ;;  %v4060_v29 = vld [vmem:[#allocation3 + $0x28] sm:$0xff]  ;;  %v4066_v2 = vld [vmem:[#allocation4 + $0x58] sm:$0xff]  ;;  %v4099_v38 = vld [vmem:[#allocation3 + $0xf0] sm:$0xff] }
 0x251   : > { %v2055_v54 = vsel %vm2023_vm10, 0.0, %v5387_v4  ;;  %v1348_v55 = vpop.permute.xlu1 %1347  ;;  %v4087_v4 = vld [vmem:[#allocation3 + $0xa0] sm:$0xff] }
 0x252   : > { %2087 = vst.msk [vmem:[#allocation4] sm:$0xff] %vm565_vm1, %v2055_v54  ;;  %v5404_v10 = vadd.f32 %v4053_v61, %v1348_v55  ;;  %vm6249_vm13 = vcmp.ge.f32.partialorder %v5410_v31, 1.0  ;;  %v4059_v54 = vld [vmem:[#allocation4 + $0x20] sm:$0xff] }
 0x253   : > { %v2056_v17 = vsel %vm6249_vm13, 0.0, %v5410_v31  ;;  %v1350_v33 = vpop.permute.xlu0 %1349 }
 0x254   : > { %vm1469_vm12 = vcmp.ge.f32.partialorder %v5404_v10, 1.0  ;;  %2088 = vst.msk [vmem:[#allocation4 + $0x8] sm:$0xff] %vm565_vm1, %v2056_v17  ;;  %v5422_v15 = vadd.f32 %v4056_v58, %v1350_v33  ;;  %v4061_v17 = vld [vmem:[#allocation3 + $0x50] sm:$0xff] }
 0x255   : > { %v1501_v36 = vsel %vm1469_vm12, 0.0, %v5404_v10  ;;  %v1908_v46 = vpop.permute.xlu1 %1907 }
 0x256   : > { %1533 = vst.msk [vmem:[#allocation3 + $0x30] sm:$0xff] %vm565_vm1, %v1501_v36  ;;  %v1997_v51 = vadd.f32 %v4055_v27, %v1908_v46  ;;  %vm1470_vm15 = vcmp.ge.f32.partialorder %v5422_v15, 1.0 }
 0x257   : > { %v1502_v48 = vsel %vm1470_vm15, 0.0, %v5422_v15  ;;  %v1910_v45 = vpop.permute.xlu0 %1909  ;;  %v4072_v15 = vld [vmem:[#allocation3 + $0x78] sm:$0xff] }
 0x258   : > { %vm2029_vm14 = vcmp.ge.f32.partialorder %v1997_v51, 1.0  ;;  %1534 = vst.msk [vmem:[#allocation3 + $0x38] sm:$0xff] %vm565_vm1, %v1502_v48  ;;  %v1998_v30 = vadd.f32 %v4058_v40, %v1910_v45  ;;  %v4063_v45 = vld [vmem:[#allocation4 + $0x50] sm:$0xff] }
 0x259   : > { %v2061_v50 = vsel %vm2029_vm14, 0.0, %v1997_v51  ;;  %v1344_v24 = vpop.permute.xlu1 %1343 }
 0x25a   : > { %2093 = vst.msk [vmem:[#allocation4 + $0x30] sm:$0xff] %vm565_vm1, %v2061_v50  ;;  %v5427_v5 = vadd.f32 %v4057_v41, %v1344_v24  ;;  %vm2030_vm2 = vcmp.ge.f32.partialorder %v1998_v30, 1.0  ;;  %v4062_v50 = vld [vmem:[#allocation4 + $0x28] sm:$0xff] }
 0x25b   : > { %v2062_v61 = vsel %vm2030_vm2, 0.0, %v1998_v30  ;;  %v1346_v6 = vpop.permute.xlu0 %1345  ;;  %vm5441_vm3 = vmpackc.low %vm2030_vm2, %vm2029_vm14 }
 0x25c   : > { %vm1467_vm0 = vcmp.ge.f32.partialorder %v5427_v5, 1.0  ;;  %2094 = vst.msk [vmem:[#allocation4 + $0x38] sm:$0xff] %vm565_vm1, %v2062_v61  ;;  %v1436_v36 = vadd.f32 %v4060_v29, %v1346_v6  ;;  %v3554_v29 = vsel %vm1464_vm11, 1.0, %v6260_v18 }
 0x25d   : > { %v1499_v57 = vsel %vm1467_vm0, 0.0, %v5427_v5  ;;  %v1904_v16 = vpop.permute.xlu1 %1903  ;;  %v4071_v5 = vld [vmem:[#allocation3 + $0x60] sm:$0xff] }
 0x25e   : > { %1531 = vst.msk [vmem:[#allocation3 + $0x20] sm:$0xff] %vm565_vm1, %v1499_v57  ;;  %v5438_v55 = vadd.f32 %v4059_v54, %v1904_v16  ;;  %vm1468_vm8 = vcmp.ge.f32.partialorder %v1436_v36, 1.0  ;;  %v4064_v16 = vld [vmem:[#allocation3 + $0x58] sm:$0xff] }
 0x25f   : > { %v1500_v33 = vsel %vm1468_vm8, 0.0, %v1436_v36 }
 0x260   : > { %vm6248_vm5 = vcmp.ge.f32.partialorder %v5438_v55, 1.0  ;;  %v1906_v58 = vpop.permute.xlu0 %1905  ;;  %1532 = vst.msk [vmem:[#allocation3 + $0x28] sm:$0xff] %vm565_vm1, %v1500_v33 }
 0x261   : > { %v2059_v46 = vsel %vm6248_vm5, 0.0, %v5438_v55  ;;  %v1356_v27 = vpop.permute.xlu1 %1355  ;;  %v5455_v24 = vadd.f32 %v4062_v50, %v1906_v58  ;;  %v3553_v58 = vsel %vm1463_vm7, 1.0, %v6260_v18 }
 0x262   : > { %2091 = vst.msk [vmem:[#allocation4 + $0x20] sm:$0xff] %vm565_vm1, %v2059_v46  ;;  %v5451_v51 = vadd.f32 %v4061_v17, %v1356_v27  ;;  %v4065_v46 = vld [vmem:[#allocation3 + $0x40] sm:$0xff] }
 0x263   : > { %vm6250_vm2 = vcmp.ge.f32.partialorder %v5455_v24, 1.0 }
 0x264   : > { %vm1473_vm14 = vcmp.ge.f32.partialorder %v5451_v51, 1.0  ;;  %v2060_v30 = vsel %vm6250_vm2, 0.0, %v5455_v24  ;;  %v1358_v57 = vpop.permute.xlu0 %1357 }
 0x265   : > { %v1505_v41 = vsel %vm1473_vm14, 0.0, %v5451_v51  ;;  %v1916_v48 = vpop.permute.xlu1 %1915  ;;  %2092 = vst.msk [vmem:[#allocation4 + $0x28] sm:$0xff] %vm565_vm1, %v2060_v30  ;;  %v5467_v54 = vadd.f32 %v4064_v16, %v1358_v57  ;;  %v3556_v30 = vsel %vm1466_vm6, 1.0, %v6260_v18 }
 0x266   : > { %1537 = vst.msk [vmem:[#allocation3 + $0x50] sm:$0xff] %vm565_vm1, %v1505_v41  ;;  %v2001_v40 = vadd.f32 %v4063_v45, %v1916_v48  ;;  %v1623_v41 = vpack.c.bf16 %v3554_v29, %v3553_v58  ;;  %v3555_v29 = vsel %vm1465_vm4, 1.0, %v6260_v18  ;;  %v3558_v58 = vsel %vm1468_vm8, 1.0, %v6260_v18 }
 0x267   : > { %vm1474_vm13 = vcmp.ge.f32.partialorder %v5467_v54, 1.0 }
 0x268   : > { %vm2033_vm5 = vcmp.ge.f32.partialorder %v2001_v40, 1.0  ;;  %v1506_v17 = vsel %vm1474_vm13, 0.0, %v5467_v54  ;;  %v1918_v33 = vpop.permute.xlu0 %1917 }
 0x269   : > { %v2065_v61 = vsel %vm2033_vm5, 0.0, %v2001_v40  ;;  %v1352_v6 = vpop.permute.xlu1 %1351  ;;  %1538 = vst.msk [vmem:[#allocation3 + $0x58] sm:$0xff] %vm565_vm1, %v1506_v17  ;;  %v2002_v50 = vadd.f32 %v4066_v2, %v1918_v33  ;;  %v1624_v17 = vpack.c.bf16 %v3556_v30, %v3555_v29 }
 0x26a   : > { %2097 = vst.msk [vmem:[#allocation4 + $0x50] sm:$0xff] %vm565_vm1, %v2065_v61  ;;  %v5475_v27 = vadd.f32 %v4065_v46, %v1352_v6 }
 0x26b   : > { %vm2034_vm2 = vcmp.ge.f32.partialorder %v2002_v50, 1.0 }
 0x26c   : > { %vm1471_vm11 = vcmp.ge.f32.partialorder %v5475_v27, 1.0  ;;  %v2066_v16 = vsel %vm2034_vm2, 0.0, %v2002_v50  ;;  %v1354_v61 = vpop.permute.xlu0 %1353  ;;  %vm5495_vm7 = vmpackc.low %vm2034_vm2, %vm2033_vm5 }
 0x26d   : > { %v1503_v48 = vsel %vm1471_vm11, 0.0, %v5475_v27  ;;  %v1912_v45 = vpop.permute.xlu1 %1911  ;;  %2203 = vxpose.xlu0.c.b16.start [1/8] (narrow) %v1623_v41, 32  ;;  %2098 = vst.msk [vmem:[#allocation4 + $0x58] sm:$0xff] %vm565_vm1, %v2066_v16  ;;  %v1440_v46 = vadd.f32 %v4068_v25, %v1354_v61  ;;  %v3560_v61 = vsel %vm1470_vm15, 1.0, %v6260_v18 }
 0x26e   : > { %1535 = vst.msk [vmem:[#allocation3 + $0x40] sm:$0xff] %vm565_vm1, %v1503_v48  ;;  %v5492_v57 = vadd.f32 %v4067_v19, %v1912_v45  ;;  %v3557_v48 = vsel %vm1467_vm0, 1.0, %v6260_v18  ;;  %v4070_v45 = vld [vmem:[#allocation4 + $0x48] sm:$0xff] }
 0x26f   : > { %vm1472_vm5 = vcmp.ge.f32.partialorder %v1440_v46, 1.0  ;;  %v1625_v36 = vpack.c.bf16 %v3558_v58, %v3557_v48  ;;  %v4073_v48 = vld [vmem:[#allocation4 + $0x60] sm:$0xff] }
 0x270   : > { %vm6252_vm6 = vcmp.ge.f32.partialorder %v5492_v57, 1.0  ;;  %v1504_v50 = vsel %vm1472_vm5, 0.0, %v1440_v46  ;;  %v1914_v41 = vpop.permute.xlu0 %1913 }
 0x271   : > { %v2063_v33 = vsel %vm6252_vm6, 0.0, %v5492_v57  ;;  %v1364_v40 = vpop.permute.xlu1 %1363  ;;  %2204 = vxpose.xlu0.c.b16.cont [2/8] (narrow) %v1624_v17, 32  ;;  %1536 = vst.msk [vmem:[#allocation3 + $0x48] sm:$0xff] %vm565_vm1, %v1504_v50  ;;  %v5517_v30 = vadd.f32 %v4070_v45, %v1914_v41  ;;  %v3562_v41 = vsel %vm1472_vm5, 1.0, %v6260_v18 }
 0x272   : > { %2095 = vst.msk [vmem:[#allocation4 + $0x40] sm:$0xff] %vm565_vm1, %v2063_v33  ;;  %v5510_v2 = vadd.f32 %v4069_v11, %v1364_v40  ;;  %v3559_v33 = vsel %vm1469_vm12, 1.0, %v6260_v18 }
 0x273   : > { %vm6251_vm8 = vcmp.ge.f32.partialorder %v5517_v30, 1.0  ;;  %v1626_v58 = vpack.c.bf16 %v3560_v61, %v3559_v33  ;;  %v4075_v33 = vld [vmem:[#allocation3 + $0x90] sm:$0xff] }
 0x274   : > { %vm1477_vm4 = vcmp.ge.f32.partialorder %v5510_v2, 1.0  ;;  %v2064_v25 = vsel %vm6251_vm8, 0.0, %v5517_v30  ;;  %v1366_v17 = vpop.permute.xlu0 %1365  ;;  %vm6289_vm8 = vcmp.ge.f32.partialorder %v5410_v31, 1.0 }
 0x275   : > { %v1509_v19 = vsel %vm1477_vm4, 0.0, %v5510_v2  ;;  %v1360_v16 = vpop.permute.xlu1 %1359  ;;  %2205 = vxpose.xlu0.c.b16.cont [3/8] (narrow) %v1625_v36, 32  ;;  %2096 = vst.msk [vmem:[#allocation4 + $0x48] sm:$0xff] %vm565_vm1, %v2064_v25  ;;  %v1446_v40 = vadd.f32 %v4072_v15, %v1366_v17  ;;  %v3564_v17 = vsel %vm1474_vm13, 1.0, %v6260_v18  ;;  %v4082_v2 = vld [vmem:[#allocation3 + $0x88] sm:$0xff]  ;;  %vm3617_vm6 = vmpackc.low %vm6289_vm8, %vm2023_vm10 }
 0x276   : > { %1541 = vst.msk [vmem:[#allocation3 + $0x70] sm:$0xff] %vm565_vm1, %v1509_v19  ;;  %v1443_v29 = vadd.f32 %v4071_v5, %v1360_v16  ;;  %v3561_v19 = vsel %vm1471_vm11, 1.0, %v6260_v18  ;;  %v4074_v16 = vld [vmem:[#allocation3 + $0x68] sm:$0xff] }
 0x277   : > { %vm1478_vm0 = vcmp.ge.f32.partialorder %v1446_v40, 1.0  ;;  %v1627_v46 = vpack.c.bf16 %v3562_v41, %v3561_v19  ;;  %v4077_v19 = vld [vmem:[#allocation4 + $0x90] sm:$0xff] }
 0x278   : > { %vm1475_vm15 = vcmp.ge.f32.partialorder %v1443_v29, 1.0  ;;  %v1510_v10 = vsel %vm1478_vm0, 0.0, %v1446_v40 }
 0x279   : > { %v1507_v11 = vsel %vm1475_vm15, 0.0, %v1443_v29  ;;  %v1920_v50 = vpop.permute.xlu1 %1919  ;;  %2206 = vxpose.xlu0.c.b16.cont [4/8] (narrow) %v1626_v58, 32  ;;  %v1362_v36 = vpop.permute.xlu0 %1361  ;;  %1542 = vst.msk [vmem:[#allocation3 + $0x78] sm:$0xff] %vm565_vm1, %v1510_v10  ;;  %v4079_v29 = vld [vmem:[#allocation3 + $0x80] sm:$0xff] }
 0x27a   : > { %1539 = vst.msk [vmem:[#allocation3 + $0x60] sm:$0xff] %vm565_vm1, %v1507_v11  ;;  %v2003_v45 = vadd.f32 %v4073_v48, %v1920_v50  ;;  %v1444_v61 = vadd.f32 %v4074_v16, %v1362_v36  ;;  %v3563_v11 = vsel %vm1473_vm14, 1.0, %v6260_v18  ;;  %v4076_v50 = vld [vmem:[#allocation4 + $0x68] sm:$0xff] }
 0x27b   : > { %v1628_v54 = vpack.c.bf16 %v3564_v17, %v3563_v11 }
 0x27c   : > { %vm2035_vm12 = vcmp.ge.f32.partialorder %v2003_v45, 1.0  ;;  %vm1476_vm2 = vcmp.ge.f32.partialorder %v1444_v61, 1.0 }
 0x27d   : > { %v2067_v5 = vsel %vm2035_vm12, 0.0, %v2003_v45  ;;  %v1372_v25 = vpop.permute.xlu1 %1371  ;;  %v1508_v27 = vsel %vm1476_vm2, 0.0, %v1444_v61  ;;  %2207 = vxpose.xlu0.c.b16.cont [5/8] (narrow) %v1627_v46, 32  ;;  %v1922_v58 = vpop.permute.xlu0 %1921  ;;  %v3566_v36 = vsel %vm1476_vm2, 1.0, %v6260_v18  ;;  %v3568_v45 = vsel %vm1478_vm0, 1.0, %v6260_v18  ;;  %v6294_v46 = vld [vmem:[#allocation13_spill] sm:$0xff] }
 0x27e   : > { %2099 = vst.msk [vmem:[#allocation4 + $0x60] sm:$0xff] %vm565_vm1, %v2067_v5  ;;  %v5549_v15 = vadd.f32 %v4075_v33, %v1372_v25  ;;  %1540 = vst.msk [vmem:[#allocation3 + $0x68] sm:$0xff] %vm565_vm1, %v1508_v27  ;;  %v2004_v41 = vadd.f32 %v4076_v50, %v1922_v58  ;;  %v3565_v5 = vsel %vm1475_vm15, 1.0, %v6260_v18  ;;  %v4078_v25 = vld [vmem:[#allocation3 + $0x98] sm:$0xff] }
 0x27f   : > { %v1629_v33 = vpack.c.bf16 %v3566_v36, %v3565_v5 }
 0x280   : > { %vm1481_vm11 = vcmp.ge.f32.partialorder %v5549_v15, 1.0  ;;  %vm2036_vm13 = vcmp.ge.f32.partialorder %v2004_v41, 1.0 }
 0x281   : > { %v1513_v48 = vsel %vm1481_vm11, 0.0, %v5549_v15  ;;  %v1932_v10 = vpop.permute.xlu1 %1931  ;;  %v2068_v16 = vsel %vm2036_vm13, 0.0, %v2004_v41  ;;  %2208 = vxpose.xlu0.c.b16.cont [6/8] (narrow) %v1628_v54, 32  ;;  %v1374_v61 = vpop.permute.xlu0 %1373  ;;  %vm5564_vm14 = vmpackc.low %vm2036_vm13, %vm2035_vm12  ;;  %v3567_v54 = vsel %vm1477_vm4, 1.0, %v6260_v18 }
 0x282   : > { %1545 = vst.msk [vmem:[#allocation3 + $0x90] sm:$0xff] %vm565_vm1, %v1513_v48  ;;  %v5561_v51 = vadd.f32 %v4077_v19, %v1932_v10  ;;  %2100 = vst.msk [vmem:[#allocation4 + $0x68] sm:$0xff] %vm565_vm1, %v2068_v16  ;;  %v1450_v17 = vadd.f32 %v4078_v25, %v1374_v61  ;;  %v4080_v48 = vld [vmem:[#allocation4 + $0x98] sm:$0xff]  ;;  %v1630_v40 = vpack.c.bf16 %v3568_v45, %v3567_v54  ;;  %v4081_v16 = vld [vmem:[#allocation4 + $0x80] sm:$0xff] }
 0x283   : > { %v4083_v45 = vld [vmem:[#allocation3 + $0xb0] sm:$0xff] }
 0x284   : > { %vm2041_vm5 = vcmp.ge.f32.partialorder %v5561_v51, 1.0  ;;  %vm1482_vm12 = vcmp.ge.f32.partialorder %v1450_v17, 1.0 }
 0x285   : > { %v2073_v27 = vsel %vm2041_vm5, 0.0, %v5561_v51  ;;  %v1368_v58 = vpop.permute.xlu1 %1367  ;;  %v1514_v50 = vsel %vm1482_vm12, 0.0, %v1450_v17  ;;  %2209 = vxpose.xlu0.c.b16.cont [7/8] (narrow) %v1629_v33, 32  ;;  %v1934_v41 = vpop.permute.xlu0 %1933 }
 0x286   : > { %2105 = vst.msk [vmem:[#allocation4 + $0x90] sm:$0xff] %vm565_vm1, %v2073_v27  ;;  %v1447_v11 = vadd.f32 %v4079_v29, %v1368_v58  ;;  %1546 = vst.msk [vmem:[#allocation3 + $0x98] sm:$0xff] %vm565_vm1, %v1514_v50  ;;  %v2010_v10 = vadd.f32 %v4080_v48, %v1934_v41 }
 0x288   : > { %vm1479_vm15 = vcmp.ge.f32.partialorder %v1447_v11, 1.0  ;;  %vm2042_vm0 = vcmp.ge.f32.partialorder %v2010_v10, 1.0 }
 0x289   : > { %v1511_v36 = vsel %vm1479_vm15, 0.0, %v1447_v11  ;;  %v1928_v19 = vpop.permute.xlu1 %1927  ;;  %v2074_v5 = vsel %vm2042_vm0, 0.0, %v2010_v10  ;;  %2210 = vxpose.xlu0.c.b16.end [8/8] (narrow) %v1630_v40, 32  ;;  %v1370_v25 = vpop.permute.xlu0 %1369  ;;  %v3569_v50 = vsel %vm1479_vm15, 1.0, %v6260_v18 }
 0x28a   : > { %1543 = vst.msk [vmem:[#allocation3 + $0x80] sm:$0xff] %vm565_vm1, %v1511_v36  ;;  %v2007_v61 = vadd.f32 %v4081_v16, %v1928_v19  ;;  %2106 = vst.msk [vmem:[#allocation4 + $0x98] sm:$0xff] %vm565_vm1, %v2074_v5  ;;  %v1448_v33 = vadd.f32 %v4082_v2, %v1370_v25  ;;  %v4084_v36 = vld [vmem:[#allocation4 + $0x88] sm:$0xff]  ;;  %v3572_v16 = vsel %vm1482_vm12, 1.0, %v6260_v18  ;;  %v4085_v25 = vld [vmem:[#allocation4 + $0xb0] sm:$0xff] }
 0x28c   : > { %vm2039_vm4 = vcmp.ge.f32.partialorder %v2007_v61, 1.0  ;;  %vm1480_vm2 = vcmp.ge.f32.partialorder %v1448_v33, 1.0 }
 0x28d   : > { %v1380_v27 = vpop.permute.xlu1 %1379  ;;  %v2071_v58 = vsel %vm2039_vm4, 0.0, %v2007_v61  ;;  %v1512_v41 = vsel %vm1480_vm2, 0.0, %v1448_v33  ;;  %v3570_v54 = vsel %vm1480_vm2, 1.0, %v6260_v18  ;;  %v1930_v48 = vpop.permute.xlu0 %1929  ;;  %v3571_v33 = vsel %vm1481_vm11, 1.0, %v6260_v18  ;;  %vm3635_vm11 = vmpackc.low %vm2042_vm0, %vm2041_vm5 }
 0x28e   : > { %v5588_v29 = vadd.f32 %v4083_v45, %v1380_v27  ;;  %2103 = vst.msk [vmem:[#allocation4 + $0x80] sm:$0xff] %vm565_vm1, %v2071_v58  ;;  %1544 = vst.msk [vmem:[#allocation3 + $0x88] sm:$0xff] %vm565_vm1, %v1512_v41  ;;  %v1631_v40 = vpack.c.bf16 %v3570_v54, %v3569_v50  ;;  %v2008_v19 = vadd.f32 %v4084_v36, %v1930_v48  ;;  %v4086_v45 = vld [vmem:[#allocation3 + $0xb8] sm:$0xff]  ;;  %v4155_v41 = vmov 1.0|1.0  }
 0x28f   : > { %v1632_v17 = vpack.c.bf16 %v3572_v16, %v3571_v33 }
 0x290   : > { %vm1485_vm13 = vcmp.ge.f32.partialorder %v5588_v29, 1.0  ;;  %2219 = vxpose.xlu1.c.b16.start [1/8] (narrow) %v1631_v40, 32  ;;  %vm2040_vm15 = vcmp.ge.f32.partialorder %v2008_v19, 1.0  ;;  %v4088_v40 = vld [vmem:[#allocation4 + $0xb8] sm:$0xff] }
 0x291   : > { %v1517_v5 = vsel %vm1485_vm13, 0.0, %v5588_v29  ;;  %v1940_v11 = vpop.permute.xlu1 %1939  ;;  %v1382_v27 = vpop.permute.xlu0 %1381  ;;  %v2072_v58 = vsel %vm2040_vm15, 0.0, %v2008_v19  ;;  %vm3633_vm12 = vmpackc.low %vm2040_vm15, %vm2039_vm4  ;;  %v4089_v19 = vld [vmem:[#allocation4 + $0xa0] sm:$0xff] }
 0x292   : > { %1549 = vst.msk [vmem:[#allocation3 + $0xb0] sm:$0xff] %vm565_vm1, %v1517_v5  ;;  %v5602_v2 = vadd.f32 %v4085_v25, %v1940_v11  ;;  %v1454_v50 = vadd.f32 %v4086_v45, %v1382_v27  ;;  %2104 = vst.msk [vmem:[#allocation4 + $0x88] sm:$0xff] %vm565_vm1, %v2072_v58  ;;  %3768 = vmatprep.subr.msk.bf16.mxu1 %vm3633_vm12, %v4155_v41  ;;  %v4090_v25 = vld [vmem:[#allocation3 + $0xa8] sm:$0xff] }
 0x293   : > { %3769 = vmatpush3.bf16.msk.msra.mxu1 %vm3617_vm6, %v4155_v41 }
 0x294   : > { %vm2045_vm2 = vcmp.ge.f32.partialorder %v5602_v2, 1.0  ;;  %vm1486_vm4 = vcmp.ge.f32.partialorder %v1454_v50, 1.0  ;;  %2220 = vxpose.xlu1.c.b16.cont [2/8] (narrow) %v1632_v17, 32  ;;  %3770 = vmatprep.subr.msk.bf16.mxu1 %vm3635_vm11, %v4155_v41  ;;  %vm6290_vm11 = vcmp.ge.f32.partialorder %v5438_v55, 1.0  ;;  %v4095_v55 = vld [vmem:[#allocation3 + $0xc0] sm:$0xff] }
 0x295   : > { %v2077_v15 = vsel %vm2045_vm2, 0.0, %v5602_v2  ;;  %v1376_v61 = vpop.permute.xlu1 %1375  ;;  %v1518_v54 = vsel %vm1486_vm4, 0.0, %v1454_v50  ;;  %v1942_v48 = vpop.permute.xlu0 %1941 }
 0x296   : > { %2109 = vst.msk [vmem:[#allocation4 + $0xb0] sm:$0xff] %vm565_vm1, %v2077_v15  ;;  %v1451_v31 = vadd.f32 %v4087_v4, %v1376_v61  ;;  %1550 = vst.msk [vmem:[#allocation3 + $0xb8] sm:$0xff] %vm565_vm1, %v1518_v54  ;;  %v2014_v36 = vadd.f32 %v4088_v40, %v1942_v48  ;;  %v4092_v48 = vld [vmem:[#allocation4 + $0xa8] sm:$0xff] }
 0x297   : > { %3771 = vmatpush3.bf16.msk.msra.mxu1 %vm5390_vm9, %v4155_v41 }
 0x298   : > { %vm1483_vm10 = vcmp.ge.f32.partialorder %v1451_v31, 1.0  ;;  %vm2046_vm6 = vcmp.ge.f32.partialorder %v2014_v36, 1.0 }
 0x299   : > { %v1515_v51 = vsel %vm1483_vm10, 0.0, %v1451_v31  ;;  %v1936_v10 = vpop.permute.xlu1 %1935  ;;  %v2078_v5 = vsel %vm2046_vm6, 0.0, %v2014_v36  ;;  %v1378_v11 = vpop.permute.xlu0 %1377  ;;  %v3573_v45 = vsel %vm1483_vm10, 1.0, %v6260_v18 }
 0x29a   : > { %1547 = vst.msk [vmem:[#allocation3 + $0xa0] sm:$0xff] %vm565_vm1, %v1515_v51  ;;  %v2011_v16 = vadd.f32 %v4089_v19, %v1936_v10  ;;  %2110 = vst.msk [vmem:[#allocation4 + $0xb8] sm:$0xff] %vm565_vm1, %v2078_v5  ;;  %v1452_v33 = vadd.f32 %v4090_v25, %v1378_v11  ;;  %v3576_v51 = vsel %vm1486_vm4, 1.0, %v6260_v18  ;;  %v4093_v19 = vld [vmem:[#allocation4 + $0xd0] sm:$0xff]  ;;  %v3575_v11 = vsel %vm1485_vm13, 1.0, %v6260_v18 }
 0x29b   : > { %v1634_v50 = vpack.c.bf16 %v3576_v51, %v3575_v11  ;;  %vm6291_vm4 = vcmp.ge.f32.partialorder %v5455_v24, 1.0  ;;  %vm3639_vm13 = vmpackc.low %vm2046_vm6, %vm2045_vm2  ;;  %v4098_v51 = vld [vmem:[#allocation3 + $0xc8] sm:$0xff] }
 0x29c   : > { %vm2043_vm8 = vcmp.ge.f32.partialorder %v2011_v16, 1.0  ;;  %vm1484_vm5 = vcmp.ge.f32.partialorder %v1452_v33, 1.0  ;;  %vm3621_vm10 = vmpackc.low %vm6291_vm4, %vm6290_vm11 }
 0x29d   : > { %v2075_v27 = vsel %vm2043_vm8, 0.0, %v2011_v16  ;;  %v1388_v58 = vpop.permute.xlu1 %1387  ;;  %v1516_v15 = vsel %vm1484_vm5, 0.0, %v1452_v33  ;;  %v3574_v61 = vsel %vm1484_vm5, 1.0, %v6260_v18  ;;  %v1938_v4 = vpop.permute.xlu0 %1937 }
 0x29e   : > { %2107 = vst.msk [vmem:[#allocation4 + $0xa0] sm:$0xff] %vm565_vm1, %v2075_v27  ;;  %v5635_v17 = vadd.f32 %v4091_v20, %v1388_v58  ;;  %1548 = vst.msk [vmem:[#allocation3 + $0xa8] sm:$0xff] %vm565_vm1, %v1516_v15  ;;  %v1633_v54 = vpack.c.bf16 %v3574_v61, %v3573_v45  ;;  %v2012_v40 = vadd.f32 %v4092_v48, %v1938_v4  ;;  %v4094_v27 = vld [vmem:[#allocation3 + $0xd8] sm:$0xff]  ;;  %v4097_v4 = vld [vmem:[#allocation4 + $0xc0] sm:$0xff] }
 0x29f   : > { %v4096_v15 = vld [vmem:[#allocation4 + $0xd8] sm:$0xff] }
 0x2a0   : > { %vm1489_vm9 = vcmp.ge.f32.partialorder %v5635_v17, 1.0  ;;  %vm2044_vm0 = vcmp.ge.f32.partialorder %v2012_v40, 1.0  ;;  %2221 = vxpose.xlu1.c.b16.cont [3/8] (narrow) %v1633_v54, 32 }
 0x2a1   : > { %v1521_v10 = vsel %vm1489_vm9, 0.0, %v5635_v17  ;;  %v1948_v31 = vpop.permute.xlu1 %1947  ;;  %v2076_v25 = vsel %vm2044_vm0, 0.0, %v2012_v40  ;;  %v1390_v33 = vpop.permute.xlu0 %1389  ;;  %vm3637_vm15 = vmpackc.low %vm2044_vm0, %vm2043_vm8 }
 0x2a2   : > { %1553 = vst.msk [vmem:[#allocation3 + $0xd0] sm:$0xff] %vm565_vm1, %v1521_v10  ;;  %v5648_v5 = vadd.f32 %v4093_v19, %v1948_v31  ;;  %2108 = vst.msk [vmem:[#allocation4 + $0xa8] sm:$0xff] %vm565_vm1, %v2076_v25  ;;  %v1458_v58 = vadd.f32 %v4094_v27, %v1390_v33  ;;  %3772 = vmatprep.subr.msk.bf16.mxu1 %vm3637_vm15, %v4155_v41 }
 0x2a3   : > { %3773 = vmatpush3.bf16.msk.msra.mxu1 %vm3621_vm10, %v4155_v41  ;;  %vm6292_vm10 = vcmp.ge.f32.partialorder %v5492_v57, 1.0  ;;  %v4103_v57 = vld [vmem:[#allocation3 + $0xe0] sm:$0xff] }
 0x2a4   : > { %vm2049_vm12 = vcmp.ge.f32.partialorder %v5648_v5, 1.0  ;;  %vm1490_vm8 = vcmp.ge.f32.partialorder %v1458_v58, 1.0  ;;  %2222 = vxpose.xlu1.c.b16.cont [4/8] (narrow) %v1634_v50, 32  ;;  %3774 = vmatprep.subr.msk.bf16.mxu1 %vm3639_vm13, %v4155_v41  ;;  %vm6293_vm13 = vcmp.ge.f32.partialorder %v5517_v30, 1.0 }
 0x2a5   : > { %v2081_v29 = vsel %vm2049_vm12, 0.0, %v5648_v5  ;;  %v1384_v16 = vpop.permute.xlu1 %1383  ;;  %v1522_v20 = vsel %vm1490_vm8, 0.0, %v1458_v58  ;;  %v1950_v45 = vpop.permute.xlu0 %1949 }
 0x2a6   : > { %2113 = vst.msk [vmem:[#allocation4 + $0xd0] sm:$0xff] %vm565_vm1, %v2081_v29  ;;  %v1455_v24 = vadd.f32 %v4095_v55, %v1384_v16  ;;  %1554 = vst.msk [vmem:[#allocation3 + $0xd8] sm:$0xff] %vm565_vm1, %v1522_v20  ;;  %v2018_v61 = vadd.f32 %v4096_v15, %v1950_v45  ;;  %v4100_v16 = vld [vmem:[#allocation4 + $0xc8] sm:$0xff]  ;;  %v3580_v20 = vsel %vm1490_vm8, 1.0, %v6260_v18  ;;  %v4101_v15 = vld [vmem:[#allocation4 + $0xf0] sm:$0xff] }
 0x2a7   : > { %3775 = vmatpush3.bf16.msk.msra.mxu1 %vm5441_vm3, %v4155_v41  ;;  %vm3625_vm8 = vmpackc.low %vm6293_vm13, %vm6292_vm10 }
 0x2a8   : > { %vm1487_vm5 = vcmp.ge.f32.partialorder %v1455_v24, 1.0  ;;  %vm2050_vm2 = vcmp.ge.f32.partialorder %v2018_v61, 1.0 }
 0x2a9   : > { %v1519_v2 = vsel %vm1487_vm5, 0.0, %v1455_v24  ;;  %v1944_v36 = vpop.permute.xlu1 %1943  ;;  %v2082_v48 = vsel %vm2050_vm2, 0.0, %v2018_v61  ;;  %v1386_v40 = vpop.permute.xlu0 %1385  ;;  %v3577_v25 = vsel %vm1487_vm5, 1.0, %v6260_v18 }
 0x2aa   : > { %1551 = vst.msk [vmem:[#allocation3 + $0xc0] sm:$0xff] %vm565_vm1, %v1519_v2  ;;  %v2015_v54 = vadd.f32 %v4097_v4, %v1944_v36  ;;  %2114 = vst.msk [vmem:[#allocation4 + $0xd8] sm:$0xff] %vm565_vm1, %v2082_v48  ;;  %v1456_v10 = vadd.f32 %v4098_v51, %v1386_v40  ;;  %v3579_v36 = vsel %vm1489_vm9, 1.0, %v6260_v18  ;;  %v4102_v40 = vld [vmem:[#allocation3 + $0xf8] sm:$0xff] }
 0x2ab   : > { %v1636_v58 = vpack.c.bf16 %v3580_v20, %v3579_v36  ;;  %vm3643_vm9 = vmpackc.low %vm2050_vm2, %vm2049_vm12  ;;  %v4106_v20 = vld [vmem:[#allocation4 + $0xf8] sm:$0xff]  ;;  %v4107_v36 = vld [vmem:[#allocation4 + $0x70] sm:$0xff] }
 0x2ac   : > { %vm2047_vm6 = vcmp.ge.f32.partialorder %v2015_v54, 1.0  ;;  %vm1488_vm0 = vcmp.ge.f32.partialorder %v1456_v10, 1.0 }
 0x2ad   : > { %v2079_v31 = vsel %vm2047_vm6, 0.0, %v2015_v54  ;;  %v1396_v19 = vpop.permute.xlu1 %1395  ;;  %v1520_v33 = vsel %vm1488_vm0, 0.0, %v1456_v10  ;;  %v3578_v50 = vsel %vm1488_vm0, 1.0, %v6260_v18  ;;  %v1946_v27 = vpop.permute.xlu0 %1945 }
 0x2ae   : > { %2111 = vst.msk [vmem:[#allocation4 + $0xc0] sm:$0xff] %vm565_vm1, %v2079_v31  ;;  %v5681_v11 = vadd.f32 %v4099_v38, %v1396_v19  ;;  %1552 = vst.msk [vmem:[#allocation3 + $0xc8] sm:$0xff] %vm565_vm1, %v1520_v33  ;;  %v1635_v29 = vpack.c.bf16 %v3578_v50, %v3577_v25  ;;  %v2016_v55 = vadd.f32 %v4100_v16, %v1946_v27  ;;  %v4104_v19 = vld [vmem:[#allocation3 + $0xe8] sm:$0xff]  ;;  %v4105_v33 = vld [vmem:[#allocation4 + $0xe0] sm:$0xff] }
 0x2b0   : > { %vm1493_vm3 = vcmp.ge.f32.partialorder %v5681_v11, 1.0  ;;  %vm2048_vm15 = vcmp.ge.f32.partialorder %v2016_v55, 1.0  ;;  %2223 = vxpose.xlu1.c.b16.cont [5/8] (narrow) %v1635_v29, 32 }
 0x2b1   : > { %v1525_v45 = vsel %vm1493_vm3, 0.0, %v5681_v11  ;;  %v1956_v24 = vpop.permute.xlu1 %1955  ;;  %v2080_v4 = vsel %vm2048_vm15, 0.0, %v2016_v55  ;;  %v1398_v48 = vpop.permute.xlu0 %1397  ;;  %vm3641_vm11 = vmpackc.low %vm2048_vm15, %vm2047_vm6  ;;  %v4109_v11 = vld [vmem:[#allocation4 + $0xe8] sm:$0xff] }
 0x2b2   : > { %1557 = vst.msk [vmem:[#allocation3 + $0xf0] sm:$0xff] %vm565_vm1, %v1525_v45  ;;  %v5694_v2 = vadd.f32 %v4101_v15, %v1956_v24  ;;  %2112 = vst.msk [vmem:[#allocation4 + $0xc8] sm:$0xff] %vm565_vm1, %v2080_v4  ;;  %v1462_v51 = vadd.f32 %v4102_v40, %v1398_v48  ;;  %3776 = vmatprep.subr.msk.bf16.mxu1 %vm3641_vm11, %v4155_v41  ;;  %v3583_v48 = vsel %vm1493_vm3, 1.0, %v6260_v18 }
 0x2b3   : > { %3777 = vmatpush3.bf16.msk.msra.mxu1 %vm3625_vm8, %v4155_v41 }
 0x2b4   : > { %vm2053_vm4 = vcmp.ge.f32.partialorder %v5694_v2, 1.0  ;;  %vm1494_vm5 = vcmp.ge.f32.partialorder %v1462_v51, 1.0  ;;  %2224 = vxpose.xlu1.c.b16.cont [6/8] (narrow) %v1636_v58, 32  ;;  %3778 = vmatprep.subr.msk.bf16.mxu1 %vm3643_vm9, %v4155_v41 }
 0x2b5   : > { %v2085_v17 = vsel %vm2053_vm4, 0.0, %v5694_v2  ;;  %v1392_v54 = vpop.permute.xlu1 %1391  ;;  %v1526_v10 = vsel %vm1494_vm5, 0.0, %v1462_v51  ;;  %v1394_v31 = vpop.permute.xlu0 %1393  ;;  %v3584_v6 = vsel %vm1494_vm5, 1.0, %v6260_v18  ;;  %v4108_v51 = vld [vmem:[#allocation4 + $0x78] sm:$0xff]  ;;  %v6295_v2 = vpack.c.bf16 %v4802_v49, %v6294_v46  ;;  %v2199_v49 = vld [vmem:[%s6228_s5] sm:$0xff] }
 0x2b6   : > { %2117 = vst.msk [vmem:[#allocation4 + $0xf0] sm:$0xff] %vm565_vm1, %v2085_v17  ;;  %v1459_v30 = vadd.f32 %v4103_v57, %v1392_v54  ;;  %1558 = vst.msk [vmem:[#allocation3 + $0xf8] sm:$0xff] %vm565_vm1, %v1526_v10  ;;  %v1460_v38 = vadd.f32 %v4104_v19, %v1394_v31  ;;  %v1638_v17 = vpack.c.bf16 %v3584_v6, %v3583_v48  ;;  %v6303_v46 = vld [vmem:[#allocation14_spill] sm:$0xff] }
 0x2b7   : > { %3779 = vmatpush3.bf16.msk.msra.mxu1 %vm5495_vm7, %v4155_v41 }
 0x2b8   : > { %vm1491_vm6 = vcmp.ge.f32.partialorder %v1459_v30, 1.0  ;;  %vm1492_vm12 = vcmp.ge.f32.partialorder %v1460_v38, 1.0 }
 0x2b9   : > { %v1523_v5 = vsel %vm1491_vm6, 0.0, %v1459_v30  ;;  %v3581_v61 = vsel %vm1491_vm6, 1.0, %v6260_v18  ;;  %v1952_v25 = vpop.permute.xlu1 %1951  ;;  %v1524_v27 = vsel %vm1492_vm12, 0.0, %v1460_v38  ;;  %v3582_v29 = vsel %vm1492_vm12, 1.0, %v6260_v18  ;;  %v1958_v16 = vpop.permute.xlu0 %1957 }
 0x2ba   : > { %1555 = vst.msk [vmem:[#allocation3 + $0xe0] sm:$0xff] %vm565_vm1, %v1523_v5  ;;  %v2019_v50 = vadd.f32 %v4105_v33, %v1952_v25  ;;  %1556 = vst.msk [vmem:[#allocation3 + $0xe8] sm:$0xff] %vm565_vm1, %v1524_v27  ;;  %v1637_v55 = vpack.c.bf16 %v3582_v29, %v3581_v61  ;;  %v2022_v45 = vadd.f32 %v4106_v20, %v1958_v16  ;;  %v4044_v33 = vld [vmem:[%s6226_s3] sm:$0xff]  }
 0x2bb   : > { %3904 = vmatprep.subr.bf16.mxu0 %v4044_v33 }
 0x2bc   : > { %vm2051_vm2 = vcmp.ge.f32.partialorder %v2019_v50, 1.0  ;;  %vm2054_vm7 = vcmp.ge.f32.partialorder %v2022_v45, 1.0  ;;  %2225 = vxpose.xlu1.c.b16.cont [7/8] (narrow) %v1637_v55, 32  ;;  %3905 = vmatpush3.bf16.msra.mxu0 %v4044_v33  ;;  %v2200_v55 = vld [vmem:[%s6228_s5 + $0x8] sm:$0xff] }
 0x2bd   : > { %v2083_v24 = vsel %vm2051_vm2, 0.0, %v2019_v50  ;;  %v1924_v15 = vpop.permute.xlu1 %1923  ;;  %v2086_v58 = vsel %vm2054_vm7, 0.0, %v2022_v45  ;;  %v1926_v40 = vpop.permute.xlu0 %1925  ;;  %vm3647_vm10 = vmpackc.low %vm2054_vm7, %vm2053_vm4 }
 0x2be   : > { %2115 = vst.msk [vmem:[#allocation4 + $0xe0] sm:$0xff] %vm565_vm1, %v2083_v24  ;;  %v2005_v4 = vadd.f32 %v4107_v36, %v1924_v15  ;;  %2118 = vst.msk [vmem:[#allocation4 + $0xf8] sm:$0xff] %vm565_vm1, %v2086_v58  ;;  %v2006_v54 = vadd.f32 %v4108_v51, %v1926_v40  ;;  %v2201_v40 = vld [vmem:[%s6228_s5 + $0x10] sm:$0xff] }
 0x2c0   : > { %vm2037_vm0 = vcmp.ge.f32.partialorder %v2005_v4, 1.0  ;;  %vm2038_vm15 = vcmp.ge.f32.partialorder %v2006_v54, 1.0  ;;  %2226 = vxpose.xlu1.c.b16.end [8/8] (narrow) %v1638_v17, 32  ;;  %v2202_v17 = vld [vmem:[%s6228_s5 + $0x18] sm:$0xff] }
 0x2c1   : > { %v2069_v57 = vsel %vm2037_vm0, 0.0, %v2005_v4  ;;  %v2070_v30 = vsel %vm2038_vm15, 0.0, %v2006_v54  ;;  %v1954_v10 = vpop.permute.xlu0 %1953  ;;  %vm3631_vm13 = vmpackc.low %vm2038_vm15, %vm2037_vm0 }
 0x2c2   : > { %2101 = vst.msk [vmem:[#allocation4 + $0x70] sm:$0xff] %vm565_vm1, %v2069_v57  ;;  %2102 = vst.msk [vmem:[#allocation4 + $0x78] sm:$0xff] %vm565_vm1, %v2070_v30  ;;  %v2020_v31 = vadd.f32 %v4109_v11, %v1954_v10  ;;  %v6296_v11 = vld [vmem:[#allocation12_spill] sm:$0xff] }
 0x2c4   : > { %vm2052_vm3 = vcmp.ge.f32.partialorder %v2020_v31, 1.0 }
 0x2c5   : > { %v2084_v19 = vsel %vm2052_vm3, 0.0, %v2020_v31  ;;  %vm3645_vm11 = vmpackc.low %vm2052_vm3, %vm2051_vm2  ;;  %v6297_v31 = vld [vmem:[#allocation11_spill] sm:$0xff] }
 0x2c6   : > { %2116 = vst.msk [vmem:[#allocation4 + $0xe8] sm:$0xff] %vm565_vm1, %v2084_v19  ;;  %3780 = vmatprep.subr.msk.bf16.mxu1 %vm3645_vm11, %v4155_v41  ;;  %v6298_v19 = vpack.c.bf16 %v6296_v11, %v6297_v31  ;;  %v2509_v11 = vld [vmem:[#allocation5 + $0x50] sm:$0xff]  ;;  %v2507_v31 = vld [vmem:[#allocation5 + $0x40] sm:$0xff] }
 0x2c7   : > { %3781 = vmatpush3.bf16.msk.msra.mxu1 %vm5564_vm14, %v4155_v41 }
 0x2c8   : > { %3782 = vmatprep.subr.msk.bf16.mxu1 %vm3647_vm10, %v4155_v41 }
 0x2cb   : > { %3783 = vmatpush3.bf16.msk.msra.mxu1 %vm3631_vm13, %v4155_v41  ;;  %v4045_v41 = vld [vmem:[%s6226_s3 + $0x8] sm:$0xff]  }
 0x2cc   : > { %3906 = vmatprep.subr.bf16.mxu0 %v4045_v41 }
 0x2cd   : > { %3907 = vmatpush3.bf16.msra.mxu0 %v4045_v41 }
 0x2d3   : > { %v2211_v38 = vpop.trf.xlu0 }
 0x2d7   : > { %v2212_v25 = vpop.trf.xlu0 }
 0x30a   : > { %v2227_v5 = vpop.trf.xlu1 }
 0x30b   : > { %2267 = vmatprep.mubr.bf16.mxu1 %v2227_v5  ;;  %v6300_v5 = vld [vmem:[#allocation16_spill] sm:$0xff] }
 0x30c   : > { %2268 = vmatmul.mubr.bf16.vlgmr.msra.gmra.mrb[0].mxu1 %v2211_v38  ;;  %v6299_v38 = vld [vmem:[#allocation17_spill] sm:$0xff] }
 0x30e   : > { %v2228_v61 = vpop.trf.xlu1 }
 0x30f   : > { %2275 = vmatprep.mubr.bf16.mxu1 %v2228_v61  ;;  %v6301_v61 = vpack.c.bf16 %v6299_v38, %v6300_v5 }
 0x314   : > { %2276 = vmatmul.mubr.bf16.gmra.mrb[4].mxu1 %v2212_v25  ;;  %v6302_v25 = vld [vmem:[#allocation15_spill] sm:$0xff] }
 0x315   : > { %3872 = vmatprep.mubr.msk.bf16.mxu1 %vm565_vm1, %v6295_v2  ;;  %v6304_v2 = vpack.c.bf16 %v6302_v25, %v6303_v46 }
 0x3df   : > { %v3784_v50 = vpop.f32.mrb[0].mxu1 }
 0x3e0   : > { %v3785_v27 = vpop.f32.mrb[1].mxu1 }
 0x3e1   : > { %v3786_v29 = vadd.f32 %v3785_v27, %v3784_v50  ;;  %v3787_v16 = vpop.f32.mrb[2].mxu1  ;;  %v6305_v50 = vld [vmem:[#allocation21_spill] sm:$0xff]  ;;  %v6306_v27 = vld [vmem:[#allocation20_spill] sm:$0xff] }
 0x3e2   : > { %v3788_v20 = vpop.f32.mrb[3].mxu1 }
 0x3e3   : > { %v3789_v45 = vadd.f32 %v3788_v20, %v3787_v16  ;;  %v2284_v6 = vmul.f32 %v3786_v29, %v2199_v49  ;;  %v6307_v29 = vpack.c.bf16 %v6305_v50, %v6306_v27  ;;  %v6308_v16 = vld [vmem:[#allocation19_spill] sm:$0xff]  ;;  %v6309_v49 = vld [vmem:[#allocation18_spill] sm:$0xff] }
 0x3e5   : > { %v2285_v24 = vmul.f32 %v3789_v45, %v2200_v55  ;;  %v6310_v55 = vpack.c.bf16 %v6308_v16, %v6309_v49  ;;  %v2510_v49 = vld [vmem:[#allocation5 + $0x58] sm:$0xff] }
 0x3e7   : > { %v3790_v15 = vpop.f32.mrb[4].mxu1  ;;  %v2288_v36 = vpack.c.bf16 %v2285_v24, %v2284_v6 }
 0x3e8   : > { %v3791_v4 = vpop.f32.mrb[5].mxu1 }
 0x3e9   : > { %v3792_v48 = vadd.f32 %v3791_v4, %v3790_v15  ;;  %v3793_v58 = vpop.f32.mrb[6].mxu1  ;;  %3868 = vmatprep.subr.bf16.mxu1 %v2288_v36 }
 0x3ea   : > { %v3794_v51 = vpop.f32.mrb[7].mxu1  ;;  %3869 = vmatpush3.bf16.msra.mxu1 %v2288_v36 }
 0x3eb   : > { %v3795_v54 = vadd.f32 %v3794_v51, %v3793_v58  ;;  %v2286_v57 = vmul.f32 %v3792_v48, %v2201_v40 }
 0x3ed   : > { %v2287_v30 = vmul.f32 %v3795_v54, %v2202_v17 }
 0x3ef   : > { %v2289_v10 = vpack.c.bf16 %v2287_v30, %v2286_v57 }
 0x3f1   : > { %3870 = vmatprep.subr.bf16.mxu1 %v2289_v10 }
 0x3f2   : > { %3871 = vmatpush3.bf16.msra.mxu1 %v2289_v10 }
 0x3f3   : > { %3940 = vmatprep.subr.bf16.mxu1 %v4044_v33 }
 0x3f5   : > { %3873 = vmatmul.mubr.msk.bf16.vlgmr.msra.gmra.mrb[8].mxu1 %vm565_vm1, %v6298_v19 }
 0x3f6   : > { %3876 = vmatprep.mubr.msk.bf16.mxu1 %vm565_vm1, %v6301_v61  ;;  %3942 = vmatpush3.bf16.msra.mxu1 %v4044_v33  ;;  %v2504_v33 = vld [vmem:[#allocation5 + $0x28] sm:$0xff] }
 0x3f7   : > { %3941 = vmatprep.subr.bf16.mxu1 %v4045_v41 }
 0x3fa   : > { %3943 = vmatpush3.bf16.msra.mxu1 %v4045_v41 }
 0x3fd   : > { %3877 = vmatmul.mubr.msk.bf16.gmra.mrb[12].mxu1 %vm565_vm1, %v6304_v2 }
 0x3fe   : > { %3880 = vmatprep.mubr.msk.bf16.mxu1 %vm565_vm1, %v6307_v29 }
 0x405   : > { %3881 = vmatmul.mubr.msk.bf16.gmra.mrb[16].mxu1 %vm565_vm1, %v6310_v55  ;;  %v2508_v55 = vld [vmem:[#allocation5 + $0x48] sm:$0xff] }
 0x406   : > { %3884 = vmatprep.mubr.msk.bf16.mxu1 %vm565_vm1, %v1069_v60  ;;  %v2502_v60 = vld [vmem:[#allocation5 + $0x18] sm:$0xff] }
 0x40d   : > { %3885 = vmatmul.mubr.msk.bf16.gmra.mrb[20].mxu1 %vm565_vm1, %v1070_v35  ;;  %v2500_v35 = vld [vmem:[#allocation5 + $0x8] sm:$0xff] }
 0x40e   : > { %3888 = vmatprep.mubr.msk.bf16.mxu1 %vm565_vm1, %v1071_v53 }
 0x415   : > { %3889 = vmatmul.mubr.msk.bf16.gmra.mrb[24].mxu1 %vm565_vm1, %v1072_v8 }
 0x416   : > { %3892 = vmatprep.mubr.msk.bf16.mxu1 %vm565_vm1, %v1073_v56 }
 0x41d   : > { %3893 = vmatmul.mubr.msk.bf16.gmra.mrb[28].mxu1 %vm565_vm1, %v1074_v3 }
 0x41e   : > { %3896 = vmatprep.mubr.msk.bf16.mxu1 %vm565_vm1, %v1075_v0 }
 0x425   : > { %3897 = vmatmul.mubr.msk.bf16.gmra.mrb[32].mxu1 %vm565_vm1, %v1076_v9 }
 0x426   : > { %3900 = vmatprep.mubr.msk.bf16.mxu1 %vm565_vm1, %v1077_v47 }
 0x42d   : > { %3901 = vmatmul.mubr.msk.bf16.gmra.mrb[36].mxu1 %vm565_vm1, %v1078_v14  ;;  %v2506_v14 = vld [vmem:[#allocation5 + $0x38] sm:$0xff] }
 0x4c8   : > { %v3874_v1 = vpop.f32.mrb[8].mxu1 }
 0x4c9   : > { %v2533_v42 = vsub.f32 %v3874_v1, %v2501_v13  ;;  %v2372_v37 = vpop.f32.mrb[9].mxu1 }
 0x4ca   : > { %v2531_v43 = vsub.f32 %v2372_v37, %v2499_v7  ;;  %v3875_v22 = vpop.f32.mrb[10].mxu1 }
 0x4cb   : > { %v2565_v53 = vmul.f32 0.5, %v2533_v42  ;;  %v2534_v34 = vsub.f32 %v3875_v22, %v2502_v60  ;;  %v2375_v32 = vpop.f32.mrb[11].mxu1 }
 0x4cc   : > { %v2563_v28 = vmul.f32 0.5, %v2531_v43  ;;  %v2532_v8 = vsub.f32 %v2375_v32, %v2500_v35 }
 0x4cd   : > { %v2597_v56 = vadd.f32 %v2565_v53, %v2501_v13  ;;  %v2566_v12 = vmul.f32 0.5, %v2534_v34 }
 0x4ce   : > { %v2595_v44 = vadd.f32 %v2563_v28, %v2499_v7  ;;  %v2564_v3 = vmul.f32 0.5, %v2532_v8 }
 0x4cf   : > { %vm2629_vm14 = vcmp.ge.f32.partialorder %v2597_v56, 0.5  ;;  %v2598_v23 = vadd.f32 %v2566_v12, %v2502_v60  ;;  %v2513_v12 = vld [vmem:[#allocation5 + $0x70] sm:$0xff] }
 0x4d0   : > { %v2661_v0 = vsel %vm2629_vm14, 0.0, %v2597_v56  ;;  %v3667_v63 = vsel %vm2629_vm14, 1.0, %v6260_v18  ;;  %vm2627_vm4 = vcmp.ge.f32.partialorder %v2595_v44, 0.5  ;;  %v2596_v21 = vadd.f32 %v2564_v3, %v2500_v35  ;;  %v3878_v39 = vpop.f32.mrb[12].mxu1 }
 0x4d1   : > { %2693 = vst.msk [vmem:[#allocation5 + $0x10] sm:$0xff] %vm565_vm1, %v2661_v0  ;;  %v2659_v9 = vsel %vm2627_vm4, 0.0, %v2595_v44  ;;  %v3665_v47 = vsel %vm2627_vm4, 1.0, %v6260_v18  ;;  %vm2630_vm8 = vcmp.ge.f32.partialorder %v2598_v23, 0.5  ;;  %v2537_v52 = vsub.f32 %v3878_v39, %v2505_v62  ;;  %v2388_v26 = vpop.f32.mrb[13].mxu1  ;;  %v2511_v44 = vld [vmem:[#allocation5 + $0x60] sm:$0xff] }
 0x4d2   : > { %2691 = vst.msk [vmem:[#allocation5] sm:$0xff] %vm565_vm1, %v2659_v9  ;;  %v2662_v41 = vsel %vm2630_vm8, 0.0, %v2598_v23  ;;  %v3668_v20 = vsel %vm2630_vm8, 1.0, %v6260_v18  ;;  %vm2628_vm9 = vcmp.ge.f32.partialorder %v2596_v21, 0.5  ;;  %v2535_v45 = vsub.f32 %v2388_v26, %v2503_v59  ;;  %v3879_v6 = vpop.f32.mrb[14].mxu1  ;;  %v2514_v23 = vld [vmem:[#allocation5 + $0x78] sm:$0xff] }
 0x4d3   : > { %2694 = vst.msk [vmem:[#allocation5 + $0x18] sm:$0xff] %vm565_vm1, %v2662_v41  ;;  %v2788_v24 = vpack.c.bf16 %v3668_v20, %v3667_v63  ;;  %v2660_v15 = vsel %vm2628_vm9, 0.0, %v2596_v21  ;;  %v3666_v36 = vsel %vm2628_vm9, 1.0, %v6260_v18  ;;  %v2569_v4 = vmul.f32 0.5, %v2537_v52  ;;  %v2391_v48 = vpop.f32.mrb[15].mxu1  ;;  %v2512_v41 = vld [vmem:[#allocation5 + $0x68] sm:$0xff] }
 0x4d4   : > { %2692 = vst.msk [vmem:[#allocation5 + $0x8] sm:$0xff] %vm565_vm1, %v2660_v15  ;;  %v2787_v58 = vpack.c.bf16 %v3666_v36, %v3665_v47  ;;  %v2567_v40 = vmul.f32 0.5, %v2535_v45  ;;  %v2538_v17 = vsub.f32 %v3879_v6, %v2506_v14  ;;  %v2536_v51 = vsub.f32 %v2391_v48, %v2504_v33 }
 0x4d5   : > { %v2601_v54 = vadd.f32 %v2569_v4, %v2505_v62 }
 0x4d6   : > { %v2599_v57 = vadd.f32 %v2567_v40, %v2503_v59  ;;  %v2570_v30 = vmul.f32 0.5, %v2538_v17  ;;  %v2568_v10 = vmul.f32 0.5, %v2536_v51  ;;  %3908 = vmatprep.mubr.msk.bf16.mxu0 %vm565_vm1, %v2787_v58  ;;  %v2517_v17 = vld [vmem:[#allocation5 + $0x90] sm:$0xff] }
 0x4d7   : > { %vm2633_vm5 = vcmp.ge.f32.partialorder %v2601_v54, 0.5  ;;  %3909 = vmatmul.mubr.msk.bf16.vlgmr.msra.gmra.mrb[32].mxu0 %vm565_vm1, %v2788_v24 }
 0x4d8   : > { %v2665_v19 = vsel %vm2633_vm5, 0.0, %v2601_v54  ;;  %vm2631_vm6 = vcmp.ge.f32.partialorder %v2599_v57, 0.5  ;;  %v2602_v38 = vadd.f32 %v2570_v30, %v2506_v14  ;;  %v3882_v5 = vpop.f32.mrb[16].mxu1  ;;  %v2600_v25 = vadd.f32 %v2568_v10, %v2504_v33 }
 0x4d9   : > { %2697 = vst.msk [vmem:[#allocation5 + $0x30] sm:$0xff] %vm565_vm1, %v2665_v19  ;;  %v2663_v61 = vsel %vm2631_vm6, 0.0, %v2599_v57  ;;  %v2541_v46 = vsub.f32 %v3882_v5, %v2509_v11  ;;  %v2404_v2 = vpop.f32.mrb[17].mxu1  ;;  %v3671_v50 = vsel %vm2633_vm5, 1.0, %v6260_v18  ;;  %v3669_v27 = vsel %vm2631_vm6, 1.0, %v6260_v18  ;;  %v2516_v5 = vld [vmem:[#allocation5 + $0x88] sm:$0xff] }
 0x4da   : > { %2695 = vst.msk [vmem:[#allocation5 + $0x20] sm:$0xff] %vm565_vm1, %v2663_v61  ;;  %vm2634_vm12 = vcmp.ge.f32.partialorder %v2602_v38, 0.5  ;;  %v2539_v29 = vsub.f32 %v2404_v2, %v2507_v31  ;;  %v3883_v16 = vpop.f32.mrb[18].mxu1  ;;  %vm2632_vm2 = vcmp.ge.f32.partialorder %v2600_v25, 0.5 }
 0x4db   : > { %v2666_v13 = vsel %vm2634_vm12, 0.0, %v2602_v38  ;;  %v3672_v7 = vsel %vm2634_vm12, 1.0, %v6260_v18  ;;  %v2573_v1 = vmul.f32 0.5, %v2541_v46  ;;  %v2407_v60 = vpop.f32.mrb[19].mxu1  ;;  %v2664_v37 = vsel %vm2632_vm2, 0.0, %v2600_v25  ;;  %v2518_v38 = vld [vmem:[#allocation5 + $0x98] sm:$0xff] }
 0x4dc   : > { %2698 = vst.msk [vmem:[#allocation5 + $0x38] sm:$0xff] %vm565_vm1, %v2666_v13  ;;  %v2790_v42 = vpack.c.bf16 %v3672_v7, %v3671_v50  ;;  %v3670_v35 = vsel %vm2632_vm2, 1.0, %v6260_v18  ;;  %v2571_v43 = vmul.f32 0.5, %v2539_v29  ;;  %2696 = vst.msk [vmem:[#allocation5 + $0x28] sm:$0xff] %vm565_vm1, %v2664_v37  ;;  %v2542_v34 = vsub.f32 %v3883_v16, %v2510_v49 }
 0x4dd   : > { %v2789_v22 = vpack.c.bf16 %v3670_v35, %v3669_v27  ;;  %v2605_v53 = vadd.f32 %v2573_v1, %v2509_v11  ;;  %v2540_v32 = vsub.f32 %v2407_v60, %v2508_v55  ;;  %v2515_v11 = vld [vmem:[#allocation5 + $0x80] sm:$0xff] }
 0x4de   : > { %v2603_v28 = vadd.f32 %v2571_v43, %v2507_v31  ;;  %v2574_v8 = vmul.f32 0.5, %v2542_v34  ;;  %v2521_v34 = vld [vmem:[#allocation5 + $0xb0] sm:$0xff] }
 0x4df   : > { %vm2637_vm7 = vcmp.ge.f32.partialorder %v2605_v53, 0.5  ;;  %v2572_v56 = vmul.f32 0.5, %v2540_v32  ;;  %3912 = vmatprep.mubr.msk.bf16.mxu0 %vm565_vm1, %v2789_v22 }
 0x4e0   : > { %v2669_v3 = vsel %vm2637_vm7, 0.0, %v2605_v53  ;;  %vm2635_vm0 = vcmp.ge.f32.partialorder %v2603_v28, 0.5  ;;  %3913 = vmatmul.mubr.msk.bf16.gmra.mrb[36].mxu0 %vm565_vm1, %v2790_v42  ;;  %v3886_v62 = vpop.f32.mrb[20].mxu1  ;;  %v2606_v0 = vadd.f32 %v2574_v8, %v2510_v49  ;;  %v3675_v39 = vsel %vm2637_vm7, 1.0, %v6260_v18 }
 0x4e1   : > { %2701 = vst.msk [vmem:[#allocation5 + $0x50] sm:$0xff] %vm565_vm1, %v2669_v3  ;;  %v2667_v59 = vsel %vm2635_vm0, 0.0, %v2603_v28  ;;  %v2604_v63 = vadd.f32 %v2572_v56, %v2508_v55  ;;  %v2420_v21 = vpop.f32.mrb[21].mxu1  ;;  %v2545_v9 = vsub.f32 %v3886_v62, %v2513_v12  ;;  %v3673_v26 = vsel %vm2635_vm0, 1.0, %v6260_v18 }
 0x4e2   : > { %2699 = vst.msk [vmem:[#allocation5 + $0x40] sm:$0xff] %vm565_vm1, %v2667_v59  ;;  %v2543_v47 = vsub.f32 %v2420_v21, %v2511_v44  ;;  %v3887_v52 = vpop.f32.mrb[22].mxu1  ;;  %vm2638_vm15 = vcmp.ge.f32.partialorder %v2606_v0, 0.5  ;;  %v2519_v59 = vld [vmem:[#allocation5 + $0xa0] sm:$0xff] }
 0x4e3   : > { %vm2636_vm3 = vcmp.ge.f32.partialorder %v2604_v63, 0.5  ;;  %v2546_v14 = vsub.f32 %v3887_v52, %v2514_v23  ;;  %v2423_v33 = vpop.f32.mrb[23].mxu1  ;;  %v2670_v20 = vsel %vm2638_vm15, 0.0, %v2606_v0  ;;  %v3676_v45 = vsel %vm2638_vm15, 1.0, %v6260_v18  ;;  %v2522_v0 = vld [vmem:[#allocation5 + $0xb8] sm:$0xff] }
 0x4e4   : > { %v2668_v6 = vsel %vm2636_vm3, 0.0, %v2604_v63  ;;  %v3674_v24 = vsel %vm2636_vm3, 1.0, %v6260_v18  ;;  %2702 = vst.msk [vmem:[#allocation5 + $0x58] sm:$0xff] %vm565_vm1, %v2670_v20  ;;  %v2792_v15 = vpack.c.bf16 %v3676_v45, %v3675_v39  ;;  %v2577_v4 = vmul.f32 0.5, %v2545_v9  ;;  %v2520_v9 = vld [vmem:[#allocation5 + $0xa8] sm:$0xff] }
 0x4e5   : > { %2700 = vst.msk [vmem:[#allocation5 + $0x48] sm:$0xff] %vm565_vm1, %v2668_v6  ;;  %v2791_v36 = vpack.c.bf16 %v3674_v24, %v3673_v26  ;;  %v2575_v48 = vmul.f32 0.5, %v2543_v47  ;;  %v2578_v58 = vmul.f32 0.5, %v2546_v14  ;;  %v2544_v40 = vsub.f32 %v2423_v33, %v2512_v41 }
 0x4e6   : > { %v2609_v51 = vadd.f32 %v2577_v4, %v2513_v12 }
 0x4e7   : > { %v2607_v54 = vadd.f32 %v2575_v48, %v2511_v44  ;;  %3916 = vmatprep.mubr.msk.bf16.mxu0 %vm565_vm1, %v2791_v36  ;;  %v2610_v57 = vadd.f32 %v2578_v58, %v2514_v23  ;;  %v2576_v30 = vmul.f32 0.5, %v2544_v40  ;;  %v2525_v40 = vld [vmem:[#allocation5 + $0xd0] sm:$0xff] }
 0x4e8   : > { %3917 = vmatmul.mubr.msk.bf16.gmra.mrb[40].mxu0 %vm565_vm1, %v2792_v15  ;;  %v3890_v10 = vpop.f32.mrb[24].mxu1  ;;  %vm2641_vm11 = vcmp.ge.f32.partialorder %v2609_v51, 0.5 }
 0x4e9   : > { %vm2639_vm10 = vcmp.ge.f32.partialorder %v2607_v54, 0.5  ;;  %v2549_v31 = vsub.f32 %v3890_v10, %v2517_v17  ;;  %v2436_v19 = vpop.f32.mrb[25].mxu1  ;;  %v2673_v61 = vsel %vm2641_vm11, 0.0, %v2609_v51  ;;  %v3679_v25 = vsel %vm2641_vm11, 1.0, %v6260_v18 }
 0x4ea   : > { %v2671_v46 = vsel %vm2639_vm10, 0.0, %v2607_v54  ;;  %v3677_v2 = vsel %vm2639_vm10, 1.0, %v6260_v18  ;;  %v3891_v50 = vpop.f32.mrb[26].mxu1  ;;  %2705 = vst.msk [vmem:[#allocation5 + $0x70] sm:$0xff] %vm565_vm1, %v2673_v61  ;;  %vm2642_vm13 = vcmp.ge.f32.partialorder %v2610_v57, 0.5  ;;  %v2608_v27 = vadd.f32 %v2576_v30, %v2512_v41  ;;  %v2526_v61 = vld [vmem:[#allocation5 + $0xd8] sm:$0xff] }
 0x4eb   : > { %2703 = vst.msk [vmem:[#allocation5 + $0x60] sm:$0xff] %vm565_vm1, %v2671_v46  ;;  %v2581_v29 = vmul.f32 0.5, %v2549_v31  ;;  %v2547_v16 = vsub.f32 %v2436_v19, %v2515_v11  ;;  %v2439_v49 = vpop.f32.mrb[27].mxu1  ;;  %v2674_v55 = vsel %vm2642_vm13, 0.0, %v2610_v57  ;;  %v3680_v13 = vsel %vm2642_vm13, 1.0, %v6260_v18 }
 0x4ec   : > { %v2550_v7 = vsub.f32 %v3891_v50, %v2518_v38  ;;  %v2548_v1 = vsub.f32 %v2439_v49, %v2516_v5  ;;  %2706 = vst.msk [vmem:[#allocation5 + $0x78] sm:$0xff] %vm565_vm1, %v2674_v55  ;;  %v2794_v60 = vpack.c.bf16 %v3680_v13, %v3679_v25  ;;  %vm2640_vm14 = vcmp.ge.f32.partialorder %v2608_v27, 0.5  ;;  %v2524_v50 = vld [vmem:[#allocation5 + $0xc8] sm:$0xff] }
 0x4ed   : > { %v2613_v42 = vadd.f32 %v2581_v29, %v2517_v17  ;;  %v2579_v37 = vmul.f32 0.5, %v2547_v16  ;;  %v2672_v35 = vsel %vm2640_vm14, 0.0, %v2608_v27  ;;  %v3678_v43 = vsel %vm2640_vm14, 1.0, %v6260_v18  ;;  %v2523_v17 = vld [vmem:[#allocation5 + $0xc0] sm:$0xff] }
 0x4ee   : > { %v2582_v22 = vmul.f32 0.5, %v2550_v7  ;;  %v2580_v53 = vmul.f32 0.5, %v2548_v1  ;;  %2704 = vst.msk [vmem:[#allocation5 + $0x68] sm:$0xff] %vm565_vm1, %v2672_v35  ;;  %v2793_v32 = vpack.c.bf16 %v3678_v43, %v3677_v2 }
 0x4ef   : > { %vm2645_vm4 = vcmp.ge.f32.partialorder %v2613_v42, 0.5  ;;  %v2611_v28 = vadd.f32 %v2579_v37, %v2515_v11  ;;  %v2529_v37 = vld [vmem:[#allocation5 + $0xf0] sm:$0xff] }
 0x4f0   : > { %v2677_v8 = vsel %vm2645_vm4, 0.0, %v2613_v42  ;;  %v2614_v56 = vadd.f32 %v2582_v22, %v2518_v38  ;;  %v2612_v12 = vadd.f32 %v2580_v53, %v2516_v5  ;;  %v3894_v44 = vpop.f32.mrb[28].mxu1  ;;  %v3683_v3 = vsel %vm2645_vm4, 1.0, %v6260_v18  ;;  %3920 = vmatprep.mubr.msk.bf16.mxu0 %vm565_vm1, %v2793_v32  ;;  %v2527_v32 = vld [vmem:[#allocation5 + $0xe0] sm:$0xff] }
 0x4f1   : > { %2709 = vst.msk [vmem:[#allocation5 + $0x90] sm:$0xff] %vm565_vm1, %v2677_v8  ;;  %vm2643_vm8 = vcmp.ge.f32.partialorder %v2611_v28, 0.5  ;;  %v2553_v62 = vsub.f32 %v3894_v44, %v2521_v34  ;;  %v2452_v23 = vpop.f32.mrb[29].mxu1  ;;  %3921 = vmatmul.mubr.msk.bf16.gmra.mrb[44].mxu0 %vm565_vm1, %v2794_v60 }
 0x4f2   : > { %v2675_v63 = vsel %vm2643_vm8, 0.0, %v2611_v28  ;;  %v3681_v21 = vsel %vm2643_vm8, 1.0, %v6260_v18  ;;  %vm2646_vm9 = vcmp.ge.f32.partialorder %v2614_v56, 0.5  ;;  %vm2644_vm5 = vcmp.ge.f32.partialorder %v2612_v12, 0.5  ;;  %v3895_v39 = vpop.f32.mrb[30].mxu1 }
 0x4f3   : > { %2707 = vst.msk [vmem:[#allocation5 + $0x80] sm:$0xff] %vm565_vm1, %v2675_v63  ;;  %v2678_v47 = vsel %vm2646_vm9, 0.0, %v2614_v56  ;;  %v3684_v52 = vsel %vm2646_vm9, 1.0, %v6260_v18  ;;  %v2676_v26 = vsel %vm2644_vm5, 0.0, %v2612_v12  ;;  %v3682_v14 = vsel %vm2644_vm5, 1.0, %v6260_v18  ;;  %v2455_v33 = vpop.f32.mrb[31].mxu1 }
 0x4f4   : > { %2710 = vst.msk [vmem:[#allocation5 + $0x98] sm:$0xff] %vm565_vm1, %v2678_v47  ;;  %v2796_v41 = vpack.c.bf16 %v3684_v52, %v3683_v3  ;;  %2708 = vst.msk [vmem:[#allocation5 + $0x88] sm:$0xff] %vm565_vm1, %v2676_v26  ;;  %v2795_v20 = vpack.c.bf16 %v3682_v14, %v3681_v21  ;;  %v2585_v45 = vmul.f32 0.5, %v2553_v62  ;;  %v2551_v6 = vsub.f32 %v2452_v23, %v2519_v59  ;;  %v2530_v56 = vld [vmem:[#allocation5 + $0xf8] sm:$0xff]  ;;  %v2528_v12 = vld [vmem:[#allocation5 + $0xe8] sm:$0xff] }
 0x4f5   : > { %v2554_v24 = vsub.f32 %v3895_v39, %v2522_v0  ;;  %v2552_v15 = vsub.f32 %v2455_v33, %v2520_v9 }
 0x4f6   : > { %v2617_v36 = vadd.f32 %v2585_v45, %v2521_v34  ;;  %v2583_v4 = vmul.f32 0.5, %v2551_v6  ;;  %3924 = vmatprep.mubr.msk.bf16.mxu0 %vm565_vm1, %v2795_v20 }
 0x4f7   : > { %v2586_v48 = vmul.f32 0.5, %v2554_v24  ;;  %v2584_v58 = vmul.f32 0.5, %v2552_v15 }
 0x4f8   : > { %vm2649_vm6 = vcmp.ge.f32.partialorder %v2617_v36, 0.5  ;;  %v2615_v51 = vadd.f32 %v2583_v4, %v2519_v59  ;;  %v3898_v54 = vpop.f32.mrb[32].mxu1 }
 0x4f9   : > { %v2681_v57 = vsel %vm2649_vm6, 0.0, %v2617_v36  ;;  %v2618_v30 = vadd.f32 %v2586_v48, %v2522_v0  ;;  %v2616_v10 = vadd.f32 %v2584_v58, %v2520_v9  ;;  %v2468_v11 = vpop.f32.mrb[33].mxu1  ;;  %v3687_v31 = vsel %vm2649_vm6, 1.0, %v6260_v18  ;;  %3925 = vmatmul.mubr.msk.bf16.gmra.mrb[48].mxu0 %vm565_vm1, %v2796_v41 }
 0x4fa   : > { %2713 = vst.msk [vmem:[#allocation5 + $0xb0] sm:$0xff] %vm565_vm1, %v2681_v57  ;;  %vm2647_vm12 = vcmp.ge.f32.partialorder %v2615_v51, 0.5  ;;  %v2557_v19 = vsub.f32 %v3898_v54, %v2525_v40  ;;  %v2555_v38 = vsub.f32 %v2468_v11, %v2523_v17  ;;  %v3899_v5 = vpop.f32.mrb[34].mxu1 }
 0x4fb   : > { %v2679_v25 = vsel %vm2647_vm12, 0.0, %v2615_v51  ;;  %v3685_v46 = vsel %vm2647_vm12, 1.0, %v6260_v18  ;;  %vm2650_vm2 = vcmp.ge.f32.partialorder %v2618_v30, 0.5  ;;  %vm2648_vm7 = vcmp.ge.f32.partialorder %v2616_v10, 0.5  ;;  %v2471_v2 = vpop.f32.mrb[35].mxu1 }
 0x4fc   : > { %2711 = vst.msk [vmem:[#allocation5 + $0xa0] sm:$0xff] %vm565_vm1, %v2679_v25  ;;  %v2682_v27 = vsel %vm2650_vm2, 0.0, %v2618_v30  ;;  %v3688_v29 = vsel %vm2650_vm2, 1.0, %v6260_v18  ;;  %v2680_v16 = vsel %vm2648_vm7, 0.0, %v2616_v10  ;;  %v3686_v49 = vsel %vm2648_vm7, 1.0, %v6260_v18 }
 0x4fd   : > { %2714 = vst.msk [vmem:[#allocation5 + $0xb8] sm:$0xff] %vm565_vm1, %v2682_v27  ;;  %v2798_v55 = vpack.c.bf16 %v3688_v29, %v3687_v31  ;;  %2712 = vst.msk [vmem:[#allocation5 + $0xa8] sm:$0xff] %vm565_vm1, %v2680_v16  ;;  %v2797_v13 = vpack.c.bf16 %v3686_v49, %v3685_v46  ;;  %v2589_v7 = vmul.f32 0.5, %v2557_v19  ;;  %v2587_v1 = vmul.f32 0.5, %v2555_v38  ;;  %v5922_v38 = vld [vmem:[%s6227_s4] ss:$0 sm:$0xff] }
 0x4fe   : > { %v2558_v60 = vsub.f32 %v3899_v5, %v2526_v61  ;;  %v2556_v42 = vsub.f32 %v2471_v2, %v2524_v50  ;;  %v3035_v2 = vld [vmem:[#allocation6] sm:$0xff]  ;;  %v3038_v29 = vld [vmem:[#allocation6 + $0x18] sm:$0xff] }
 0x4ff   : > { %v2621_v35 = vadd.f32 %v2589_v7, %v2525_v40  ;;  %v2619_v43 = vadd.f32 %v2587_v1, %v2523_v17  ;;  %3928 = vmatprep.mubr.msk.bf16.mxu0 %vm565_vm1, %v2797_v13  ;;  %v3036_v13 = vld [vmem:[#allocation6 + $0x8] sm:$0xff] }
 0x500   : > { %v2590_v22 = vmul.f32 0.5, %v2558_v60  ;;  %v2588_v53 = vmul.f32 0.5, %v2556_v42  ;;  %v3902_v34 = vpop.f32.mrb[36].mxu1 }
 0x501   : > { %vm2653_vm0 = vcmp.ge.f32.partialorder %v2621_v35, 0.5  ;;  %vm2651_vm15 = vcmp.ge.f32.partialorder %v2619_v43, 0.5  ;;  %v2561_v28 = vsub.f32 %v3902_v34, %v2529_v37  ;;  %v2484_v8 = vpop.f32.mrb[37].mxu1  ;;  %3929 = vmatmul.mubr.msk.bf16.gmra.mrb[52].mxu0 %vm565_vm1, %v2798_v55 }
 0x502   : > { %v2685_v44 = vsel %vm2653_vm0, 0.0, %v2621_v35  ;;  %v2683_v3 = vsel %vm2651_vm15, 0.0, %v2619_v43  ;;  %v3903_v62 = vpop.f32.mrb[38].mxu1  ;;  %v2622_v23 = vadd.f32 %v2590_v22, %v2526_v61  ;;  %v2620_v59 = vadd.f32 %v2588_v53, %v2524_v50  ;;  %v3037_v61 = vld [vmem:[#allocation6 + $0x10] sm:$0xff] }
 0x503   : > { %2717 = vst.msk [vmem:[#allocation5 + $0xd0] sm:$0xff] %vm565_vm1, %v2685_v44  ;;  %2715 = vst.msk [vmem:[#allocation5 + $0xc0] sm:$0xff] %vm565_vm1, %v2683_v3  ;;  %v2593_v0 = vmul.f32 0.5, %v2561_v28  ;;  %v2559_v63 = vsub.f32 %v2484_v8, %v2527_v32  ;;  %v2487_v21 = vpop.f32.mrb[39].mxu1  ;;  %v3691_v39 = vsel %vm2653_vm0, 1.0, %v6260_v18  ;;  %v3689_v9 = vsel %vm2651_vm15, 1.0, %v6260_v18 }
 0x504   : > { %v2562_v47 = vsub.f32 %v3903_v62, %v2530_v56  ;;  %v2560_v52 = vsub.f32 %v2487_v21, %v2528_v12  ;;  %vm2654_vm3 = vcmp.ge.f32.partialorder %v2622_v23, 0.5  ;;  %vm2652_vm11 = vcmp.ge.f32.partialorder %v2620_v59, 0.5  ;;  %v3041_v8 = vld [vmem:[#allocation6 + $0x30] sm:$0xff]  ;;  %v3039_v3 = vld [vmem:[#allocation6 + $0x20] sm:$0xff] }
 0x505   : > { %v2625_v26 = vadd.f32 %v2593_v0, %v2529_v37  ;;  %v2591_v14 = vmul.f32 0.5, %v2559_v63  ;;  %v2686_v33 = vsel %vm2654_vm3, 0.0, %v2622_v23  ;;  %v3692_v41 = vsel %vm2654_vm3, 1.0, %v6260_v18  ;;  %v3042_v0 = vld [vmem:[#allocation6 + $0x38] sm:$0xff] }
 0x506   : > { %v2684_v20 = vsel %vm2652_vm11, 0.0, %v2620_v59  ;;  %v3690_v45 = vsel %vm2652_vm11, 1.0, %v6260_v18  ;;  %2718 = vst.msk [vmem:[#allocation5 + $0xd8] sm:$0xff] %vm565_vm1, %v2686_v33  ;;  %v2800_v6 = vpack.c.bf16 %v3692_v41, %v3691_v39  ;;  %v2594_v4 = vmul.f32 0.5, %v2562_v47  ;;  %v3040_v47 = vld [vmem:[#allocation6 + $0x28] sm:$0xff] }
 0x507   : > { %2716 = vst.msk [vmem:[#allocation5 + $0xc8] sm:$0xff] %vm565_vm1, %v2684_v20  ;;  %v2799_v24 = vpack.c.bf16 %v3690_v45, %v3689_v9  ;;  %vm2657_vm10 = vcmp.ge.f32.partialorder %v2625_v26, 0.5  ;;  %v2623_v15 = vadd.f32 %v2591_v14, %v2527_v32  ;;  %v2592_v48 = vmul.f32 0.5, %v2560_v52 }
 0x508   : > { %v2689_v36 = vsel %vm2657_vm10, 0.0, %v2625_v26  ;;  %v2626_v40 = vadd.f32 %v2594_v4, %v2530_v56  ;;  %v3695_v51 = vsel %vm2657_vm10, 1.0, %v6260_v18 }
 0x509   : > { %2721 = vst.msk [vmem:[#allocation5 + $0xf0] sm:$0xff] %vm565_vm1, %v2689_v36  ;;  %vm2655_vm13 = vcmp.ge.f32.partialorder %v2623_v15, 0.5  ;;  %3932 = vmatprep.mubr.msk.bf16.mxu0 %vm565_vm1, %v2799_v24  ;;  %v2624_v17 = vadd.f32 %v2592_v48, %v2528_v12 }
 0x50a   : > { %v2687_v58 = vsel %vm2655_vm13, 0.0, %v2623_v15  ;;  %3933 = vmatmul.mubr.msk.bf16.gmra.mrb[56].mxu0 %vm565_vm1, %v2800_v6  ;;  %v3693_v54 = vsel %vm2655_vm13, 1.0, %v6260_v18  ;;  %vm2658_vm14 = vcmp.ge.f32.partialorder %v2626_v40, 0.5 }
 0x50b   : > { %2719 = vst.msk [vmem:[#allocation5 + $0xe0] sm:$0xff] %vm565_vm1, %v2687_v58  ;;  %vm2656_vm4 = vcmp.ge.f32.partialorder %v2624_v17, 0.5  ;;  %v2690_v57 = vsel %vm2658_vm14, 0.0, %v2626_v40  ;;  %v3696_v30 = vsel %vm2658_vm14, 1.0, %v6260_v18  ;;  %v3045_v58 = vld [vmem:[#allocation6 + $0x50] sm:$0xff] }
 0x50c   : > { %v2688_v10 = vsel %vm2656_vm4, 0.0, %v2624_v17  ;;  %v3694_v11 = vsel %vm2656_vm4, 1.0, %v6260_v18  ;;  %2722 = vst.msk [vmem:[#allocation5 + $0xf8] sm:$0xff] %vm565_vm1, %v2690_v57  ;;  %v2802_v31 = vpack.c.bf16 %v3696_v30, %v3695_v51 }
 0x50d   : > { %2720 = vst.msk [vmem:[#allocation5 + $0xe8] sm:$0xff] %vm565_vm1, %v2688_v10  ;;  %v2801_v19 = vpack.c.bf16 %v3694_v11, %v3693_v54  ;;  %v3043_v54 = vld [vmem:[#allocation6 + $0x40] sm:$0xff]  ;;  %v3046_v11 = vld [vmem:[#allocation6 + $0x58] sm:$0xff] }
 0x50f   : > { %3936 = vmatprep.mubr.msk.bf16.mxu1 %vm565_vm1, %v2801_v19 }
 0x510   : > { %3937 = vmatmul.mubr.msk.bf16.vlgmr.msra.gmra.mrb[40].mxu1 %vm565_vm1, %v2802_v31 }
 0x5aa   : > { %v3910_v5 = vpop.f32.mrb[32].mxu0 }
 0x5ab   : > { %v2917_v25 = vadd.f32 %v3910_v5, %v5922_v38  ;;  %v2908_v46 = vpop.f32.mrb[33].mxu0 }
 0x5ac   : > { %v2909_v50 = vadd.f32 %v5922_v38, %v2908_v46  ;;  %v3911_v27 = vpop.f32.mrb[34].mxu0 }
 0x5ad   : > { %v3069_v16 = vsub.f32 %v2917_v25, %v3037_v61  ;;  %v2920_v49 = vadd.f32 %v3911_v27, %v5922_v38  ;;  %v2911_v55 = vpop.f32.mrb[35].mxu0  ;;  %v3044_v25 = vld [vmem:[#allocation6 + $0x48] sm:$0xff] }
 0x5ae   : > { %v3067_v7 = vsub.f32 %v2909_v50, %v3035_v2  ;;  %v2912_v1 = vadd.f32 %v5922_v38, %v2911_v55 }
 0x5af   : > { %v3101_v60 = vmul.f32 0.5, %v3069_v16  ;;  %v3070_v42 = vsub.f32 %v2920_v49, %v3038_v29 }
 0x5b0   : > { %v3099_v37 = vmul.f32 0.5, %v3067_v7  ;;  %v3068_v35 = vsub.f32 %v2912_v1, %v3036_v13 }
 0x5b1   : > { %v5928_v43 = vadd.f32 %v3101_v60, %v3037_v61  ;;  %v3102_v22 = vmul.f32 0.5, %v3070_v42 }
 0x5b2   : > { %v5930_v53 = vadd.f32 %v3099_v37, %v3035_v2  ;;  %v3100_v34 = vmul.f32 0.5, %v3068_v35 }
 0x5b3   : > { %v5932_v32 = vadd.f32 %v3102_v22, %v3038_v29  ;;  %v3914_v28 = vpop.f32.mrb[36].mxu0  ;;  %vm3165_vm8 = vcmp.ge.f32.partialorder %v5928_v43, 1.0 }
 0x5b4   : > { %v5935_v56 = vadd.f32 %v3100_v34, %v3036_v13  ;;  %v2933_v12 = vadd.f32 %v3914_v28, %v5922_v38  ;;  %v2924_v44 = vpop.f32.mrb[37].mxu0  ;;  %vm3163_vm9 = vcmp.ge.f32.partialorder %v5930_v53, 1.0  ;;  %v3197_v62 = vsel %vm3165_vm8, 0.0, %v5928_v43  ;;  %v3049_v34 = vld [vmem:[#allocation6 + $0x70] sm:$0xff] }
 0x5b5   : > { %v2925_v23 = vadd.f32 %v5922_v38, %v2924_v44  ;;  %v3915_v59 = vpop.f32.mrb[38].mxu0  ;;  %v3195_v63 = vsel %vm3163_vm9, 0.0, %v5930_v53  ;;  %3229 = vst.msk [vmem:[#allocation6 + $0x10] sm:$0xff] %vm565_vm1, %v3197_v62  ;;  %vm3166_vm6 = vcmp.ge.f32.partialorder %v5932_v32, 1.0  ;;  %v3047_v44 = vld [vmem:[#allocation6 + $0x60] sm:$0xff] }
 0x5b6   : > { %v3073_v21 = vsub.f32 %v2933_v12, %v3041_v8  ;;  %v2936_v39 = vadd.f32 %v3915_v59, %v5922_v38  ;;  %v2927_v9 = vpop.f32.mrb[39].mxu0  ;;  %3227 = vst.msk [vmem:[#allocation6] sm:$0xff] %vm565_vm1, %v3195_v63  ;;  %vm3164_vm5 = vcmp.ge.f32.partialorder %v5935_v56, 1.0  ;;  %v3198_v20 = vsel %vm3166_vm6, 0.0, %v5932_v32  ;;  %v3050_v59 = vld [vmem:[#allocation6 + $0x78] sm:$0xff] }
 0x5b7   : > { %v3071_v52 = vsub.f32 %v2925_v23, %v3039_v3  ;;  %v2928_v26 = vadd.f32 %v5922_v38, %v2927_v9  ;;  %v3196_v14 = vsel %vm3164_vm5, 0.0, %v5935_v56  ;;  %3230 = vst.msk [vmem:[#allocation6 + $0x18] sm:$0xff] %vm565_vm1, %v3198_v20  ;;  %v3048_v9 = vld [vmem:[#allocation6 + $0x68] sm:$0xff]  ;;  %v6042_v53 = vsel %vm3166_vm6, 1.0, %v6260_v18 }
 0x5b8   : > { %v3105_v33 = vmul.f32 0.5, %v3073_v21  ;;  %v3074_v41 = vsub.f32 %v2936_v39, %v3042_v0  ;;  %3228 = vst.msk [vmem:[#allocation6 + $0x8] sm:$0xff] %vm565_vm1, %v3196_v14 }
 0x5b9   : > { %v3103_v45 = vmul.f32 0.5, %v3071_v52  ;;  %v3072_v6 = vsub.f32 %v2928_v26, %v3040_v47 }
 0x5ba   : > { %v5960_v24 = vadd.f32 %v3105_v33, %v3041_v8  ;;  %v3106_v15 = vmul.f32 0.5, %v3074_v41 }
 0x5bb   : > { %v5962_v36 = vadd.f32 %v3103_v45, %v3039_v3  ;;  %v3104_v4 = vmul.f32 0.5, %v3072_v6  ;;  %v3918_v48 = vpop.f32.mrb[40].mxu0  ;;  %v6027_v45 = vsel %vm3163_vm9, 1.0, %v6260_v18 }
 0x5bc   : > { %v5964_v40 = vadd.f32 %v3106_v15, %v3042_v0  ;;  %v2949_v17 = vadd.f32 %v3918_v48, %v5922_v38  ;;  %v2940_v51 = vpop.f32.mrb[41].mxu0  ;;  %vm3169_vm12 = vcmp.ge.f32.partialorder %v5960_v24, 1.0  ;;  %v6037_v48 = vsel %vm3165_vm8, 1.0, %v6260_v18 }
 0x5bd   : > { %v5968_v57 = vadd.f32 %v3104_v4, %v3040_v47  ;;  %v2941_v30 = vadd.f32 %v5922_v38, %v2940_v51  ;;  %v3919_v10 = vpop.f32.mrb[42].mxu0  ;;  %vm3167_vm2 = vcmp.ge.f32.partialorder %v5962_v36, 1.0  ;;  %v3201_v31 = vsel %vm3169_vm12, 0.0, %v5960_v24 }
 0x5be   : > { %v3077_v19 = vsub.f32 %v2949_v17, %v3045_v58  ;;  %v2952_v5 = vadd.f32 %v3919_v10, %v5922_v38  ;;  %v2943_v61 = vpop.f32.mrb[43].mxu0  ;;  %v3199_v46 = vsel %vm3167_vm2, 0.0, %v5962_v36  ;;  %3233 = vst.msk [vmem:[#allocation6 + $0x30] sm:$0xff] %vm565_vm1, %v3201_v31  ;;  %vm3170_vm0 = vcmp.ge.f32.partialorder %v5964_v40, 1.0  ;;  %v3054_v36 = vld [vmem:[#allocation6 + $0x98] sm:$0xff] }
 0x5bf   : > { %v3075_v2 = vsub.f32 %v2941_v30, %v3043_v54  ;;  %v2944_v50 = vadd.f32 %v5922_v38, %v2943_v61  ;;  %3231 = vst.msk [vmem:[#allocation6 + $0x20] sm:$0xff] %vm565_vm1, %v3199_v46  ;;  %vm3168_vm7 = vcmp.ge.f32.partialorder %v5968_v57, 1.0  ;;  %v3202_v1 = vsel %vm3170_vm0, 0.0, %v5964_v40 }
 0x5c0   : > { %v3109_v27 = vmul.f32 0.5, %v3077_v19  ;;  %v3078_v29 = vsub.f32 %v2952_v5, %v3046_v11  ;;  %v3200_v16 = vsel %vm3168_vm7, 0.0, %v5968_v57  ;;  %3234 = vst.msk [vmem:[#allocation6 + $0x38] sm:$0xff] %vm565_vm1, %v3202_v1  ;;  %v6032_v4 = vsel %vm3164_vm5, 1.0, %v6260_v18 }
 0x5c1   : > { %v3107_v49 = vmul.f32 0.5, %v3075_v2  ;;  %v3076_v55 = vsub.f32 %v2944_v50, %v3044_v25  ;;  %3232 = vst.msk [vmem:[#allocation6 + $0x28] sm:$0xff] %vm565_vm1, %v3200_v16  ;;  %v6047_v56 = vsel %vm3167_vm2, 1.0, %v6260_v18  ;;  %v6055_v31 = vsel %vm3169_vm12, 1.0, %v6260_v18  ;;  %v3052_v50 = vld [vmem:[#allocation6 + $0x88] sm:$0xff] }
 0x5c2   : > { %v5988_v13 = vadd.f32 %v3109_v27, %v3045_v58  ;;  %v3110_v7 = vmul.f32 0.5, %v3078_v29  ;;  %v6065_v24 = vsel %vm3168_vm7, 1.0, %v6260_v18 }
 0x5c3   : > { %v5993_v60 = vadd.f32 %v3107_v49, %v3043_v54  ;;  %v3108_v42 = vmul.f32 0.5, %v3076_v55  ;;  %v3053_v54 = vld [vmem:[#allocation6 + $0x90] sm:$0xff]  ;;  %v6073_v49 = vsel %vm3170_vm0, 1.0, %v6260_v18 }
 0x5c4   : > { %v5996_v37 = vadd.f32 %v3110_v7, %v3046_v11  ;;  %vm3173_vm15 = vcmp.ge.f32.partialorder %v5988_v13, 1.0  ;;  %v3922_v22 = vpop.f32.mrb[44].mxu0  ;;  %v3051_v11 = vld [vmem:[#allocation6 + $0x80] sm:$0xff] }
 0x5c5   : > { %v5999_v35 = vadd.f32 %v3108_v42, %v3044_v25  ;;  %vm3171_vm3 = vcmp.ge.f32.partialorder %v5993_v60, 1.0  ;;  %v3205_v28 = vsel %vm3173_vm15, 0.0, %v5988_v13  ;;  %v2965_v8 = vadd.f32 %v3922_v22, %v5922_v38  ;;  %v2956_v12 = vpop.f32.mrb[45].mxu0 }
 0x5c6   : > { %v3203_v3 = vsel %vm3171_vm3, 0.0, %v5993_v60  ;;  %3237 = vst.msk [vmem:[#allocation6 + $0x50] sm:$0xff] %vm565_vm1, %v3205_v28  ;;  %vm3174_vm11 = vcmp.ge.f32.partialorder %v5996_v37, 1.0  ;;  %v2957_v62 = vadd.f32 %v5922_v38, %v2956_v12  ;;  %v3923_v23 = vpop.f32.mrb[46].mxu0  ;;  %v6080_v7 = vsel %vm3173_vm15, 1.0, %v6260_v18 }
 0x5c7   : > { %3235 = vst.msk [vmem:[#allocation6 + $0x40] sm:$0xff] %vm565_vm1, %v3203_v3  ;;  %vm3172_vm10 = vcmp.ge.f32.partialorder %v5999_v35, 1.0  ;;  %v3206_v0 = vsel %vm3174_vm11, 0.0, %v5996_v37  ;;  %v3081_v63 = vsub.f32 %v2965_v8, %v3049_v34  ;;  %v2968_v21 = vadd.f32 %v3923_v23, %v5922_v38  ;;  %v2959_v39 = vpop.f32.mrb[47].mxu0  ;;  %v3057_v3 = vld [vmem:[#allocation6 + $0xb0] sm:$0xff] }
 0x5c8   : > { %v3204_v47 = vsel %vm3172_vm10, 0.0, %v5999_v35  ;;  %3238 = vst.msk [vmem:[#allocation6 + $0x58] sm:$0xff] %vm565_vm1, %v3206_v0  ;;  %v3079_v52 = vsub.f32 %v2957_v62, %v3047_v44  ;;  %v2960_v26 = vadd.f32 %v5922_v38, %v2959_v39  ;;  %v6088_v40 = vsel %vm3171_vm3, 1.0, %v6260_v18 }
 0x5c9   : > { %3236 = vst.msk [vmem:[#allocation6 + $0x48] sm:$0xff] %vm565_vm1, %v3204_v47  ;;  %v3113_v14 = vmul.f32 0.5, %v3081_v63  ;;  %v3082_v33 = vsub.f32 %v2968_v21, %v3050_v59  ;;  %v6095_v13 = vsel %vm3174_vm11, 1.0, %v6260_v18  ;;  %v6103_v62 = vsel %vm3172_vm10, 1.0, %v6260_v18  ;;  %v3055_v63 = vld [vmem:[#allocation6 + $0xa0] sm:$0xff]  ;;  %v3058_v47 = vld [vmem:[#allocation6 + $0xb8] sm:$0xff] }
 0x5ca   : > { %v3111_v41 = vmul.f32 0.5, %v3079_v52  ;;  %v3080_v20 = vsub.f32 %v2960_v26, %v3048_v9 }
 0x5cb   : > { %v3145_v6 = vadd.f32 %v3113_v14, %v3049_v34  ;;  %v3114_v15 = vmul.f32 0.5, %v3082_v33 }
 0x5cc   : > { %v3143_v58 = vadd.f32 %v3111_v41, %v3047_v44  ;;  %v3112_v17 = vmul.f32 0.5, %v3080_v20  ;;  %v3926_v51 = vpop.f32.mrb[48].mxu0  ;;  %v3056_v41 = vld [vmem:[#allocation6 + $0xa8] sm:$0xff] }
 0x5cd   : > { %v6049_v30 = vadd.f32 %v3114_v15, %v3050_v59  ;;  %v2981_v43 = vadd.f32 %v3926_v51, %v5922_v38  ;;  %v2972_v10 = vpop.f32.mrb[49].mxu0  ;;  %vm3177_vm13 = vcmp.ge.f32.partialorder %v3145_v6, 1.0 }
 0x5ce   : > { %v6057_v32 = vadd.f32 %v3112_v17, %v3048_v9  ;;  %v2973_v19 = vadd.f32 %v5922_v38, %v2972_v10  ;;  %v3927_v5 = vpop.f32.mrb[50].mxu0  ;;  %vm3175_vm14 = vcmp.ge.f32.partialorder %v3143_v58, 1.0  ;;  %v3209_v61 = vsel %vm3177_vm13, 0.0, %v3145_v6 }
 0x5cf   : > { %v3085_v25 = vsub.f32 %v2981_v43, %v3053_v54  ;;  %v2984_v46 = vadd.f32 %v3927_v5, %v5922_v38  ;;  %v2975_v2 = vpop.f32.mrb[51].mxu0  ;;  %v3207_v27 = vsel %vm3175_vm14, 0.0, %v3143_v58  ;;  %3241 = vst.msk [vmem:[#allocation6 + $0x70] sm:$0xff] %vm565_vm1, %v3209_v61  ;;  %vm3178_vm8 = vcmp.ge.f32.partialorder %v6049_v30, 1.0 }
 0x5d0   : > { %v3083_v29 = vsub.f32 %v2973_v19, %v3051_v11  ;;  %v2976_v16 = vadd.f32 %v5922_v38, %v2975_v2  ;;  %3239 = vst.msk [vmem:[#allocation6 + $0x60] sm:$0xff] %vm565_vm1, %v3207_v27  ;;  %vm3176_vm4 = vcmp.ge.f32.partialorder %v6057_v32, 1.0  ;;  %v3210_v8 = vsel %vm3178_vm8, 0.0, %v6049_v30  ;;  %v3061_v27 = vld [vmem:[#allocation6 + $0xd0] sm:$0xff] }
 0x5d1   : > { %v3117_v55 = vmul.f32 0.5, %v3085_v25  ;;  %v3086_v57 = vsub.f32 %v2984_v46, %v3054_v36  ;;  %v3208_v1 = vsel %vm3176_vm4, 0.0, %v6057_v32  ;;  %v6107_v23 = vsel %vm3175_vm14, 1.0, %v6260_v18  ;;  %3242 = vst.msk [vmem:[#allocation6 + $0x78] sm:$0xff] %vm565_vm1, %v3210_v8 }
 0x5d2   : > { %v3115_v42 = vmul.f32 0.5, %v3083_v29  ;;  %v3084_v22 = vsub.f32 %v2976_v16, %v3052_v50  ;;  %3240 = vst.msk [vmem:[#allocation6 + $0x68] sm:$0xff] %vm565_vm1, %v3208_v1  ;;  %v6113_v21 = vsel %vm3177_vm13, 1.0, %v6260_v18  ;;  %v3059_v1 = vld [vmem:[#allocation6 + $0xc0] sm:$0xff] }
 0x5d3   : > { %v3149_v34 = vadd.f32 %v3117_v55, %v3053_v54  ;;  %v3118_v28 = vmul.f32 0.5, %v3086_v57 }
 0x5d4   : > { %v3147_v12 = vadd.f32 %v3115_v42, %v3051_v11  ;;  %v3116_v44 = vmul.f32 0.5, %v3084_v22  ;;  %v3930_v60 = vpop.f32.mrb[52].mxu0 }
 0x5d5   : > { %v3150_v37 = vadd.f32 %v3118_v28, %v3054_v36  ;;  %v2997_v59 = vadd.f32 %v3930_v60, %v5922_v38  ;;  %v2988_v0 = vpop.f32.mrb[53].mxu0  ;;  %vm3181_vm9 = vcmp.ge.f32.partialorder %v3149_v34, 1.0  ;;  %v3062_v28 = vld [vmem:[#allocation6 + $0xd8] sm:$0xff] }
 0x5d6   : > { %v3148_v39 = vadd.f32 %v3116_v44, %v3052_v50  ;;  %v2989_v35 = vadd.f32 %v5922_v38, %v2988_v0  ;;  %v3931_v9 = vpop.f32.mrb[54].mxu0  ;;  %vm3179_vm5 = vcmp.ge.f32.partialorder %v3147_v12, 1.0  ;;  %v6118_v52 = vsel %vm3181_vm9, 1.0, %v6260_v18 }
 0x5d7   : > { %v3089_v26 = vsub.f32 %v2997_v59, %v3057_v3  ;;  %v3000_v14 = vadd.f32 %v3931_v9, %v5922_v38  ;;  %v2991_v33 = vpop.f32.mrb[55].mxu0  ;;  %v3732_v20 = vsel %vm3179_vm5, 1.0, %v6260_v18  ;;  %v3211_v6 = vsel %vm3179_vm5, 0.0, %v3147_v12 }
 0x5d8   : > { %v3087_v15 = vsub.f32 %v2989_v35, %v3055_v63  ;;  %v2992_v58 = vadd.f32 %v5922_v38, %v2991_v33  ;;  %v3990_v17 = vpack.i.bf16 %v3732_v20, %v6027_v45  ;;  %3243 = vst.msk [vmem:[#allocation6 + $0x80] sm:$0xff] %vm565_vm1, %v3211_v6  ;;  %vm3180_vm6 = vcmp.ge.f32.partialorder %v3148_v39, 1.0  ;;  %v3065_v6 = vld [vmem:[#allocation6 + $0xf0] sm:$0xff] }
 0x5d9   : > { %v3121_v51 = vmul.f32 0.5, %v3089_v26  ;;  %v3090_v54 = vsub.f32 %v3000_v14, %v3058_v47  ;;  %v3733_v43 = vsel %vm3180_vm6, 1.0, %v6260_v18  ;;  %v3212_v10 = vsel %vm3180_vm6, 0.0, %v3148_v39 }
 0x5da   : > { %v3119_v11 = vmul.f32 0.5, %v3087_v15  ;;  %v3088_v19 = vsub.f32 %v2992_v58, %v3056_v41  ;;  %3991 = vxpose.xlu0.b32.start [1/16] (narrow) %v3990_v17, 32  ;;  %v3992_v5 = vpack.i.bf16 %v3733_v43, %v6032_v4  ;;  %3244 = vst.msk [vmem:[#allocation6 + $0x88] sm:$0xff] %vm565_vm1, %v3212_v10  ;;  %v3994_v36 = vpack.i.bf16 %v6118_v52, %v6037_v48  ;;  %v3063_v43 = vld [vmem:[#allocation6 + $0xe0] sm:$0xff] }
 0x5db   : > { %v3153_v61 = vadd.f32 %v3121_v51, %v3057_v3  ;;  %v3122_v45 = vmul.f32 0.5, %v3090_v54  ;;  %v3213_v25 = vsel %vm3181_vm9, 0.0, %v3149_v34  ;;  %vm3182_vm12 = vcmp.ge.f32.partialorder %v3150_v37, 1.0  ;;  %v3060_v3 = vld [vmem:[#allocation6 + $0xc8] sm:$0xff] }
 0x5dc   : > { %v3151_v46 = vadd.f32 %v3119_v11, %v3055_v63  ;;  %v3120_v2 = vmul.f32 0.5, %v3088_v19  ;;  %3245 = vst.msk [vmem:[#allocation6 + $0x90] sm:$0xff] %vm565_vm1, %v3213_v25  ;;  %v3735_v29 = vsel %vm3182_vm12, 1.0, %v6260_v18  ;;  %v3214_v16 = vsel %vm3182_vm12, 0.0, %v3150_v37 }
 0x5dd   : > { %v3934_v50 = vpop.f32.mrb[56].mxu0  ;;  %v3154_v4 = vadd.f32 %v3122_v45, %v3058_v47  ;;  %v3996_v48 = vpack.i.bf16 %v3735_v29, %v6042_v53  ;;  %3246 = vst.msk [vmem:[#allocation6 + $0x98] sm:$0xff] %vm565_vm1, %v3214_v16  ;;  %vm3185_vm2 = vcmp.ge.f32.partialorder %v3153_v61, 1.0 }
 0x5de   : > { %v3013_v55 = vadd.f32 %v3934_v50, %v5922_v38  ;;  %v3004_v57 = vpop.f32.mrb[57].mxu0  ;;  %v3152_v42 = vadd.f32 %v3120_v2, %v3056_v41  ;;  %3993 = vxpose.xlu0.b32.cont [2/16] (narrow) %v3992_v5, 32  ;;  %vm3183_vm7 = vcmp.ge.f32.partialorder %v3151_v46, 1.0  ;;  %v6139_v8 = vsel %vm3185_vm2, 1.0, %v6260_v18  ;;  %v3066_v5 = vld [vmem:[#allocation6 + $0xf8] sm:$0xff]  ;;  %v3064_v50 = vld [vmem:[#allocation6 + $0xe8] sm:$0xff] }
 0x5df   : > { %v3005_v22 = vadd.f32 %v5922_v38, %v3004_v57  ;;  %v3935_v34 = vpop.f32.mrb[58].mxu0  ;;  %v3736_v53 = vsel %vm3183_vm7, 1.0, %v6260_v18  ;;  %v3215_v37 = vsel %vm3183_vm7, 0.0, %v3151_v46  ;;  %v3217_v15 = vsel %vm3185_vm2, 0.0, %v3153_v61 }
 0x5e0   : > { %v3093_v12 = vsub.f32 %v3013_v55, %v3061_v27  ;;  %v3016_v44 = vadd.f32 %v3935_v34, %v5922_v38  ;;  %v3007_v60 = vpop.f32.mrb[59].mxu0  ;;  %v3998_v63 = vpack.i.bf16 %v3736_v53, %v6047_v56  ;;  %3247 = vst.msk [vmem:[#allocation6 + $0xa0] sm:$0xff] %vm565_vm1, %v3215_v37  ;;  %vm3184_vm0 = vcmp.ge.f32.partialorder %v3152_v42, 1.0  ;;  %3249 = vst.msk [vmem:[#allocation6 + $0xb0] sm:$0xff] %vm565_vm1, %v3217_v15 }
 0x5e1   : > { %v3091_v59 = vsub.f32 %v3005_v22, %v3059_v1  ;;  %v3008_v0 = vadd.f32 %v5922_v38, %v3007_v60  ;;  %v6147_v9 = vsel %vm3184_vm0, 1.0, %v6260_v18  ;;  %v3216_v47 = vsel %vm3184_vm0, 0.0, %v3152_v42 }
 0x5e2   : > { %v3125_v39 = vmul.f32 0.5, %v3093_v12  ;;  %v3094_v35 = vsub.f32 %v3016_v44, %v3062_v28  ;;  %3995 = vxpose.xlu0.b32.cont [3/16] (narrow) %v3994_v36, 32  ;;  %v4000_v14 = vpack.i.bf16 %v6147_v9, %v6065_v24  ;;  %3248 = vst.msk [vmem:[#allocation6 + $0xa8] sm:$0xff] %vm565_vm1, %v3216_v47  ;;  %v4002_v56 = vpack.i.bf16 %v6139_v8, %v6055_v31 }
 0x5e3   : > { %v3123_v52 = vmul.f32 0.5, %v3091_v59  ;;  %v3092_v26 = vsub.f32 %v3008_v0, %v3060_v3  ;;  %v3938_v20 = vpop.f32.mrb[40].mxu1  ;;  %vm3186_vm15 = vcmp.ge.f32.partialorder %v3154_v4, 1.0 }
 0x5e4   : > { %v3157_v33 = vadd.f32 %v3125_v39, %v3061_v27  ;;  %v3126_v41 = vmul.f32 0.5, %v3094_v35  ;;  %v3029_v51 = vadd.f32 %v3938_v20, %v5922_v38  ;;  %v3020_v54 = vpop.f32.mrb[41].mxu1  ;;  %v6158_v24 = vsel %vm3186_vm15, 1.0, %v6260_v18 }
 0x5e5   : > { %v3155_v58 = vadd.f32 %v3123_v52, %v3059_v1  ;;  %v3124_v17 = vmul.f32 0.5, %v3092_v26  ;;  %v3021_v11 = vadd.f32 %v5922_v38, %v3020_v54  ;;  %v3939_v19 = vpop.f32.mrb[42].mxu1  ;;  %v4004_v36 = vpack.i.bf16 %v6158_v24, %v6073_v49 }
 0x5e6   : > { %v3158_v10 = vadd.f32 %v3126_v41, %v3062_v28  ;;  %v3218_v61 = vsel %vm3186_vm15, 0.0, %v3154_v4  ;;  %v3097_v25 = vsub.f32 %v3029_v51, %v3065_v6  ;;  %3997 = vxpose.xlu0.b32.cont [4/16] (narrow) %v3996_v48, 32  ;;  %v3032_v46 = vadd.f32 %v3939_v19, %v5922_v38  ;;  %v3023_v2 = vpop.f32.mrb[43].mxu1 }
 0x5e7   : > { %v3156_v45 = vadd.f32 %v3124_v17, %v3060_v3  ;;  %3250 = vst.msk [vmem:[#allocation6 + $0xb8] sm:$0xff] %vm565_vm1, %v3218_v61  ;;  %vm3187_vm3 = vcmp.ge.f32.partialorder %v3155_v58, 1.0  ;;  %v3095_v27 = vsub.f32 %v3021_v11, %v3063_v43  ;;  %v3024_v29 = vadd.f32 %v5922_v38, %v3023_v2 }
 0x5e8   : > { %v3740_v16 = vsel %vm3187_vm3, 1.0, %v6260_v18  ;;  %v3219_v55 = vsel %vm3187_vm3, 0.0, %v3155_v58  ;;  %v3129_v57 = vmul.f32 0.5, %v3097_v25  ;;  %v3098_v1 = vsub.f32 %v3032_v46, %v3066_v5 }
 0x5e9   : > { %v4006_v4 = vpack.i.bf16 %v3740_v16, %v6088_v40  ;;  %3251 = vst.msk [vmem:[#allocation6 + $0xc0] sm:$0xff] %vm565_vm1, %v3219_v55  ;;  %vm3188_vm11 = vcmp.ge.f32.partialorder %v3156_v45, 1.0  ;;  %v3127_v48 = vmul.f32 0.5, %v3095_v27  ;;  %v3096_v42 = vsub.f32 %v3024_v29, %v3064_v50 }
 0x5ea   : > { %v3741_v22 = vsel %vm3188_vm11, 1.0, %v6260_v18  ;;  %v3220_v34 = vsel %vm3188_vm11, 0.0, %v3156_v45  ;;  %v3161_v28 = vadd.f32 %v3129_v57, %v3065_v6  ;;  %v3130_v12 = vmul.f32 0.5, %v3098_v1  ;;  %3999 = vxpose.xlu0.b32.cont [5/16] (narrow) %v3998_v63, 32 }
 0x5eb   : > { %v4008_v38 = vpack.i.bf16 %v3741_v22, %v6103_v62  ;;  %3252 = vst.msk [vmem:[#allocation6 + $0xc8] sm:$0xff] %vm565_vm1, %v3220_v34  ;;  %vm3189_vm10 = vcmp.ge.f32.partialorder %v3157_v33, 1.0  ;;  %v3159_v44 = vadd.f32 %v3127_v48, %v3063_v43  ;;  %v3128_v60 = vmul.f32 0.5, %v3096_v42 }
 0x5ec   : > { %v3742_v40 = vsel %vm3189_vm10, 1.0, %v6260_v18  ;;  %v3221_v3 = vsel %vm3189_vm10, 0.0, %v3157_v33  ;;  %v3162_v53 = vadd.f32 %v3130_v12, %v3066_v5  ;;  %vm3190_vm13 = vcmp.ge.f32.partialorder %v3158_v10, 1.0 }
 0x5ed   : > { %v4010_v37 = vpack.i.bf16 %v3742_v40, %v6080_v7  ;;  %3253 = vst.msk [vmem:[#allocation6 + $0xd0] sm:$0xff] %vm565_vm1, %v3221_v3  ;;  %vm3193_vm14 = vcmp.ge.f32.partialorder %v3161_v28, 1.0  ;;  %v3160_v59 = vadd.f32 %v3128_v60, %v3064_v50  ;;  %v3743_v0 = vsel %vm3190_vm13, 1.0, %v6260_v18 }
 0x5ee   : > { %v3222_v63 = vsel %vm3190_vm13, 0.0, %v3158_v10  ;;  %vm3191_vm9 = vcmp.ge.f32.partialorder %v3159_v44, 1.0  ;;  %4001 = vxpose.xlu0.b32.cont [6/16] (narrow) %v4000_v14, 32  ;;  %v4012_v62 = vpack.i.bf16 %v3743_v0, %v6095_v13  ;;  %v3746_v9 = vsel %vm3193_vm14, 1.0, %v6260_v18 }
 0x5ef   : > { %3254 = vst.msk [vmem:[#allocation6 + $0xd8] sm:$0xff] %vm565_vm1, %v3222_v63  ;;  %v3744_v39 = vsel %vm3191_vm9, 1.0, %v6260_v18  ;;  %v3223_v35 = vsel %vm3191_vm9, 0.0, %v3159_v44  ;;  %vm3192_vm5 = vcmp.ge.f32.partialorder %v3160_v59, 1.0  ;;  %v4018_v47 = vpack.i.bf16 %v3746_v9, %v6113_v21 }
 0x5f0   : > { %v4014_v7 = vpack.i.bf16 %v3744_v39, %v6107_v23  ;;  %3255 = vst.msk [vmem:[#allocation6 + $0xe0] sm:$0xff] %vm565_vm1, %v3223_v35  ;;  %v3225_v52 = vsel %vm3193_vm14, 0.0, %v3161_v28  ;;  %v3729_v26 = vsel %vm3176_vm4, 1.0, %v6260_v18  ;;  %v3745_v13 = vsel %vm3192_vm5, 1.0, %v6260_v18 }
 0x5f1   : > { %v3224_v14 = vsel %vm3192_vm5, 0.0, %v3160_v59  ;;  %3257 = vst.msk [vmem:[#allocation6 + $0xf0] sm:$0xff] %vm565_vm1, %v3225_v52  ;;  %vm3194_vm6 = vcmp.ge.f32.partialorder %v3162_v53, 1.0  ;;  %v4016_v33 = vpack.i.bf16 %v3745_v13, %v3729_v26  ;;  %v3731_v23 = vsel %vm3178_vm8, 1.0, %v6260_v18 }
 0x5f2   : > { %3256 = vst.msk [vmem:[#allocation6 + $0xe8] sm:$0xff] %vm565_vm1, %v3224_v14  ;;  %v3747_v21 = vsel %vm3194_vm6, 1.0, %v6260_v18  ;;  %v3226_v41 = vsel %vm3194_vm6, 0.0, %v3162_v53  ;;  %4003 = vxpose.xlu0.b32.cont [7/16] (narrow) %v4002_v56, 32 }
 0x5f3   : > { %v4020_v32 = vpack.i.bf16 %v3747_v21, %v3731_v23  ;;  %3258 = vst.msk [vmem:[#allocation6 + $0xf8] sm:$0xff] %vm565_vm1, %v3226_v41 }
 0x5f6   : > { %4005 = vxpose.xlu0.b32.cont [8/16] (narrow) %v4004_v36, 32 }
 0x5fa   : > { %4007 = vxpose.xlu0.b32.cont [9/16] (narrow) %v4006_v4, 32 }
 0x5fe   : > { %4009 = vxpose.xlu0.b32.cont [10/16] (narrow) %v4008_v38, 32 }
 0x602   : > { %4011 = vxpose.xlu0.b32.cont [11/16] (narrow) %v4010_v37, 32 }
 0x606   : > { %4013 = vxpose.xlu0.b32.cont [12/16] (narrow) %v4012_v62, 32 }
 0x60a   : > { %4015 = vxpose.xlu0.b32.cont [13/16] (narrow) %v4014_v7, 32 }
 0x60e   : > { %4017 = vxpose.xlu0.b32.cont [14/16] (narrow) %v4016_v33, 32 }
 0x612   : > { %4019 = vxpose.xlu0.b32.cont [15/16] (narrow) %v4018_v47, 32 }
 0x616   : > { %4021 = vxpose.xlu0.b32.end [16/16] (narrow) %v4020_v32, 32 }
 0x65a   : > { %v4022_v18 = vpop.trf.xlu0 }
 0x65b   : > { %v4026_v30 = vunpack.i.h.bf16 %v4022_v18  ;;  %v4023_v31 = vunpack.i.l.bf16 %v4022_v18 }
 0x65d   : > { %3388 = vst [vmem:[%s4229_s14 + $0x8] sm:$0xff] %v4026_v30  ;;  %3387 = vst [vmem:[%s4229_s14] sm:$0xff] %v4023_v31 }
 0x65e   : > { %v4027_v49 = vpop.trf.xlu0 }
 0x65f   : > { %v4031_v8 = vunpack.i.h.bf16 %v4027_v49  ;;  %v4028_v56 = vunpack.i.l.bf16 %v4027_v49 }
 0x661   : > { %3390 = vst [vmem:[%s4229_s14 + $0x18] sm:$0xff] %v4031_v8  ;;  %3389 = vst [vmem:[%s4229_s14 + $0x10] sm:$0xff] %v4028_v56 }
 0x662   : > { %v4032_v20 = vpop.trf.xlu0 }
 0x663   : > { %v4036_v6 = vunpack.i.h.bf16 %v4032_v20  ;;  %v4033_v15 = vunpack.i.l.bf16 %v4032_v20 }
 0x665   : > { %3392 = vst [vmem:[%s4229_s14 + $0x28] sm:$0xff] %v4036_v6  ;;  %3391 = vst [vmem:[%s4229_s14 + $0x20] sm:$0xff] %v4033_v15 }
 0x666   : > { %v4037_v58 = vpop.trf.xlu0 }
 0x667   : > { %v4041_v17 = vunpack.i.h.bf16 %v4037_v58  ;;  %v4038_v51 = vunpack.i.l.bf16 %v4037_v58 }
 0x669   : > { %3394 = vst [vmem:[%s4229_s14 + $0x38] sm:$0xff] %v4041_v17  ;;  %3393 = vst [vmem:[%s4229_s14 + $0x30] sm:$0xff] %v4038_v51 }
 0x66a PF: > { %s16_s25 = sadd.s32 1, %s4148_s25   ;;  %s6311_s21 = smov %s4140_s23 }
 0x66b   : > { %p13_p8 = scmp.ge.s32.totalorder %s16_s25, 10   ;;  %s6312_s22 = smov %s4144_s24 }
 0x66c   : > { %s6313_s23 = smov %s6316_s26  ;;  %s6314_s24 = smov %s6320_s27 }
 0x66d   :  { %15 = sbr.rel (!%p13_p8) target bundleno = 3 (0x3), region = 78 }

</bundles_post_ra>
